<compile_context>
chip_gen: v5e
topology: v5e:2x2
jax: 0.10.0
libtpu: 0.0.40
codegen_flags: <defaults>
</compile_context>

<pallas_src>
import functools

import numpy as np
import jax
import jax.numpy as jnp
from jax.experimental import pallas as pl
from jax.experimental.pallas import tpu as pltpu


# ---------------------------------------------------------------------------
# Fused Pallas kernel: conv1+pool1 + conv2+pool2 + fc1 + fc2 + log_softmax
# ---------------------------------------------------------------------------

def _mycnn_kernel(x_ref, t1_ref, b1_ref, r1_ref, c1_ref,
                  t2_ref, b2_ref, r2_ref, c2_ref,
                  w1_ref, v1_ref, w2_ref, v2_ref, o_ref, *, num_class):
    f32, bf16 = jnp.float32, jnp.bfloat16

    def conv_relu_pool(slab, t_ref, b_ref, r_ref, c_ref):
        # slab: (Hp, S) f32 zero-padded input slab.  Conv = ONE deep-K MXU matmul:
        # concatenate the 5 row-shifted views along lanes -> (H, 5*S) @ (5*S, W*Cout).
        hp, s = slab.shape
        k = t_ref.shape[0] // s                       # kernel height (= 5)
        h = hp - (k - 1)                              # 'same' conv output rows
        lhs = jnp.concatenate([slab[kh:kh + h, :] for kh in range(k)],
                              axis=1).astype(bf16)    # single hoisted bf16 cast
        y = jnp.dot(lhs, t_ref[...], preferred_element_type=f32) + b_ref[...]
        y = jnp.maximum(y, 0.0)                       # bias + ReLU in f32

        # 2x2 max-pool: stacked even|odd selectors -> one matmul per axis, then max of
        # the two aligned halves.  The selectors also re-lay the pooled pixels out as
        # the next stage's zero-padded slab (unselected rows/lanes stay 0 = padding).
        rr = jnp.dot(r_ref[...], y, preferred_element_type=f32)
        nr = rr.shape[0] // 2
        yr = jnp.maximum(rr[:nr, :], rr[nr:, :])
        cc = jnp.dot(yr, c_ref[...], preferred_element_type=f32)
        nc = cc.shape[1] // 2
        return jnp.maximum(cc[:, :nc], cc[:, nc:])

    slab2 = conv_relu_pool(x_ref[0], t1_ref, b1_ref, r1_ref, c1_ref)   # (Hp2, S2)
    pooled = conv_relu_pool(slab2, t2_ref, b2_ref, r2_ref, c2_ref)     # (Ho2, Wo2*C2)

    # fc1 + ReLU (+ dropout = identity): fc1 rows are pre-permuted host-side so each
    # pooled row contracts against its own 128-row weight block (no in-kernel flatten).
    rows, fwid = pooled.shape
    h = v1_ref[...]                                                    # (1, 128) bias
    for y in range(rows):
        h = h + jnp.dot(pooled[y:y + 1, :].astype(bf16),
                        w1_ref[y * fwid:(y + 1) * fwid, :],
                        preferred_element_type=f32)
    h = jnp.maximum(h, 0.0)
    # TODO(synk): F.dropout(training=self.training) is identity here (inference mode);
    # training-mode masked dropout (p=0.5) is not emulated.

    # fc2 + masked log_softmax over the lane-dense (padded to 128) class dim.
    logits = jnp.dot(h.astype(bf16), w2_ref[...],
                     preferred_element_type=f32) + v2_ref[...]         # (1, 128)
    col = jax.lax.broadcasted_iota(jnp.int32, logits.shape, 1)
    logits = jnp.where(col < num_class, logits, -1e30)                 # mask pad classes
    m = jnp.max(logits, axis=-1, keepdims=True)
    s = logits - m
    lse = jnp.log(jnp.sum(jnp.exp(s), axis=-1, keepdims=True))
    o_ref[0] = (s - lse).astype(o_ref.dtype)


# ---------------------------------------------------------------------------
# pallas_call wrapper
# ---------------------------------------------------------------------------

_CONST_KEYS = ("T1", "b1", "R1", "C1", "T2", "b2", "R2", "C2",
               "fc1_w", "fc1_b", "fc2_w", "fc2_b")


def mycnn_forward(consts, x_nchw, *, num_class):
    N, cin, H, W = x_nchw.shape
    pad, ksize = 2, 5
    slab1 = consts["T1"].shape[0] // ksize
    Hp, Wp = H + 2 * pad, W + 2 * pad
    npad = consts["fc2_w"].shape[1]

    # The only host-side layout op: zero-padded, lane-dense input slab for conv1.
    x = jnp.transpose(x_nchw, (0, 2, 3, 1))                            # NCHW -> NHWC
    xp = jnp.pad(x, ((0, 0), (pad, pad), (pad, pad), (0, 0)))
    slab = jnp.pad(xp.reshape(N, Hp, Wp * cin),
                   ((0, 0), (0, 0), (0, slab1 - Wp * cin)))

    def const_spec(a):
        nd = a.ndim
        return pl.BlockSpec(a.shape, lambda n, _nd=nd: (0,) * _nd)     # resident const

    out = pl.pallas_call(
        functools.partial(_mycnn_kernel, num_class=num_class),
        out_shape=jax.ShapeDtypeStruct((N, 1, npad), jnp.float32),
        grid=(N,),
        in_specs=[pl.BlockSpec((1, Hp, slab1), lambda n: (n, 0, 0))]
                 + [const_spec(consts[k]) for k in _CONST_KEYS],
        out_specs=pl.BlockSpec((1, 1, npad), lambda n: (n, 0, 0)),
        compiler_params=pltpu.CompilerParams(dimension_semantics=("parallel",)),
    )(slab, *(consts[k] for k in _CONST_KEYS))
    return out[:, 0, :num_class]


# ---------------------------------------------------------------------------
# Host-side (numpy) constant construction from PyTorch-layout parameters
# ---------------------------------------------------------------------------

def _round_up(x, m):
    return (x + m - 1) // m * m


def _conv_pool_consts(w_oihw, b, h_in, w_in, *, in_slab_w, in_pix_shift,
                      out_rows, out_row_off, out_cols, mxu_dtype, ksize=5):
    """Toeplitz conv weights + stacked 2x2-maxpool selectors for one conv stage.

    in_pix_shift: padded-pixel p lives at input-slab lane (p + in_pix_shift)*Cin;
                  pixels mapping outside [0, in_slab_w) are dropped (zero padding).
    The pooled output is emitted directly on a (out_rows, out_cols) canvas:
    pooled row r -> canvas row r+out_row_off, pooled pixel j, channel c -> lane j*Cout+c.
    Unselected canvas rows/lanes stay zero (= next stage's padding).
    """
    w_np = np.asarray(w_oihw, np.float32)                 # (Cout, Cin, KH, KW)
    b_np = np.asarray(b, np.float32)
    cout, cin = w_np.shape[0], w_np.shape[1]

    T = np.zeros((ksize * in_slab_w, w_in * cout), np.float32)
    for kh in range(ksize):
        for kw in range(ksize):
            for ow in range(w_in):
                lane = (ow + kw + in_pix_shift) * cin
                if 0 <= lane and lane + cin <= in_slab_w:
                    T[kh * in_slab_w + lane: kh * in_slab_w + lane + cin,
                      ow * cout:(ow + 1) * cout] = w_np[:, :, kh, kw].T
    b_row = np.tile(b_np, w_in).reshape(1, w_in * cout)

    ho, wo = h_in // 2, w_in // 2
    R = np.zeros((2 * out_rows, h_in), np.float32)        # even | odd conv rows
    for r in range(ho):
        R[out_row_off + r, 2 * r] = 1.0
        R[out_rows + out_row_off + r, 2 * r + 1] = 1.0
    C = np.zeros((w_in * cout, 2 * out_cols), np.float32)  # even | odd pixel columns
    for j in range(wo):
        for c in range(cout):
            C[(2 * j) * cout + c, j * cout + c] = 1.0
            C[(2 * j + 1) * cout + c, out_cols + j * cout + c] = 1.0

    return dict(T=jnp.asarray(T, mxu_dtype), b=jnp.asarray(b_row),
                R=jnp.asarray(R), C=jnp.asarray(C))


def prepare_constants(params, h, w, num_class, mxu_dtype=jnp.bfloat16):
    pad, ksize = 2, 5
    cin1 = int(params["conv1_w"].shape[1])
    cout1 = int(params["conv1_w"].shape[0])
    cout2 = int(params["conv2_w"].shape[0])
    h2, w2 = h // 2, w // 2                               # conv2 spatial
    ho, wo = h // 4, w // 4                               # final pooled spatial

    slab1 = _round_up((w + 2 * pad) * cin1, 128)          # conv1 input slab width
    slab2 = _round_up((w2 + pad) * cout1, 128)            # conv2 input slab width

    c1 = _conv_pool_consts(params["conv1_w"], params["conv1_b"], h, w,
                           in_slab_w=slab1, in_pix_shift=0,
                           out_rows=h2 + 2 * pad, out_row_off=pad, out_cols=slab2,
                           mxu_dtype=mxu_dtype, ksize=ksize)
    c2 = _conv_pool_consts(params["conv2_w"], params["conv2_b"], h2, w2,
                           in_slab_w=slab2, in_pix_shift=-pad,
                           out_rows=ho, out_row_off=0, out_cols=wo * cout2,
                           mxu_dtype=mxu_dtype, ksize=ksize)
    consts = {"T1": c1["T"], "b1": c1["b"], "R1": c1["R"], "C1": c1["C"],
              "T2": c2["T"], "b2": c2["b"], "R2": c2["R"], "C2": c2["C"]}

    # fc1: transpose to (in, out) and permute rows so the kernel consumes the pooled
    # slab rows directly while matching PyTorch x.view(N,-1) on NCHW (c*Ho*Wo + y*Wo + x).
    w1 = np.asarray(params["fc1_w"], np.float32)          # (128, F) PyTorch (out, in)
    f_dim = w1.shape[1]
    perm = np.zeros(f_dim, np.int64)
    for y in range(ho):
        for x in range(wo):
            for c in range(cout2):
                perm[y * wo * cout2 + x * cout2 + c] = c * ho * wo + y * wo + x
    consts["fc1_w"] = jnp.asarray(w1.T[perm, :], mxu_dtype)           # (F, 128) bf16
    consts["fc1_b"] = jnp.asarray(np.asarray(params["fc1_b"], np.float32).reshape(1, -1))

    # fc2: transpose to (in, out), zero-pad classes to a lane-dense 128, pre-cast bf16.
    w2m = np.asarray(params["fc2_w"], np.float32)                     # (num_class, 128)
    npad = _round_up(max(num_class, 128), 128)
    w2k = np.zeros((w2m.shape[1], npad), np.float32); w2k[:, :num_class] = w2m.T
    b2k = np.zeros((1, npad), np.float32)
    b2k[0, :num_class] = np.asarray(params["fc2_b"], np.float32)
    consts["fc2_w"] = jnp.asarray(w2k, mxu_dtype)
    consts["fc2_b"] = jnp.asarray(b2k)
    return consts


def init_params(key, num_class, h, w):
    ks = jax.random.split(key, 8)
    p = {}
    p["conv1_w"] = 0.1 * jax.random.normal(ks[0], (16, 3, 5, 5), jnp.float32)
    p["conv1_b"] = 0.01 * jax.random.normal(ks[1], (16,), jnp.float32)
    p["conv2_w"] = 0.1 * jax.random.normal(ks[2], (32, 16, 5, 5), jnp.float32)
    p["conv2_b"] = 0.01 * jax.random.normal(ks[3], (32,), jnp.float32)
    fc1_in = 32 * (h // 4) * (w // 4)                     # analogue of 32*75*75
    p["fc1_w"] = 0.05 * jax.random.normal(ks[4], (128, fc1_in), jnp.float32)
    p["fc1_b"] = 0.01 * jax.random.normal(ks[5], (128,), jnp.float32)
    p["fc2_w"] = 0.05 * jax.random.normal(ks[6], (num_class, 128), jnp.float32)
    p["fc2_b"] = 0.01 * jax.random.normal(ks[7], (num_class,), jnp.float32)
    return p


# ---------------------------------------------------------------------------
# Pure-JAX reference (for a loose-tolerance correctness check)
# ---------------------------------------------------------------------------

def mycnn_reference(params, x_nchw, num_class):
    def conv(x, w, b):
        y = jax.lax.conv_general_dilated(
            x, w, (1, 1), ((2, 2), (2, 2)),
            dimension_numbers=("NCHW", "OIHW", "NCHW"))
        return jax.nn.relu(y + b[None, :, None, None])

    def pool(x):
        return jax.lax.reduce_window(x, -jnp.inf, jax.lax.max,
                                     (1, 1, 2, 2), (1, 1, 2, 2), "VALID")

    x = pool(conv(x_nchw, params["conv1_w"], params["conv1_b"]))
    x = pool(conv(x, params["conv2_w"], params["conv2_b"]))
    x = x.reshape(x.shape[0], -1)
    x = jax.nn.relu(x @ params["fc1_w"].T + params["fc1_b"])
    x = x @ params["fc2_w"].T + params["fc2_b"]
    return jax.nn.log_softmax(x, axis=-1)


if __name__ == "__main__":
    NUM_CLASS = 10
    N, C, H, W = 2, 3, 16, 16

    key = jax.random.PRNGKey(0)
    k_x, k_p = jax.random.split(key)
    x = jax.random.normal(k_x, (N, C, H, W), jnp.float32)
    params = init_params(k_p, NUM_CLASS, H, W)
    consts = prepare_constants(params, H, W, NUM_CLASS)

    fwd = jax.jit(functools.partial(mycnn_forward, num_class=NUM_CLASS))
    out = jax.block_until_ready(fwd(consts, x))

    assert out.shape == (N, NUM_CLASS)
    assert bool(jnp.all(jnp.isfinite(out)))
    # log-softmax rows must exponentiate-sum to 1
    assert jnp.allclose(jnp.sum(jnp.exp(out), axis=-1), 1.0, atol=1e-4)
    # match the pure-JAX reference (bf16 MXU operands -> loose tolerance)
    ref = mycnn_reference(params, x, NUM_CLASS)
    assert float(jnp.max(jnp.abs(out - ref))) < 0.1
    print("KERNEL_OK")
</pallas_src>

<mosaic_0001>
module attributes {stable_mosaic.version = 11 : i64} {
  func.func @_mycnn_kernel(%arg0: i32, %arg1: memref<1x20x128xf32, #tpu.memory_space<vmem>>, %arg2: memref<640x256xbf16, #tpu.memory_space<vmem>>, %arg3: memref<1x256xf32, #tpu.memory_space<vmem>>, %arg4: memref<24x16xf32, #tpu.memory_space<vmem>>, %arg5: memref<256x512xf32, #tpu.memory_space<vmem>>, %arg6: memref<1280x256xbf16, #tpu.memory_space<vmem>>, %arg7: memref<1x256xf32, #tpu.memory_space<vmem>>, %arg8: memref<8x8xf32, #tpu.memory_space<vmem>>, %arg9: memref<256x256xf32, #tpu.memory_space<vmem>>, %arg10: memref<512x128xbf16, #tpu.memory_space<vmem>>, %arg11: memref<1x128xf32, #tpu.memory_space<vmem>>, %arg12: memref<128x128xbf16, #tpu.memory_space<vmem>>, %arg13: memref<1x128xf32, #tpu.memory_space<vmem>>, %arg14: memref<1x1x128xf32, #tpu.memory_space<vmem>>) attributes {dimension_semantics = [#tpu.dimension_semantics<parallel>], iteration_bounds = array<i64: 2>, scalar_prefetch = 0 : i64, scratch_operands = 0 : i64, tpu.core_type = #tpu.core_type<tc>, window_params = [{transform_indices = @transform_0, window_bounds = array<i64: 1, 20, 128>}, {pipeline_mode = #tpu.pipeline_mode<synchronous>, transform_indices = @transform_1, window_bounds = array<i64: 640, 256>}, {pipeline_mode = #tpu.pipeline_mode<synchronous>, transform_indices = @transform_2, window_bounds = array<i64: 1, 256>}, {pipeline_mode = #tpu.pipeline_mode<synchronous>, transform_indices = @transform_3, window_bounds = array<i64: 24, 16>}, {pipeline_mode = #tpu.pipeline_mode<synchronous>, transform_indices = @transform_4, window_bounds = array<i64: 256, 512>}, {pipeline_mode = #tpu.pipeline_mode<synchronous>, transform_indices = @transform_5, window_bounds = array<i64: 1280, 256>}, {pipeline_mode = #tpu.pipeline_mode<synchronous>, transform_indices = @transform_6, window_bounds = array<i64: 1, 256>}, {pipeline_mode = #tpu.pipeline_mode<synchronous>, transform_indices = @transform_7, window_bounds = array<i64: 8, 8>}, {pipeline_mode = #tpu.pipeline_mode<synchronous>, transform_indices = @transform_8, window_bounds = array<i64: 256, 256>}, {pipeline_mode = #tpu.pipeline_mode<synchronous>, transform_indices = @transform_9, window_bounds = array<i64: 512, 128>}, {pipeline_mode = #tpu.pipeline_mode<synchronous>, transform_indices = @transform_10, window_bounds = array<i64: 1, 128>}, {pipeline_mode = #tpu.pipeline_mode<synchronous>, transform_indices = @transform_11, window_bounds = array<i64: 128, 128>}, {pipeline_mode = #tpu.pipeline_mode<synchronous>, transform_indices = @transform_12, window_bounds = array<i64: 1, 128>}, {transform_indices = @transform_13, window_bounds = array<i64: 1, 1, 128>}]} {
    %c0 = arith.constant 0 : index
    %c0_0 = arith.constant 0 : index
    %c0_1 = arith.constant 0 : index
    %0 = vector.load %arg1[%c0, %c0_0, %c0_1] : memref<1x20x128xf32, #tpu.memory_space<vmem>>, vector<1x20x128xf32>
    %1 = vector.shape_cast %0 : vector<1x20x128xf32> to vector<20x128xf32>
    %2 = vector.extract_strided_slice %1 {offsets = [0, 0], sizes = [16, 128], strides = [1, 1]} : vector<20x128xf32> to vector<16x128xf32>
    %3 = vector.extract_strided_slice %1 {offsets = [1, 0], sizes = [16, 128], strides = [1, 1]} : vector<20x128xf32> to vector<16x128xf32>
    %4 = vector.extract_strided_slice %1 {offsets = [2, 0], sizes = [16, 128], strides = [1, 1]} : vector<20x128xf32> to vector<16x128xf32>
    %5 = vector.extract_strided_slice %1 {offsets = [3, 0], sizes = [16, 128], strides = [1, 1]} : vector<20x128xf32> to vector<16x128xf32>
    %6 = vector.extract_strided_slice %1 {offsets = [4, 0], sizes = [16, 128], strides = [1, 1]} : vector<20x128xf32> to vector<16x128xf32>
    %7 = tpu.concatenate %2, %3, %4, %5, %6 in 1 : vector<16x128xf32>, vector<16x128xf32>, vector<16x128xf32>, vector<16x128xf32>, vector<16x128xf32> -> vector<16x640xf32>
    %8 = arith.truncf %7 : vector<16x640xf32> to vector<16x640xbf16>
    %c0_2 = arith.constant 0 : index
    %c0_3 = arith.constant 0 : index
    %9 = vector.load %arg2[%c0_2, %c0_3] : memref<640x256xbf16, #tpu.memory_space<vmem>>, vector<640x256xbf16>
    %cst = arith.constant dense<0.000000e+00> : vector<16x256xf32>
    %10 = tpu.matmul %8, %9, %cst {dimension_numbers = #tpu.dot_dimension_numbers<[1], [0], [0], [1], [0, 0, 1, 1], [], []>} : vector<16x640xbf16>, vector<640x256xbf16>, vector<16x256xf32> -> vector<16x256xf32>
    %c0_4 = arith.constant 0 : index
    %c0_5 = arith.constant 0 : index
    %11 = vector.load %arg3[%c0_4, %c0_5] : memref<1x256xf32, #tpu.memory_space<vmem>>, vector<1x256xf32>
    %12 = vector.broadcast %11 : vector<1x256xf32> to vector<16x256xf32>
    %13 = arith.addf %10, %12 : vector<16x256xf32>
    %cst_6 = arith.constant 0.000000e+00 : f32
    %14 = vector.broadcast %cst_6 : f32 to vector<16x256xf32>
    %15 = arith.maximumf %13, %14 : vector<16x256xf32>
    %c0_7 = arith.constant 0 : index
    %c0_8 = arith.constant 0 : index
    %16 = vector.load %arg4[%c0_7, %c0_8] : memref<24x16xf32, #tpu.memory_space<vmem>>, vector<24x16xf32>
    %cst_9 = arith.constant dense<0.000000e+00> : vector<24x256xf32>
    %17 = tpu.matmul %16, %15, %cst_9 {dimension_numbers = #tpu.dot_dimension_numbers<[1], [0], [0], [1], [0, 0, 1, 1], [], []>} : vector<24x16xf32>, vector<16x256xf32>, vector<24x256xf32> -> vector<24x256xf32>
    %18 = vector.extract_strided_slice %17 {offsets = [0, 0], sizes = [12, 256], strides = [1, 1]} : vector<24x256xf32> to vector<12x256xf32>
    %19 = vector.extract_strided_slice %17 {offsets = [12, 0], sizes = [12, 256], strides = [1, 1]} : vector<24x256xf32> to vector<12x256xf32>
    %20 = arith.maximumf %18, %19 : vector<12x256xf32>
    %c0_10 = arith.constant 0 : index
    %c0_11 = arith.constant 0 : index
    %21 = vector.load %arg5[%c0_10, %c0_11] : memref<256x512xf32, #tpu.memory_space<vmem>>, vector<256x512xf32>
    %cst_12 = arith.constant dense<0.000000e+00> : vector<12x512xf32>
    %22 = tpu.matmul %20, %21, %cst_12 {dimension_numbers = #tpu.dot_dimension_numbers<[1], [0], [0], [1], [0, 0, 1, 1], [], []>} : vector<12x256xf32>, vector<256x512xf32>, vector<12x512xf32> -> vector<12x512xf32>
    %23 = vector.extract_strided_slice %22 {offsets = [0, 0], sizes = [12, 256], strides = [1, 1]} : vector<12x512xf32> to vector<12x256xf32>
    %24 = vector.extract_strided_slice %22 {offsets = [0, 256], sizes = [12, 256], strides = [1, 1]} : vector<12x512xf32> to vector<12x256xf32>
    %25 = arith.maximumf %23, %24 : vector<12x256xf32>
    %26 = vector.extract_strided_slice %25 {offsets = [0, 0], sizes = [8, 256], strides = [1, 1]} : vector<12x256xf32> to vector<8x256xf32>
    %27 = vector.extract_strided_slice %25 {offsets = [1, 0], sizes = [8, 256], strides = [1, 1]} : vector<12x256xf32> to vector<8x256xf32>
    %28 = vector.extract_strided_slice %25 {offsets = [2, 0], sizes = [8, 256], strides = [1, 1]} : vector<12x256xf32> to vector<8x256xf32>
    %29 = vector.extract_strided_slice %25 {offsets = [3, 0], sizes = [8, 256], strides = [1, 1]} : vector<12x256xf32> to vector<8x256xf32>
    %30 = vector.extract_strided_slice %25 {offsets = [4, 0], sizes = [8, 256], strides = [1, 1]} : vector<12x256xf32> to vector<8x256xf32>
    %31 = tpu.concatenate %26, %27, %28, %29, %30 in 1 : vector<8x256xf32>, vector<8x256xf32>, vector<8x256xf32>, vector<8x256xf32>, vector<8x256xf32> -> vector<8x1280xf32>
    %32 = arith.truncf %31 : vector<8x1280xf32> to vector<8x1280xbf16>
    %c0_13 = arith.constant 0 : index
    %c0_14 = arith.constant 0 : index
    %33 = vector.load %arg6[%c0_13, %c0_14] : memref<1280x256xbf16, #tpu.memory_space<vmem>>, vector<1280x256xbf16>
    %cst_15 = arith.constant dense<0.000000e+00> : vector<8x256xf32>
    %34 = tpu.matmul %32, %33, %cst_15 {dimension_numbers = #tpu.dot_dimension_numbers<[1], [0], [0], [1], [0, 0, 1, 1], [], []>} : vector<8x1280xbf16>, vector<1280x256xbf16>, vector<8x256xf32> -> vector<8x256xf32>
    %c0_16 = arith.constant 0 : index
    %c0_17 = arith.constant 0 : index
    %35 = vector.load %arg7[%c0_16, %c0_17] : memref<1x256xf32, #tpu.memory_space<vmem>>, vector<1x256xf32>
    %36 = vector.broadcast %35 : vector<1x256xf32> to vector<8x256xf32>
    %37 = arith.addf %34, %36 : vector<8x256xf32>
    %cst_18 = arith.constant 0.000000e+00 : f32
    %38 = vector.broadcast %cst_18 : f32 to vector<8x256xf32>
    %39 = arith.maximumf %37, %38 : vector<8x256xf32>
    %c0_19 = arith.constant 0 : index
    %c0_20 = arith.constant 0 : index
    %40 = vector.load %arg8[%c0_19, %c0_20] : memref<8x8xf32, #tpu.memory_space<vmem>>, vector<8x8xf32>
    %cst_21 = arith.constant dense<0.000000e+00> : vector<8x256xf32>
    %41 = tpu.matmul %40, %39, %cst_21 {dimension_numbers = #tpu.dot_dimension_numbers<[1], [0], [0], [1], [0, 0, 1, 1], [], []>} : vector<8x8xf32>, vector<8x256xf32>, vector<8x256xf32> -> vector<8x256xf32>
    %42 = vector.extract_strided_slice %41 {offsets = [0, 0], sizes = [4, 256], strides = [1, 1]} : vector<8x256xf32> to vector<4x256xf32>
    %43 = vector.extract_strided_slice %41 {offsets = [4, 0], sizes = [4, 256], strides = [1, 1]} : vector<8x256xf32> to vector<4x256xf32>
    %44 = arith.maximumf %42, %43 : vector<4x256xf32>
    %c0_22 = arith.constant 0 : index
    %c0_23 = arith.constant 0 : index
    %45 = vector.load %arg9[%c0_22, %c0_23] : memref<256x256xf32, #tpu.memory_space<vmem>>, vector<256x256xf32>
    %cst_24 = arith.constant dense<0.000000e+00> : vector<4x256xf32>
    %46 = tpu.matmul %44, %45, %cst_24 {dimension_numbers = #tpu.dot_dimension_numbers<[1], [0], [0], [1], [0, 0, 1, 1], [], []>} : vector<4x256xf32>, vector<256x256xf32>, vector<4x256xf32> -> vector<4x256xf32>
    %47 = vector.extract_strided_slice %46 {offsets = [0, 0], sizes = [4, 128], strides = [1, 1]} : vector<4x256xf32> to vector<4x128xf32>
    %48 = vector.extract_strided_slice %46 {offsets = [0, 128], sizes = [4, 128], strides = [1, 1]} : vector<4x256xf32> to vector<4x128xf32>
    %49 = arith.maximumf %47, %48 : vector<4x128xf32>
    %c0_25 = arith.constant 0 : index
    %c0_26 = arith.constant 0 : index
    %50 = vector.load %arg11[%c0_25, %c0_26] : memref<1x128xf32, #tpu.memory_space<vmem>>, vector<1x128xf32>
    %51 = vector.extract_strided_slice %49 {offsets = [0, 0], sizes = [1, 128], strides = [1, 1]} : vector<4x128xf32> to vector<1x128xf32>
    %52 = arith.truncf %51 : vector<1x128xf32> to vector<1x128xbf16>
    %c0_27 = arith.constant 0 : index
    %c0_28 = arith.constant 0 : index
    %53 = vector.load %arg10[%c0_27, %c0_28] : memref<512x128xbf16, #tpu.memory_space<vmem>>, vector<128x128xbf16>
    %cst_29 = arith.constant dense<0.000000e+00> : vector<1x128xf32>
    %54 = tpu.matmul %52, %53, %cst_29 {dimension_numbers = #tpu.dot_dimension_numbers<[1], [0], [0], [1], [0, 0, 1, 1], [], []>} : vector<1x128xbf16>, vector<128x128xbf16>, vector<1x128xf32> -> vector<1x128xf32>
    %55 = arith.addf %50, %54 : vector<1x128xf32>
    %56 = vector.extract_strided_slice %49 {offsets = [1, 0], sizes = [1, 128], strides = [1, 1]} : vector<4x128xf32> to vector<1x128xf32>
    %57 = arith.truncf %56 : vector<1x128xf32> to vector<1x128xbf16>
    %c128 = arith.constant 128 : index
    %c0_30 = arith.constant 0 : index
    %58 = vector.load %arg10[%c128, %c0_30] : memref<512x128xbf16, #tpu.memory_space<vmem>>, vector<128x128xbf16>
    %cst_31 = arith.constant dense<0.000000e+00> : vector<1x128xf32>
    %59 = tpu.matmul %57, %58, %cst_31 {dimension_numbers = #tpu.dot_dimension_numbers<[1], [0], [0], [1], [0, 0, 1, 1], [], []>} : vector<1x128xbf16>, vector<128x128xbf16>, vector<1x128xf32> -> vector<1x128xf32>
    %60 = arith.addf %55, %59 : vector<1x128xf32>
    %61 = vector.extract_strided_slice %49 {offsets = [2, 0], sizes = [1, 128], strides = [1, 1]} : vector<4x128xf32> to vector<1x128xf32>
    %62 = arith.truncf %61 : vector<1x128xf32> to vector<1x128xbf16>
    %c256 = arith.constant 256 : index
    %c0_32 = arith.constant 0 : index
    %63 = vector.load %arg10[%c256, %c0_32] : memref<512x128xbf16, #tpu.memory_space<vmem>>, vector<128x128xbf16>
    %cst_33 = arith.constant dense<0.000000e+00> : vector<1x128xf32>
    %64 = tpu.matmul %62, %63, %cst_33 {dimension_numbers = #tpu.dot_dimension_numbers<[1], [0], [0], [1], [0, 0, 1, 1], [], []>} : vector<1x128xbf16>, vector<128x128xbf16>, vector<1x128xf32> -> vector<1x128xf32>
    %65 = arith.addf %60, %64 : vector<1x128xf32>
    %66 = vector.extract_strided_slice %49 {offsets = [3, 0], sizes = [1, 128], strides = [1, 1]} : vector<4x128xf32> to vector<1x128xf32>
    %67 = arith.truncf %66 : vector<1x128xf32> to vector<1x128xbf16>
    %c384 = arith.constant 384 : index
    %c0_34 = arith.constant 0 : index
    %68 = vector.load %arg10[%c384, %c0_34] : memref<512x128xbf16, #tpu.memory_space<vmem>>, vector<128x128xbf16>
    %cst_35 = arith.constant dense<0.000000e+00> : vector<1x128xf32>
    %69 = tpu.matmul %67, %68, %cst_35 {dimension_numbers = #tpu.dot_dimension_numbers<[1], [0], [0], [1], [0, 0, 1, 1], [], []>} : vector<1x128xbf16>, vector<128x128xbf16>, vector<1x128xf32> -> vector<1x128xf32>
    %70 = arith.addf %65, %69 : vector<1x128xf32>
    %cst_36 = arith.constant 0.000000e+00 : f32
    %71 = vector.broadcast %cst_36 : f32 to vector<1x128xf32>
    %72 = arith.maximumf %70, %71 : vector<1x128xf32>
    %73 = arith.truncf %72 : vector<1x128xf32> to vector<1x128xbf16>
    %c0_37 = arith.constant 0 : index
    %c0_38 = arith.constant 0 : index
    %74 = vector.load %arg12[%c0_37, %c0_38] : memref<128x128xbf16, #tpu.memory_space<vmem>>, vector<128x128xbf16>
    %cst_39 = arith.constant dense<0.000000e+00> : vector<1x128xf32>
    %75 = tpu.matmul %73, %74, %cst_39 {dimension_numbers = #tpu.dot_dimension_numbers<[1], [0], [0], [1], [0, 0, 1, 1], [], []>} : vector<1x128xbf16>, vector<128x128xbf16>, vector<1x128xf32> -> vector<1x128xf32>
    %c0_40 = arith.constant 0 : index
    %c0_41 = arith.constant 0 : index
    %76 = vector.load %arg13[%c0_40, %c0_41] : memref<1x128xf32, #tpu.memory_space<vmem>>, vector<1x128xf32>
    %77 = arith.addf %75, %76 : vector<1x128xf32>
    %78 = tpu.iota {dimensions = array<i32: 1>} : vector<1x128xi32>
    %c10_i32 = arith.constant 10 : i32
    %79 = vector.broadcast %c10_i32 : i32 to vector<1x128xi32>
    %80 = arith.cmpi slt, %78, %79 : vector<1x128xi32>
    %cst_42 = arith.constant -1.000000e+30 : f32
    %81 = vector.broadcast %cst_42 : f32 to vector<1x128xf32>
    %82 = arith.select %80, %77, %81 : vector<1x128xi1>, vector<1x128xf32>
    %cst_43 = arith.constant dense<0xFF800000> : vector<1xf32>
    %83 = vector.multi_reduction <maximumf>, %82, %cst_43 [1] : vector<1x128xf32> to vector<1xf32>
    %84 = vector.shape_cast %83 : vector<1xf32> to vector<1x1xf32>
    %85 = vector.broadcast %84 : vector<1x1xf32> to vector<1x128xf32>
    %86 = arith.subf %82, %85 : vector<1x128xf32>
    %87 = math.exp %86 : vector<1x128xf32>
    %cst_44 = arith.constant dense<0.000000e+00> : vector<1xf32>
    %88 = vector.multi_reduction <add>, %87, %cst_44 [1] : vector<1x128xf32> to vector<1xf32>
    %89 = vector.shape_cast %88 : vector<1xf32> to vector<1x1xf32>
    %90 = math.log %89 : vector<1x1xf32>
    %91 = vector.broadcast %90 : vector<1x1xf32> to vector<1x128xf32>
    %92 = arith.subf %86, %91 : vector<1x128xf32>
    %c0_45 = arith.constant 0 : index
    %c0_46 = arith.constant 0 : index
    %c0_47 = arith.constant 0 : index
    %93 = vector.load %arg14[%c0_45, %c0_46, %c0_47] : memref<1x1x128xf32, #tpu.memory_space<vmem>>, vector<1x1x128xf32>
    %94 = vector.shape_cast %93 : vector<1x1x128xf32> to vector<1x128xf32>
    %95 = vector.shape_cast %92 : vector<1x128xf32> to vector<1x1x128xf32>
    tpu.vector_store %arg14[%c0_45, %c0_46, %c0_47], %95 {strides = array<i32>} : memref<1x1x128xf32, #tpu.memory_space<vmem>>, vector<1x1x128xf32>,
    return
  }
  func.func @transform_0(%arg0: i32) -> (i32, i32, i32) {
    %c0_i32 = arith.constant 0 : i32
    %c0_i32_0 = arith.constant 0 : i32
    %c0_i32_1 = arith.constant 0 : i32
    return %arg0, %c0_i32, %c0_i32_0 : i32, i32, i32
  }
  func.func @transform_1(%arg0: i32) -> (i32, i32) {
    %c0_i32 = arith.constant 0 : i32
    %c0_i32_0 = arith.constant 0 : i32
    %c0_i32_1 = arith.constant 0 : i32
    return %c0_i32, %c0_i32_0 : i32, i32
  }
  func.func @transform_2(%arg0: i32) -> (i32, i32) {
    %c0_i32 = arith.constant 0 : i32
    %c0_i32_0 = arith.constant 0 : i32
    %c0_i32_1 = arith.constant 0 : i32
    return %c0_i32, %c0_i32_0 : i32, i32
  }
  func.func @transform_3(%arg0: i32) -> (i32, i32) {
    %c0_i32 = arith.constant 0 : i32
    %c0_i32_0 = arith.constant 0 : i32
    %c0_i32_1 = arith.constant 0 : i32
    return %c0_i32, %c0_i32_0 : i32, i32
  }
  func.func @transform_4(%arg0: i32) -> (i32, i32) {
    %c0_i32 = arith.constant 0 : i32
    %c0_i32_0 = arith.constant 0 : i32
    %c0_i32_1 = arith.constant 0 : i32
    return %c0_i32, %c0_i32_0 : i32, i32
  }
  func.func @transform_5(%arg0: i32) -> (i32, i32) {
    %c0_i32 = arith.constant 0 : i32
    %c0_i32_0 = arith.constant 0 : i32
    %c0_i32_1 = arith.constant 0 : i32
    return %c0_i32, %c0_i32_0 : i32, i32
  }
  func.func @transform_6(%arg0: i32) -> (i32, i32) {
    %c0_i32 = arith.constant 0 : i32
    %c0_i32_0 = arith.constant 0 : i32
    %c0_i32_1 = arith.constant 0 : i32
    return %c0_i32, %c0_i32_0 : i32, i32
  }
  func.func @transform_7(%arg0: i32) -> (i32, i32) {
    %c0_i32 = arith.constant 0 : i32
    %c0_i32_0 = arith.constant 0 : i32
    %c0_i32_1 = arith.constant 0 : i32
    return %c0_i32, %c0_i32_0 : i32, i32
  }
  func.func @transform_8(%arg0: i32) -> (i32, i32) {
    %c0_i32 = arith.constant 0 : i32
    %c0_i32_0 = arith.constant 0 : i32
    %c0_i32_1 = arith.constant 0 : i32
    return %c0_i32, %c0_i32_0 : i32, i32
  }
  func.func @transform_9(%arg0: i32) -> (i32, i32) {
    %c0_i32 = arith.constant 0 : i32
    %c0_i32_0 = arith.constant 0 : i32
    %c0_i32_1 = arith.constant 0 : i32
    return %c0_i32, %c0_i32_0 : i32, i32
  }
  func.func @transform_10(%arg0: i32) -> (i32, i32) {
    %c0_i32 = arith.constant 0 : i32
    %c0_i32_0 = arith.constant 0 : i32
    %c0_i32_1 = arith.constant 0 : i32
    return %c0_i32, %c0_i32_0 : i32, i32
  }
  func.func @transform_11(%arg0: i32) -> (i32, i32) {
    %c0_i32 = arith.constant 0 : i32
    %c0_i32_0 = arith.constant 0 : i32
    %c0_i32_1 = arith.constant 0 : i32
    return %c0_i32, %c0_i32_0 : i32, i32
  }
  func.func @transform_12(%arg0: i32) -> (i32, i32) {
    %c0_i32 = arith.constant 0 : i32
    %c0_i32_0 = arith.constant 0 : i32
    %c0_i32_1 = arith.constant 0 : i32
    return %c0_i32, %c0_i32_0 : i32, i32
  }
  func.func @transform_13(%arg0: i32) -> (i32, i32, i32) {
    %c0_i32 = arith.constant 0 : i32
    %c0_i32_0 = arith.constant 0 : i32
    %c0_i32_1 = arith.constant 0 : i32
    return %arg0, %c0_i32, %c0_i32_0 : i32, i32, i32
  }
}

</mosaic_0001>

<bundles_post_ra>
// kernel: mycnn_forward.1
= control target key start
LH: loop header
LB: loop body
LE: loop exit
PB: predicated region body
PF: predicated region fallthrough
CT: control target
= control target key end

     0   :  { %s6488_s0 = inlined_call_operand.vmem [shape: f32[2,20,128], index: 0, kind: input, shape index: {}]   ;;  %s6489_s1 = inlined_call_operand.vmem [shape: bf16[640,256], index: 1, kind: input, shape index: {}]   ;;  %s6490_s2 = inlined_call_operand.vmem [shape: f32[1,256], index: 2, kind: input, shape index: {}]   ;;  %s6491_s3 = inlined_call_operand.vmem [shape: f32[24,16], index: 3, kind: input, shape index: {}]   ;;  %s6492_s4 = inlined_call_operand.hbm [shape: f32[256,512], index: 4, kind: input, shape index: {}]   ;;  %s6493_s5 = inlined_call_operand.hbm [shape: bf16[1280,256], index: 5, kind: input, shape index: {}]   ;;  %s6494_s6 = inlined_call_operand.hbm [shape: f32[1,256], index: 6, kind: input, shape index: {}]   ;;  %s6495_s7 = inlined_call_operand.hbm [shape: f32[8,8], index: 7, kind: input, shape index: {}]   ;;  %s6496_s8 = inlined_call_operand.hbm [shape: f32[256,256], index: 8, kind: input, shape index: {}]   ;;  %s6497_s9 = inlined_call_operand.hbm [shape: bf16[512,128], index: 9, kind: input, shape index: {}]   ;;  %s6498_s10 = inlined_call_operand.hbm [shape: f32[1,128], index: 10, kind: input, shape index: {}]   ;;  %s6499_s11 = inlined_call_operand.vmem [shape: bf16[128,128], index: 11, kind: input, shape index: {}]   ;;  %s6500_s12 = inlined_call_operand.hbm [shape: f32[1,128], index: 12, kind: input, shape index: {}]   ;;  %s6501_s13 = inlined_call_operand.hbm [shape: f32[2,1,128], index: 13, kind: output, shape index: {}]  }
   0x1   :  { %6511 = sst [smem:[#allocation30_spill]] %s6493_s5 }
   0x2   :  { %6512 = sst [smem:[#allocation31_spill]] %s6495_s7 }
   0x3   :  { %6513 = sst [smem:[#allocation32_spill]] %s6501_s13 }
   0x4   :  { %18 = vsyncpa [#allocation3], 0 }
   0x5   :  { %19 = vsyncpa [#allocation6], 0 }
   0x6   :  { %20 = vsyncpa [#allocation9], 0 }
   0x7   :  { %21 = vsyncpa [#allocation12], 0 }
   0x8   :  { %22 = vsyncpa [#allocation15], 0 }
   0x9   :  { %23 = vsyncpa [#allocation4], 0 }
   0xa   :  { %25 = vsyncpa [#allocation4 + $0x1], 0  ;;  %s5649_s25 = smov 0   ;;  %s5651_s26 = smov 0  }
   0xb   :  { %s5653_s27 = smov 0   ;;  %s5655_s28 = smov 0  }
   0xc LB: > { %6514 = sst [smem:[#allocation23_spill]] %s5549_s25  ;;  %s5670_s29 = sadd.s32 4294967295, %s5561_s28   ;;  %s5561_s28 = sphi %s5655_s28, %s6533_s28   ;;  %s5557_s27 = sphi %s5653_s27, %s6535_s27   ;;  %s5553_s26 = sphi %s5651_s26, %s6537_s26   ;;  %s5549_s25 = sphi %s5649_s25, %s6536_s25  }
   0xd   : > { %6515 = sst [smem:[#allocation24_spill]] %s5557_s27  ;;  %s3675_s30 = sadd.s32 4294967294, %s5561_s28  }
   0xe   : > { %6516 = sst [smem:[#allocation25_spill]] %s5561_s28  ;;  %s5674_s14 = sadd.s32 1, %s5561_s28  }
   0xf   : > { %6517 = sst [smem:[#allocation26_spill]] %s5674_s14  ;;  %s316_s15 = sadd.s32 1, %s5557_s27 }
  0x10   : > { %s313_s16 = ssub.s32 %s5561_s28, %s5674_s14  ;;  %p326_p0 = scmp.ne.s32.totalorder %s5557_s27, %s5553_s26 }
  0x11   : > { %p314_p1 = scmp.eq.s32.totalorder %s313_s16, 0  ;;  %p327_p2 = scmp.eq.s32.totalorder %s5670_s29, 1 }
  0x12   : > { %p332_p3 = scmp.ne.s32.totalorder %s5553_s26, %s5549_s25  ;;  %p333_p4 = scmp.eq.s32.totalorder %s3675_s30, 1 }
  0x13   : > { %s5685_s17 = scalar_select %p314_p1, %s5557_s27, %s316_s15  }
  0x14   : > { %p5687_p5 = por %p327_p2, %p326_p0  ;;  %p5691_p6 = por %p333_p4, %p332_p3 }
  0x15   : > { %6518 = sst [smem:[#allocation27_spill]] %s5685_s17  ;;  %p3676_p7 = scmp.ge.s32.totalorder %s5561_s28, 1 }
  0x16   : > { %s6519_s18 = scalar_select %p5687_p5, 1, 0 }
  0x17   : > { %s6521_s19 = scalar_select %p5691_p6, 1, 0 }
  0x18   : > { %6520 = sst [smem:[#allocation28_spill]] %s6519_s18  ;;  %p340_p8 = scmp.lt.s32.totalorder %s5561_s28, 3 }
  0x19   : > { %6522 = sst [smem:[#allocation29_spill]] %s6521_s19  ;;  %p5170_p9 = scmp.eq.s32.totalorder %s5670_s29, 0 }
  0x1a   : > { %p5698_p10 = pnand %p3676_p7, %p340_p8  ;;  %s6524_s5 = sld [smem:[#allocation30_spill]] }
  0x1b   : > { %s5563_s24 = smov [#allocation5]   ;;  %s6526_s7 = sld [smem:[#allocation31_spill]] }
  0x1c   : > { %p5141_p11 = pneg %p5698_p10  ;;  %s376_s30 = sshll.u32 %s5563_s24, 4  ;;  %s377_s30 = int_to_ptr.vmem [resolvable:$true] %s376_s30 }
  0x1d   : > { %s5564_s21 = smov 128   ;;  %s5565_s22 = smov 8  }
  0x1e   : > { %p5709_p12 = pnand %p5170_p9, %p5141_p11  ;;  %s426_s25 = sshll.u32 %s6497_s9, 4  ;;  %s427_s25 = int_to_ptr.hbm [resolvable:$true] %s426_s25 }
  0x1f   : > { %s5567_s17 = smov [#allocation11]   ;;  %s360_s18 = sshll.u32 %s6492_s4, 4  ;;  %s361_s18 = int_to_ptr.hbm [resolvable:$true] %s360_s18 }
  0x20   : > { %s374_s23 = sshll.u32 %s6524_s5, 4  ;;  %s5566_s5 = smov [#allocation8]   ;;  %s375_s23 = int_to_ptr.hbm [resolvable:$true] %s374_s23 }
  0x21   : > { %s401_s27 = sshll.u32 %s6526_s7, 4  ;;  %s403_s24 = sshll.u32 %s5566_s5, 4  ;;  %s402_s27 = int_to_ptr.hbm [resolvable:$true] %s401_s27  ;;  %s404_s24 = int_to_ptr.vmem [resolvable:$true] %s403_s24 }
  0x22   : > { %5147 = dma.hbm_to_vmem [thread:$0]  (!%p5709_p12), %s375_s23, 20480, %s377_s30, [#allocation6], %s5564_s21, %s5564_s21, %s5565_s22  }
  0x23   : > { %5153 = dma.hbm_to_vmem [thread:$0]  (!%p5709_p12), %s402_s27, 128, %s404_s24, [#allocation9]  }
  0x24   : > { %s428_s16 = sshll.u32 %s5567_s17, 4  ;;  %s5568_s13 = smov 64   ;;  %s429_s16 = int_to_ptr.vmem [resolvable:$true] %s428_s16 }
  0x25   : > { %s5569_s23 = smov 4   ;;  %s5570_s5 = smov [#allocation2]  }
  0x26   : > { %5159 = dma.hbm_to_vmem [thread:$0]  (!%p5709_p12), %s427_s25, 4096, %s429_s16, [#allocation12], %s5568_s13, %s5568_s13, %s5569_s23  }
  0x27   : > { %s362_s14 = sshll.u32 %s5570_s5, 4  ;;  %s5571_s19 = smov 512   ;;  %s363_s14 = int_to_ptr.vmem [resolvable:$true] %s362_s14 }
  0x28   : > { %s5572_s30 = smov 32   ;;  %s389_s22 = sshll.u32 %s6494_s6, 4  ;;  %s390_s22 = int_to_ptr.hbm [resolvable:$true] %s389_s22 }
  0x29   : > { %5144 = dma.hbm_to_vmem [thread:$0]  (!%p5709_p12), %s361_s18, 16384, %s363_s14, [#allocation3], %s5571_s19, %s5571_s19, %s5572_s30  }
  0x2a   : > { %s5573_s7 = smov [#allocation7]   ;;  %s412_s13 = sshll.u32 %s6496_s8, 4  ;;  %s413_s13 = int_to_ptr.hbm [resolvable:$true] %s412_s13 }
  0x2b   : > { %s391_s28 = sshll.u32 %s5573_s7, 4  ;;  %s5574_s25 = smov [#allocation10]   ;;  %s392_s28 = int_to_ptr.vmem [resolvable:$true] %s391_s28 }
  0x2c   : > { %5150 = dma.hbm_to_vmem [thread:$0]  (!%p5709_p12), %s390_s22, 32, %s392_s28, [#allocation6]  }
  0x2d   : > { %s414_s16 = sshll.u32 %s5574_s25, 4  ;;  %s5575_s18 = smov 256   ;;  %s415_s16 = int_to_ptr.vmem [resolvable:$true] %s414_s16 }
  0x2e   : > { %s5576_s23 = smov 16   ;;  %s441_s19 = sshll.u32 %s6498_s10, 4  ;;  %s442_s19 = int_to_ptr.hbm [resolvable:$true] %s441_s19 }
  0x2f   : > { %5156 = dma.hbm_to_vmem [thread:$0]  (!%p5709_p12), %s413_s13, 8192, %s415_s16, [#allocation9], %s5575_s18, %s5575_s18, %s5576_s23  }
  0x30   : > { %s5577_s30 = smov [#allocation13]   ;;  %s456_s22 = sshll.u32 %s6500_s12, 4  ;;  %s457_s22 = int_to_ptr.hbm [resolvable:$true] %s456_s22 }
  0x31   : > { %s443_s27 = sshll.u32 %s5577_s30, 4  ;;  %s5578_s28 = smov [#allocation14]   ;;  %s444_s27 = int_to_ptr.vmem [resolvable:$true] %s443_s27 }
  0x32   : > { %5162 = dma.hbm_to_vmem [thread:$0]  (!%p5709_p12), %s442_s19, 16, %s444_s27, [#allocation12]  }
  0x33   : > { %s458_s24 = sshll.u32 %s5578_s28, 4  ;;  %479 = sbr.rel (%p5698_p10) target bundleno = 1657 (0x679), region = 72  ;;  %s459_s24 = int_to_ptr.vmem [resolvable:$true] %s458_s24 }
  0x34   : > { %5165 = dma.hbm_to_vmem [thread:$0]  (!%p5709_p12), %s457_s22, 16, %s459_s24, [#allocation15]  }
  0x38   : > { %5524 = dma.done.wait (%p5170_p9), [#allocation3], 16384  }
  0x39   : > { %5526 = vsyncadd (%p5170_p9), [#allocation3], 4294950912 }
  0x3a   : > { %5528 = dma.done.wait (%p5170_p9), [#allocation6], 20512  }
  0x3b   : > { %5530 = vsyncadd (%p5170_p9), [#allocation6], 4294946784 }
  0x3c   : > { %5532 = dma.done.wait (%p5170_p9), [#allocation9], 8320  }
  0x3d   : > { %5534 = vsyncadd (%p5170_p9), [#allocation9], 4294958976 }
  0x3e   : > { %5536 = dma.done.wait (%p5170_p9), [#allocation12], 4112  }
  0x3f   : > { %5538 = vsyncadd (%p5170_p9), [#allocation12], 4294963184 }
  0x40   : > { %5540 = dma.done.wait (%p5170_p9), [#allocation15], 16  }
  0x41   : > { %5542 = vsyncadd (%p5170_p9), [#allocation15], 4294967280  ;;  %v3754_v0 = vld [vmem:[%s6489_s1 + $0x70] sm:$0xf]  ;;  %v4841_v1 = vld [vmem:[%s6489_s1 + $0x74] sm:$0xf0] }
  0x42   : > { %v3818_v2 = vld [vmem:[%s6489_s1 + $0xf0] sm:$0xf]  ;;  %v3755_v3 = vor.u32 %v4841_v1, %v3754_v0  ;;  %v4857_v4 = vld [vmem:[%s6489_s1 + $0xf4] sm:$0xf0]  ;;  %v3746_v9 = vld [vmem:[%s6489_s1 + $0x60] sm:$0xf] }
  0x43   : > { %v3882_v5 = vld [vmem:[%s6489_s1 + $0x170] sm:$0xf]  ;;  %v4873_v6 = vld [vmem:[%s6489_s1 + $0x174] sm:$0xf0]  ;;  %v3819_v7 = vor.u32 %v4857_v4, %v3818_v2  ;;  %v4839_v10 = vld [vmem:[%s6489_s1 + $0x64] sm:$0xf0] }
  0x44   : > { %v3883_v8 = vor.u32 %v4873_v6, %v3882_v5  ;;  %v3810_v11 = vld [vmem:[%s6489_s1 + $0xe0] sm:$0xf]  ;;  %1092 = vmatpush.bf16.msra.mxu0 %v3755_v3  ;;  %v3747_v12 = vor.u32 %v4839_v10, %v3746_v9  ;;  %v4855_v13 = vld [vmem:[%s6489_s1 + $0xe4] sm:$0xf0]  ;;  %v3946_v14 = vld [vmem:[%s6489_s1 + $0x1f0] sm:$0xf] }
  0x45   : > { %v4889_v15 = vld [vmem:[%s6489_s1 + $0x1f4] sm:$0xf0]  ;;  %1106 = vmatpush.bf16.msra.mxu1 %v3819_v7  ;;  %v3811_v16 = vor.u32 %v4855_v13, %v3810_v11  ;;  %v3874_v18 = vld [vmem:[%s6489_s1 + $0x160] sm:$0xf]  ;;  %v4871_v19 = vld [vmem:[%s6489_s1 + $0x164] sm:$0xf0] }
  0x46   : > { %1120 = vmatpush.bf16.msra.mxu2 %v3883_v8  ;;  %v3947_v17 = vor.u32 %v4889_v15, %v3946_v14  ;;  %v3738_v20 = vld [vmem:[%s6489_s1 + $0x50] sm:$0xf]  ;;  %v3875_v21 = vor.u32 %v4871_v19, %v3874_v18  ;;  %v4837_v22 = vld [vmem:[%s6489_s1 + $0x54] sm:$0xf0]  ;;  %v3938_v25 = vld [vmem:[%s6489_s1 + $0x1e0] sm:$0xf] }
  0x47   : > { %v3802_v23 = vld [vmem:[%s6489_s1 + $0xd0] sm:$0xf]  ;;  %v4853_v24 = vld [vmem:[%s6489_s1 + $0xd4] sm:$0xf0]  ;;  %v4887_v26 = vld [vmem:[%s6489_s1 + $0x1e4] sm:$0xf0]  ;;  %v3739_v28 = vor.u32 %v4837_v22, %v3738_v20 }
  0x48   : > { %1134 = vmatpush.bf16.msra.mxu3 %v3947_v17  ;;  %v3866_v27 = vld [vmem:[%s6489_s1 + $0x150] sm:$0xf]  ;;  %1093 = vmatpush.bf16.msra.mxu0 %v3747_v12  ;;  %v3939_v29 = vor.u32 %v4887_v26, %v3938_v25  ;;  %v4869_v30 = vld [vmem:[%s6489_s1 + $0x154] sm:$0xf0]  ;;  %v3730_v31 = vld [vmem:[%s6489_s1 + $0x40] sm:$0xf]  ;;  %v3803_v33 = vor.u32 %v4853_v24, %v3802_v23 }
  0x49   : > { %v4835_v32 = vld [vmem:[%s6489_s1 + $0x44] sm:$0xf0]  ;;  %1107 = vmatpush.bf16.msra.mxu1 %v3811_v16  ;;  %v3867_v34 = vor.u32 %v4869_v30, %v3866_v27  ;;  %v3794_v35 = vld [vmem:[%s6489_s1 + $0xc0] sm:$0xf]  ;;  %v3930_v37 = vld [vmem:[%s6489_s1 + $0x1d0] sm:$0xf] }
  0x4a   : > { %1121 = vmatpush.bf16.msra.mxu2 %v3875_v21  ;;  %v4851_v36 = vld [vmem:[%s6489_s1 + $0xc4] sm:$0xf0]  ;;  %v4885_v38 = vld [vmem:[%s6489_s1 + $0x1d4] sm:$0xf0]  ;;  %v3858_v39 = vld [vmem:[%s6489_s1 + $0x140] sm:$0xf]  ;;  %v3731_v42 = vor.u32 %v4835_v32, %v3730_v31 }
  0x4b   : > { %v4867_v40 = vld [vmem:[%s6489_s1 + $0x144] sm:$0xf0]  ;;  %v3931_v41 = vor.u32 %v4885_v38, %v3930_v37  ;;  %v3922_v43 = vld [vmem:[%s6489_s1 + $0x1c0] sm:$0xf]  ;;  %v3795_v45 = vor.u32 %v4851_v36, %v3794_v35  ;;  %v3722_v47 = vld [vmem:[%s6489_s1 + $0x30] sm:$0xf] }
  0x4c   : > { %1135 = vmatpush.bf16.msra.mxu3 %v3939_v29  ;;  %1094 = vmatpush.bf16.msra.mxu0 %v3739_v28  ;;  %v4883_v44 = vld [vmem:[%s6489_s1 + $0x1c4] sm:$0xf0]  ;;  %v3859_v46 = vor.u32 %v4867_v40, %v3858_v39  ;;  %v4833_v48 = vld [vmem:[%s6489_s1 + $0x34] sm:$0xf0]  ;;  %v3786_v49 = vld [vmem:[%s6489_s1 + $0xb0] sm:$0xf] }
  0x4d   : > { %1108 = vmatpush.bf16.msra.mxu1 %v3803_v33  ;;  %v4849_v50 = vld [vmem:[%s6489_s1 + $0xb4] sm:$0xf0]  ;;  %v3850_v51 = vld [vmem:[%s6489_s1 + $0x130] sm:$0xf]  ;;  %v3923_v53 = vor.u32 %v4883_v44, %v3922_v43  ;;  %p558_p13 = scmp.lt.s32.totalorder %s5670_s29, 1  ;;  %v3723_v54 = vor.u32 %v4833_v48, %v3722_v47  ;;  %vm577_vm0 = vcmask 1045504  }
  0x4e   : > { %1122 = vmatpush.bf16.msra.mxu2 %v3867_v34  ;;  %v4865_v52 = vld [vmem:[%s6489_s1 + $0x134] sm:$0xf0]  ;;  %v3914_v55 = vld [vmem:[%s6489_s1 + $0x1b0] sm:$0xf]  ;;  %v3787_v57 = vor.u32 %v4849_v50, %v3786_v49  ;;  %v3714_v59 = vld [vmem:[%s6489_s1 + $0x20] sm:$0xf] }
  0x4f   : > { %v4881_v56 = vld [vmem:[%s6489_s1 + $0x1b4] sm:$0xf0]  ;;  %v3851_v58 = vor.u32 %v4865_v52, %v3850_v51  ;;  %v4831_v60 = vld [vmem:[%s6489_s1 + $0x24] sm:$0xf0]  ;;  %v3778_v61 = vld [vmem:[%s6489_s1 + $0xa0] sm:$0xf] }
  0x50   : > { %1136 = vmatpush.bf16.msra.mxu3 %v3931_v41  ;;  %1095 = vmatpush.bf16.msra.mxu0 %v3731_v42  ;;  %v4847_v62 = vld [vmem:[%s6489_s1 + $0xa4] sm:$0xf0]  ;;  %v3842_v63 = vld [vmem:[%s6489_s1 + $0x120] sm:$0xf]  ;;  %v3915_v1 = vor.u32 %v4881_v56, %v3914_v55  ;;  %s5914_s17 = scalar_select %p558_p13, %s5670_s29, 1  ;;  %v3715_v2 = vor.u32 %v4831_v60, %v3714_v59  ;;  %vm585_vm1 = vcmask 1044480  }
  0x51   : > { %1109 = vmatpush.bf16.msra.mxu1 %v3795_v45  ;;  %v4863_v0 = vld [vmem:[%s6489_s1 + $0x124] sm:$0xf0]  ;;  %v3906_v3 = vld [vmem:[%s6489_s1 + $0x1a0] sm:$0xf]  ;;  %v3779_v5 = vor.u32 %v4847_v62, %v3778_v61  ;;  %v3706_v7 = vld [vmem:[%s6489_s1 + $0x10] sm:$0xf] }
  0x52   : > { %1123 = vmatpush.bf16.msra.mxu2 %v3859_v46  ;;  %v4879_v4 = vld [vmem:[%s6489_s1 + $0x1a4] sm:$0xf0]  ;;  %v3843_v6 = vor.u32 %v4863_v0, %v3842_v63  ;;  %v4829_v8 = vld [vmem:[%s6489_s1 + $0x14] sm:$0xf0]  ;;  %v3770_v9 = vld [vmem:[%s6489_s1 + $0x90] sm:$0xf] }
  0x53   : > { %v4845_v10 = vld [vmem:[%s6489_s1 + $0x94] sm:$0xf0]  ;;  %v3834_v11 = vld [vmem:[%s6489_s1 + $0x110] sm:$0xf]  ;;  %v3907_v13 = vor.u32 %v4879_v4, %v3906_v3  ;;  %v3698_v14 = vld [vmem:[%s6489_s1] sm:$0xf]  ;;  %v3707_v15 = vor.u32 %v4829_v8, %v3706_v7 }
  0x54   : > { %1137 = vmatpush.bf16.msra.mxu3 %v3923_v53  ;;  %1096 = vmatpush.bf16.msra.mxu0 %v3723_v54  ;;  %v4861_v12 = vld [vmem:[%s6489_s1 + $0x114] sm:$0xf0]  ;;  %s5106_s25 = smul.u32 24, %s5914_s17  ;;  %v4827_v16 = vld [vmem:[%s6489_s1 + $0x4] sm:$0xf0]  ;;  %v3771_v19 = vor.u32 %v4845_v10, %v3770_v9  ;;  %vm569_vm2 = vcmask 1046528  }
  0x55   : > { %1110 = vmatpush.bf16.msra.mxu1 %v3787_v57  ;;  %v3898_v17 = vld [vmem:[%s6489_s1 + $0x190] sm:$0xf]  ;;  %v4877_v18 = vld [vmem:[%s6489_s1 + $0x194] sm:$0xf0]  ;;  %v3835_v20 = vor.u32 %v4861_v12, %v3834_v11  ;;  %v3762_v21 = vld [vmem:[%s6489_s1 + $0x80] sm:$0xf]  ;;  %v3699_v31 = vor.u32 %v4827_v16, %v3698_v14 }
  0x56   : > { %1124 = vmatpush.bf16.msra.mxu2 %v3851_v58  ;;  %v4843_v22 = vld [vmem:[%s6489_s1 + $0x84] sm:$0xf0]  ;;  %v4010_v23 = vld [vmem:[%s6489_s1 + $0x270] sm:$0xf]  ;;  %v4905_v24 = vld [vmem:[%s6489_s1 + $0x274] sm:$0xf0]  ;;  %v3899_v27 = vor.u32 %v4877_v18, %v3898_v17  ;;  %s5992_s15 = scalar_lea.vmem %s6488_s0, %s5106_s25 }
  0x57   : > { %v4840_v25 = vld [vmem:[%s6489_s1 + $0x74] sm:$0xf]  ;;  %v3756_v26 = vld [vmem:[%s6489_s1 + $0x78] sm:$0xf0]  ;;  %v3826_v28 = vld [vmem:[%s6489_s1 + $0x100] sm:$0xf]  ;;  %v3763_v35 = vor.u32 %v4843_v22, %v3762_v21  ;;  %v4011_v36 = vor.u32 %v4905_v24, %v4010_v23 }
  0x58   : > { %1138 = vmatpush.bf16.msra.mxu3 %v3915_v1  ;;  %1097 = vmatpush.bf16.msra.mxu0 %v3715_v2  ;;  %v4859_v29 = vld [vmem:[%s6489_s1 + $0x104] sm:$0xf0]  ;;  %v4856_v30 = vld [vmem:[%s6489_s1 + $0xf4] sm:$0xf]  ;;  %v3820_v32 = vld [vmem:[%s6489_s1 + $0xf8] sm:$0xf0]  ;;  %v3759_v40 = vor.u32 %v4840_v25, %v3756_v26 }
  0x59   : > { %1111 = vmatpush.bf16.msra.mxu1 %v3779_v5  ;;  %v3890_v33 = vld [vmem:[%s6489_s1 + $0x180] sm:$0xf]  ;;  %v4875_v34 = vld [vmem:[%s6489_s1 + $0x184] sm:$0xf0]  ;;  %v4872_v38 = vld [vmem:[%s6489_s1 + $0x174] sm:$0xf]  ;;  %v3827_v41 = vor.u32 %v4859_v29, %v3826_v28  ;;  %v3823_v45 = vor.u32 %v4856_v30, %v3820_v32 }
  0x5a   : > { %1125 = vmatpush.bf16.msra.mxu2 %v3843_v6  ;;  %v4002_v37 = vld [vmem:[%s6489_s1 + $0x260] sm:$0xf]  ;;  %v3884_v39 = vld [vmem:[%s6489_s1 + $0x178] sm:$0xf0]  ;;  %v4903_v42 = vld [vmem:[%s6489_s1 + $0x264] sm:$0xf0]  ;;  %v3891_v46 = vor.u32 %v4875_v34, %v3890_v33 }
  0x5b   : > { %v4838_v43 = vld [vmem:[%s6489_s1 + $0x64] sm:$0xf]  ;;  %v3748_v44 = vld [vmem:[%s6489_s1 + $0x68] sm:$0xf0]  ;;  %v3887_v50 = vor.u32 %v4872_v38, %v3884_v39  ;;  %v3994_v51 = vld [vmem:[%s6489_s1 + $0x250] sm:$0xf]  ;;  %v4003_v56 = vor.u32 %v4903_v42, %v4002_v37 }
  0x5c   : > { %1139 = vmatpush.bf16.msra.mxu3 %v3907_v13  ;;  %1098 = vmatpush.bf16.msra.mxu0 %v3707_v15  ;;  %v4854_v47 = vld [vmem:[%s6489_s1 + $0xe4] sm:$0xf]  ;;  %v3812_v48 = vld [vmem:[%s6489_s1 + $0xe8] sm:$0xf0]  ;;  %v4901_v52 = vld [vmem:[%s6489_s1 + $0x254] sm:$0xf0]  ;;  %v3751_v61 = vor.u32 %v4838_v43, %v3748_v44 }
  0x5d   : > { %1112 = vmatpush.bf16.msra.mxu1 %v3771_v19  ;;  %v6019_v49 = vld [vmem:[%s5992_s15] sm:$0xff]  ;;  %v3876_v54 = vld [vmem:[%s6489_s1 + $0x168] sm:$0xf0]  ;;  %v4836_v57 = vld [vmem:[%s6489_s1 + $0x54] sm:$0xf]  ;;  %v3815_v0 = vor.u32 %v4854_v47, %v3812_v48  ;;  %v3995_v10 = vor.u32 %v4901_v52, %v3994_v51  ;;  %vm593_vm3 = vcmask 1043456  }
  0x5e   : > { %1126 = vmatpush.bf16.msra.mxu2 %v3835_v20  ;;  %v4870_v53 = vld [vmem:[%s6489_s1 + $0x164] sm:$0xf]  ;;  %v6034_v55 = vld [vmem:[%s5992_s15 + $0x8] sm:$0xff]  ;;  %v3740_v58 = vld [vmem:[%s6489_s1 + $0x58] sm:$0xf0]  ;;  %v578_v60 = vrot.slane %v6019_v49, 2 }
  0x5f   : > { %v6044_v59 = vpack.c.bf16 %v6034_v55, %v6019_v49  ;;  %v4852_v62 = vld [vmem:[%s6489_s1 + $0xd4] sm:$0xf]  ;;  %v3804_v63 = vld [vmem:[%s6489_s1 + $0xd8] sm:$0xf0]  ;;  %v3879_v1 = vor.u32 %v4870_v53, %v3876_v54  ;;  %v6057_v3 = vld [vmem:[%s5992_s15 + $0x10] sm:$0xf]  ;;  %v3743_v12 = vor.u32 %v4836_v57, %v3740_v58 }
  0x60   : > { %1140 = vmatpush.bf16.msra.mxu3 %v3899_v27  ;;  %1099 = vmatpush.bf16.msra.mxu0 %v3699_v31  ;;  %v4868_v2 = vld [vmem:[%s6489_s1 + $0x154] sm:$0xf]  ;;  %v579_v4 = vrot.slane %v6034_v55, 2  ;;  %v3868_v5 = vld [vmem:[%s6489_s1 + $0x158] sm:$0xf0]  ;;  %v581_v6 = vrot.slane %v6057_v3, 2  ;;  %v3807_v18 = vor.u32 %v4852_v62, %v3804_v63 }
  0x61   : > { %1113 = vmatpush.bf16.msra.mxu1 %v3763_v35  ;;  %v586_v7 = vrot.slane %v6019_v49, 3  ;;  %v587_v8 = vrot.slane %v6034_v55, 3  ;;  %v589_v9 = vrot.slane %v6057_v3, 3  ;;  %v3986_v13 = vld [vmem:[%s6489_s1 + $0x240] sm:$0xf]  ;;  %v3871_v21 = vor.u32 %v4868_v2, %v3868_v5  ;;  %s556_s19 = sand.u32 1, %s5553_s26  }
  0x62   : > { %1127 = vmatpush.bf16.msra.mxu2 %v3827_v41  ;;  %v580_v11 = vsel %vm577_vm0, %v578_v60, %v579_v4  ;;  %v4899_v14 = vld [vmem:[%s6489_s1 + $0x244] sm:$0xf0]  ;;  %v582_v15 = vsel %vm577_vm0, %v579_v4, %v581_v6  ;;  %v4834_v19 = vld [vmem:[%s6489_s1 + $0x44] sm:$0xf]  ;;  %v3732_v20 = vld [vmem:[%s6489_s1 + $0x48] sm:$0xf0] }
  0x63   : > { %1100 = vmatmul.bf16.vlgmr.msra.gmra.mxu0 %v6044_v59  ;;  %v588_v16 = vsel %vm585_vm1, %v586_v7, %v587_v8  ;;  %v590_v17 = vsel %vm585_vm1, %v587_v8, %v589_v9  ;;  %v4850_v22 = vld [vmem:[%s6489_s1 + $0xc4] sm:$0xf]  ;;  %v6087_v23 = vpack.c.bf16 %v582_v15, %v580_v11  ;;  %v3796_v25 = vld [vmem:[%s6489_s1 + $0xc8] sm:$0xf0]  ;;  %v570_v26 = vrot.slane %v6019_v49, 1  ;;  %s6527_s27 = sld [smem:[#allocation32_spill]] }
  0x64   : > { %1148 = vmatpush.bf16.msrb.mxu0 %v4011_v36  ;;  %1141 = vmatpush.bf16.msra.mxu3 %v3891_v46  ;;  %v6089_v24 = vpack.c.bf16 %v590_v17, %v588_v16  ;;  %v571_v27 = vrot.slane %v6034_v55, 1  ;;  %v573_v28 = vrot.slane %v6057_v3, 1  ;;  %v3987_v29 = vor.u32 %v4899_v14, %v3986_v13  ;;  %v4866_v30 = vld [vmem:[%s6489_s1 + $0x144] sm:$0xf]  ;;  %v3860_v31 = vld [vmem:[%s6489_s1 + $0x148] sm:$0xf0] }
  0x65   : > { %1162 = vmatpush.bf16.msrb.mxu1 %v3759_v40  ;;  %1128 = vmatmul.bf16.vlgmr.msra.gmra.mxu2 %v6087_v23  ;;  %v3735_v32 = vor.u32 %v4834_v19, %v3732_v20  ;;  %v3978_v33 = vld [vmem:[%s6489_s1 + $0x230] sm:$0xf]  ;;  %v4897_v34 = vld [vmem:[%s6489_s1 + $0x234] sm:$0xf0]  ;;  %v3799_v37 = vor.u32 %v4850_v22, %v3796_v25  ;;  %v4832_v38 = vld [vmem:[%s6489_s1 + $0x34] sm:$0xf]  ;;  %v3863_v41 = vor.u32 %v4866_v30, %v3860_v31 }
  0x66   : > { %1176 = vmatpush.bf16.msrb.mxu2 %v3823_v45  ;;  %v572_v35 = vsel %vm569_vm2, %v570_v26, %v571_v27  ;;  %v574_v36 = vsel %vm569_vm2, %v571_v27, %v573_v28  ;;  %v3724_v39 = vld [vmem:[%s6489_s1 + $0x38] sm:$0xf0]  ;;  %v4848_v42 = vld [vmem:[%s6489_s1 + $0xb4] sm:$0xf]  ;;  %v3979_v44 = vor.u32 %v4897_v34, %v3978_v33  ;;  %v3970_v48 = vld [vmem:[%s6489_s1 + $0x220] sm:$0xf] }
  0x67   : > { %1142 = vmatmul.bf16.vlgmr.msra.gmra.mxu3 %v6089_v24  ;;  %v6119_v40 = vpack.c.bf16 %v574_v36, %v572_v35  ;;  %v3788_v43 = vld [vmem:[%s6489_s1 + $0xb8] sm:$0xf0]  ;;  %v4864_v45 = vld [vmem:[%s6489_s1 + $0x134] sm:$0xf]  ;;  %v3727_v47 = vor.u32 %v4832_v38, %v3724_v39  ;;  %v4830_v52 = vld [vmem:[%s6489_s1 + $0x24] sm:$0xf] }
  0x68   : > { %1190 = vmatpush.bf16.msrb.mxu3 %v3887_v50  ;;  %1149 = vmatpush.bf16.msrb.mxu0 %v4003_v56  ;;  %v3852_v46 = vld [vmem:[%s6489_s1 + $0x138] sm:$0xf0]  ;;  %v4895_v50 = vld [vmem:[%s6489_s1 + $0x224] sm:$0xf0]  ;;  %v3791_v51 = vor.u32 %v4848_v42, %v3788_v43  ;;  %v3716_v53 = vld [vmem:[%s6489_s1 + $0x28] sm:$0xf0] }
  0x69   : > { %1163 = vmatpush.bf16.msrb.mxu1 %v3751_v61  ;;  %v3855_v54 = vor.u32 %v4864_v45, %v3852_v46  ;;  %v4846_v56 = vld [vmem:[%s6489_s1 + $0xa4] sm:$0xf]  ;;  %v3780_v57 = vld [vmem:[%s6489_s1 + $0xa8] sm:$0xf0]  ;;  %v3971_v58 = vor.u32 %v4895_v50, %v3970_v48  ;;  %v3719_v62 = vor.u32 %v4830_v52, %v3716_v53  ;;  %v3962_v63 = vld [vmem:[%s6489_s1 + $0x210] sm:$0xf]  ;;  %s6528_s21 = smov %s6527_s27  ;;  %s3537_s22 = scalar_lea.hbm %s6527_s27, %s5670_s29 }
  0x6a   : > { %1177 = vmatpush.bf16.msrb.mxu2 %v3815_v0  ;;  %1114 = vmatmul.bf16.vlgmr.msra.gmra.mxu1 %v6119_v40  ;;  %v4862_v60 = vld [vmem:[%s6489_s1 + $0x124] sm:$0xf]  ;;  %v3844_v61 = vld [vmem:[%s6489_s1 + $0x128] sm:$0xf0]  ;;  %v4893_v0 = vld [vmem:[%s6489_s1 + $0x214] sm:$0xf0]  ;;  %v3783_v2 = vor.u32 %v4846_v56, %v3780_v57 }
  0x6b   : > { %v3708_v4 = vld [vmem:[%s6489_s1 + $0x18] sm:$0xf0]  ;;  %v4844_v5 = vld [vmem:[%s6489_s1 + $0x94] sm:$0xf]  ;;  %v3847_v7 = vor.u32 %v4862_v60, %v3844_v61  ;;  %v3954_v8 = vld [vmem:[%s6489_s1 + $0x200] sm:$0xf]  ;;  %v3963_v11 = vor.u32 %v4893_v0, %v3962_v63 }
  0x6c   : > { %1191 = vmatpush.bf16.msrb.mxu3 %v3879_v1  ;;  %1150 = vmatpush.bf16.msrb.mxu0 %v3995_v10  ;;  %v4828_v1 = vld [vmem:[%s6489_s1 + $0x14] sm:$0xf]  ;;  %v3772_v6 = vld [vmem:[%s6489_s1 + $0x98] sm:$0xf0]  ;;  %v4891_v9 = vld [vmem:[%s6489_s1 + $0x204] sm:$0xf0] }
  0x6d   : > { %1164 = vmatpush.bf16.msrb.mxu1 %v3743_v12  ;;  %v4860_v10 = vld [vmem:[%s6489_s1 + $0x114] sm:$0xf]  ;;  %v3836_v12 = vld [vmem:[%s6489_s1 + $0x118] sm:$0xf0]  ;;  %v594_v13 = vrot.slane %v6019_v49, 4  ;;  %v595_v14 = vrot.slane %v6034_v55, 4  ;;  %v3711_v16 = vor.u32 %v4828_v1, %v3708_v4  ;;  %v3775_v19 = vor.u32 %v4844_v5, %v3772_v6 }
  0x6e   : > { %1178 = vmatpush.bf16.msrb.mxu2 %v3807_v18  ;;  %v597_v15 = vrot.slane %v6057_v3, 4  ;;  %v4826_v17 = vld [vmem:[%s6489_s1 + $0x4] sm:$0xf]  ;;  %v3700_v18 = vld [vmem:[%s6489_s1 + $0x8] sm:$0xf0]  ;;  %v3839_v20 = vor.u32 %v4860_v10, %v3836_v12  ;;  %v3955_v26 = vor.u32 %v4891_v9, %v3954_v8  ;;  %vm1239_vm4 = vcmask 130048  }
  0x6f   : > { %v4888_v49 = vld [vmem:[%s6489_s1 + $0x1f4] sm:$0xf]  ;;  %v3948_v55 = vld [vmem:[%s6489_s1 + $0x1f8] sm:$0xf0]  ;;  %v4842_v22 = vld [vmem:[%s6489_s1 + $0x84] sm:$0xf]  ;;  %v596_v27 = vsel %vm593_vm3, %v594_v13, %v595_v14  ;;  %v3703_v31 = vor.u32 %v4826_v17, %v3700_v18 }
  0x70   : > { %1192 = vmatpush.bf16.msrb.mxu3 %v3871_v21  ;;  %1151 = vmatpush.bf16.msrb.mxu0 %v3987_v29  ;;  %v4904_v3 = vld [vmem:[%s6489_s1 + $0x274] sm:$0xf]  ;;  %v4012_v21 = vld [vmem:[%s6489_s1 + $0x278] sm:$0xf0]  ;;  %v3764_v25 = vld [vmem:[%s6489_s1 + $0x88] sm:$0xf0]  ;;  %v598_v28 = vsel %vm593_vm3, %v595_v14, %v597_v15 }
  0x71   : > { %1165 = vmatpush.bf16.msrb.mxu1 %v3735_v32  ;;  %v4858_v29 = vld [vmem:[%s6489_s1 + $0x104] sm:$0xf]  ;;  %v3828_v30 = vld [vmem:[%s6489_s1 + $0x108] sm:$0xf0]  ;;  %v3951_v32 = vor.u32 %v4888_v49, %v3948_v55  ;;  %v4015_v33 = vor.u32 %v4904_v3, %v4012_v21  ;;  %v3767_v34 = vor.u32 %v4842_v22, %v3764_v25  ;;  %v3932_v45 = vld [vmem:[%s6489_s1 + $0x1d8] sm:$0xf0] }
  0x72   : > { %1179 = vmatpush.bf16.msrb.mxu2 %v3799_v37  ;;  %v4886_v35 = vld [vmem:[%s6489_s1 + $0x1e4] sm:$0xf]  ;;  %v3940_v36 = vld [vmem:[%s6489_s1 + $0x1e8] sm:$0xf0]  ;;  %v6229_v37 = vpack.c.bf16 %v598_v28, %v596_v27  ;;  %v3831_v38 = vor.u32 %v4858_v29, %v3828_v30  ;;  %v4900_v46 = vld [vmem:[%s6489_s1 + $0x254] sm:$0xf] }
  0x73   : > { %v4902_v39 = vld [vmem:[%s6489_s1 + $0x264] sm:$0xf]  ;;  %v3943_v42 = vor.u32 %v4886_v35, %v3940_v36  ;;  %v3924_v52 = vld [vmem:[%s6489_s1 + $0x1c8] sm:$0xf0]  ;;  %v3916_v56 = vld [vmem:[%s6489_s1 + $0x1b8] sm:$0xf0] }
  0x74   : > { %1193 = vmatpush.bf16.msrb.mxu3 %v3863_v41  ;;  %1152 = vmatpush.bf16.msrb.mxu0 %v3979_v44  ;;  %v4004_v41 = vld [vmem:[%s6489_s1 + $0x268] sm:$0xf0]  ;;  %v4884_v44 = vld [vmem:[%s6489_s1 + $0x1d4] sm:$0xf]  ;;  %v4894_v0 = vld [vmem:[%s6489_s1 + $0x224] sm:$0xf] }
  0x75   : > { %1166 = vmatpush.bf16.msrb.mxu1 %v3727_v47  ;;  %v4007_v43 = vor.u32 %v4902_v39, %v4004_v41  ;;  %v3996_v47 = vld [vmem:[%s6489_s1 + $0x258] sm:$0xf0]  ;;  %v3935_v48 = vor.u32 %v4884_v44, %v3932_v45  ;;  %v4896_v57 = vld [vmem:[%s6489_s1 + $0x234] sm:$0xf]  ;;  %v3908_v63 = vld [vmem:[%s6489_s1 + $0x1a8] sm:$0xf0] }
  0x76   : > { %1180 = vmatpush.bf16.msrb.mxu2 %v3791_v51  ;;  %v3999_v50 = vor.u32 %v4900_v46, %v3996_v47  ;;  %v4882_v51 = vld [vmem:[%s6489_s1 + $0x1c4] sm:$0xf]  ;;  %v3972_v1 = vld [vmem:[%s6489_s1 + $0x228] sm:$0xf0]  ;;  %v4876_v5 = vld [vmem:[%s6489_s1 + $0x194] sm:$0xf] }
  0x77   : > { %v3927_v53 = vor.u32 %v4882_v51, %v3924_v52  ;;  %v3975_v4 = vor.u32 %v4894_v0, %v3972_v1  ;;  %v3900_v6 = vld [vmem:[%s6489_s1 + $0x198] sm:$0xf0]  ;;  %v3892_v12 = vld [vmem:[%s6489_s1 + $0x188] sm:$0xf0]  ;;  %v4890_v13 = vld [vmem:[%s6489_s1 + $0x204] sm:$0xf] }
  0x78   : > { %1194 = vmatpush.bf16.msrb.mxu3 %v3855_v54  ;;  %1153 = vmatpush.bf16.msrb.mxu0 %v3971_v58  ;;  %v4880_v54 = vld [vmem:[%s6489_s1 + $0x1b4] sm:$0xf]  ;;  %v3980_v58 = vld [vmem:[%s6489_s1 + $0x238] sm:$0xf0]  ;;  %v3903_v9 = vor.u32 %v4876_v5, %v3900_v6  ;;  %v3956_v14 = vld [vmem:[%s6489_s1 + $0x208] sm:$0xf0] }
  0x79   : > { %1167 = vmatpush.bf16.msrb.mxu1 %v3719_v62  ;;  %v3919_v60 = vor.u32 %v4880_v54, %v3916_v56  ;;  %v3983_v61 = vor.u32 %v4896_v57, %v3980_v58  ;;  %v4878_v62 = vld [vmem:[%s6489_s1 + $0x1a4] sm:$0xf]  ;;  %v3964_v8 = vld [vmem:[%s6489_s1 + $0x218] sm:$0xf0]  ;;  %v686_v18 = vld [vmem:[%s6490_s2] sm:$0x3] }
  0x7a   : > { %1181 = vmatpush.bf16.msrb.mxu2 %v3783_v2  ;;  %v3911_v2 = vor.u32 %v4878_v62, %v3908_v63  ;;  %v688_v49 = vperm.slane %v686_v18, 0  ;;  %v6321_v41 = vld [vmem:[%s6491_s3] sm:$0xff]  ;;  %v689_v44 = vperm.slane %v686_v18, 1  ;;  %v6335_v52 = vld [vmem:[%s6491_s3 + $0x10] sm:$0xff]  ;;  %v1376_v57 = vld [vmem:[#allocation2 + $0x1c8] sm:$0xff]  ;;  %vm2910_vm5 = vcmask 64512  }
  0x7b   : > { %v1375_v56 = vld [vmem:[#allocation2 + $0x1c0] sm:$0xff]  ;;  %v1368_v63 = vld [vmem:[#allocation2 + $0x188] sm:$0xff]  ;;  %vm3514_vm7 = vcmask 1040384   ;;  %s557_s28 = scalar_lea.vmem [#allocation16], %s556_s19  ;;  %s3541_s20 = sshll.u32 %s3537_s22, 4  ;;  %s3542_s20 = int_to_ptr.hbm [resolvable:$true] %s3541_s20 }
  0x7c   : > { %1195 = vmatpush.bf16.msrb.mxu3 %v3847_v7  ;;  %1154 = vmatpush.bf16.msrb.mxu0 %v3963_v11  ;;  %v4892_v7 = vld [vmem:[%s6489_s1 + $0x214] sm:$0xf]  ;;  %v4874_v11 = vld [vmem:[%s6489_s1 + $0x184] sm:$0xf]  ;;  %v1364_v5 = vld [vmem:[#allocation2 + $0x168] sm:$0xff]  ;;  %s3539_s24 = sshll.u32 %s557_s28, 4  ;;  %s3540_s24 = int_to_ptr.vmem [resolvable:$true] %s3539_s24 }
  0x7d   : > { %1168 = vmatpush.bf16.msrb.mxu1 %v3711_v16  ;;  %v3967_v10 = vor.u32 %v4892_v7, %v3964_v8  ;;  %v3895_v15 = vor.u32 %v4874_v11, %v3892_v12  ;;  %v3959_v16 = vor.u32 %v4890_v13, %v3956_v14  ;;  %v1371_v62 = vld [vmem:[#allocation2 + $0x1a0] sm:$0xff]  ;;  %v1356_v13 = vld [vmem:[#allocation2 + $0x128] sm:$0xff]  ;;  %s3529_s13 = scalar_lea.sflag [#allocation4], %s556_s19  ;;  %s5493_s16 = sshra.s32 %s3542_s20, 4  ;;  %s5494_s16 = int_to_ptr.hbm [resolvable:$true] %s5493_s16 }
  0x7e   : > { %1182 = vmatpush.bf16.msrb.mxu2 %v3775_v19  ;;  %v1363_v7 = vld [vmem:[#allocation2 + $0x160] sm:$0xff]  ;;  %s5495_s15 = scalar_lea.hbm %s5494_s16, 1  ;;  %s5499_s29 = scalar_lea.hbm %s6528_s21, 2 }
  0x7f   : > { %v1359_v12 = vld [vmem:[#allocation2 + $0x140] sm:$0xff]  ;;  %p5496_p0 = scmp.ne.s32.totalorder %s5494_s16, %s5495_s15  ;;  %p5500_p3 = scmp.lt.s32.totalorder %s5494_s16, %s6528_s21 }
  0x80   : > { %1196 = vmatpush.bf16.msrb.mxu3 %v3839_v20  ;;  %1155 = vmatpush.bf16.msrb.mxu0 %v3955_v26  ;;  %v1351_v18 = vld [vmem:[#allocation2 + $0x100] sm:$0xff]  ;;  %p5501_p4 = scmp.lt.s32.totalorder %s5499_s29, %s5495_s15 }
  0x81   : > { %1169 = vmatpush.bf16.msrb.mxu1 %v3703_v31  ;;  %p5497_p1 = pnand %p5496_p0, %p5687_p5 }
  0x82   : > { %1183 = vmatpush.bf16.msrb.mxu2 %v3767_v34  ;;  %p5502_p7 = por %p5501_p4, %p5500_p3 }
  0x83   : > { %1156 = vmatmul.bf16.vlgmr.msrb.gmra.mxu0 %v6229_v37  ;;  %p5498_p2 = pneg %p5497_p1 }
  0x84   : > { %1204 = vmatpush.bf16.msra.mxu0 %v3951_v32  ;;  %1197 = vmatpush.bf16.msrb.mxu3 %v3831_v38 }
  0x85   : > { %1218 = vmatpush.bf16.msra.mxu1 %v4015_v33  ;;  %1184 = vmatmul.bf16.vlgmr.msrb.gmra.mxu2 %v6119_v40  ;;  %v3988_v40 = vld [vmem:[%s6489_s1 + $0x248] sm:$0xf0]  ;;  %p5503_p8 = pnand %p5502_p7, %p5498_p2 }
  0x86   : > { %1170 = vmatmul.bf16.vlgmr.msrb.gmra.mxu1 %v6044_v59  ;;  %v4898_v59 = vld [vmem:[%s6489_s1 + $0x244] sm:$0xf] }
  0x87   : > { %1198 = vmatmul.bf16.vlgmr.msrb.gmra.mxu3 %v6087_v23  ;;  %v3991_v23 = vor.u32 %v4898_v59, %v3988_v40 }
  0x88   : > { %1205 = vmatpush.bf16.msra.mxu0 %v3943_v42 }
  0x89   : > { %1219 = vmatpush.bf16.msra.mxu1 %v4007_v43  ;;  %v6328_v43 = vld [vmem:[%s6491_s3 + $0x8] sm:$0xff] }
  0x8c   : > { %1206 = vmatpush.bf16.msra.mxu0 %v3935_v48 }
  0x8d   : > { %1220 = vmatpush.bf16.msra.mxu1 %v3999_v50 }
  0x90   : > { %1207 = vmatpush.bf16.msra.mxu0 %v3927_v53  ;;  %v1379_v53 = vld [vmem:[#allocation2 + $0x1e0] sm:$0xff] }
  0x91   : > { %1221 = vmatpush.bf16.msra.mxu1 %v3991_v23  ;;  %v1380_v23 = vld [vmem:[#allocation2 + $0x1e8] sm:$0xff] }
  0x94   : > { %1208 = vmatpush.bf16.msra.mxu0 %v3919_v60  ;;  %v1372_v60 = vld [vmem:[#allocation2 + $0x1a8] sm:$0xff] }
  0x95   : > { %1222 = vmatpush.bf16.msra.mxu1 %v3983_v61 }
  0x98   : > { %1209 = vmatpush.bf16.msra.mxu0 %v3911_v2  ;;  %v1367_v2 = vld [vmem:[#allocation2 + $0x180] sm:$0xff] }
  0x99   : > { %1223 = vmatpush.bf16.msra.mxu1 %v3975_v4 }
  0x9c   : > { %1210 = vmatpush.bf16.msra.mxu0 %v3903_v9  ;;  %v1360_v9 = vld [vmem:[#allocation2 + $0x148] sm:$0xff] }
  0x9d   : > { %1224 = vmatpush.bf16.msra.mxu1 %v3967_v10 }
  0xa0   : > { %1211 = vmatpush.bf16.msra.mxu0 %v3895_v15  ;;  %v1355_v15 = vld [vmem:[#allocation2 + $0x120] sm:$0xff] }
  0xa1   : > { %1225 = vmatpush.bf16.msra.mxu1 %v3959_v16  ;;  %v1352_v16 = vld [vmem:[#allocation2 + $0x108] sm:$0xff] }
  0xa3   : > { %1212 = vmatmul.bf16.vlgmr.msra.gmra.mxu0 %v6089_v24 }
  0xa4   : > { %1226 = vmatmul.bf16.vlgmr.msra.gmra.mxu1 %v6229_v37  ;;  %1493 = vmatpush.msrb.mxu0 %v1380_v23  ;;  %v1424_v23 = vld [vmem:[#allocation2 + $0x348] sm:$0xff] }
  0xa6   : > { %1494 = vmatpush.msrb.mxu0 %v1376_v57  ;;  %v1419_v57 = vld [vmem:[#allocation2 + $0x320] sm:$0xff] }
  0xa8   : > { %1495 = vmatpush.msrb.mxu0 %v1372_v60  ;;  %v1357_v60 = vld [vmem:[#allocation2 + $0x130] sm:$0xff] }
  0xaa   : > { %1496 = vmatpush.msrb.mxu0 %v1368_v63  ;;  %v1416_v63 = vld [vmem:[#allocation2 + $0x308] sm:$0xff] }
  0xac   : > { %1497 = vmatpush.msrb.mxu0 %v1364_v5  ;;  %v1349_v5 = vld [vmem:[#allocation2 + $0xf0] sm:$0xff] }
  0xae   : > { %1498 = vmatpush.msrb.mxu0 %v1360_v9  ;;  %v1345_v9 = vld [vmem:[#allocation2 + $0xd0] sm:$0xff] }
  0xb0   : > { %1499 = vmatpush.msrb.mxu0 %v1356_v13  ;;  %v1341_v13 = vld [vmem:[#allocation2 + $0xb0] sm:$0xff] }
  0xb2   : > { %1500 = vmatpush.msrb.mxu0 %v1352_v16  ;;  %v1400_v16 = vld [vmem:[#allocation2 + $0x288] sm:$0xff] }
  0xe0   : > { %v1101_v17 = vpop.f32.mrf.mxu0 }
  0xe1   : > { %v1102_v20 = vadd.f32 %v1101_v17, %v688_v49 }
  0xe7   : > { %v1115_v19 = vpop.f32.mrf.mxu1 }
  0xe8   : > { %v1103_v55 = vpop.f32.mrf.mxu0  ;;  %v1129_v3 = vpop.f32.mrf.mxu2  ;;  %v1116_v26 = vadd.f32 %v1115_v19, %v1102_v20  ;;  %v1348_v19 = vld [vmem:[#allocation2 + $0xe8] sm:$0xff] }
  0xe9   : > { %v1104_v22 = vadd.f32 %v1103_v55, %v688_v49  ;;  %v1347_v49 = vld [vmem:[#allocation2 + $0xe0] sm:$0xff]  ;;  %v1344_v55 = vld [vmem:[#allocation2 + $0xc8] sm:$0xff]  ;;  %1501 = vmatpush.msrb.mxu0 %v1348_v19 }
  0xea   : > { %v1143_v21 = vpop.f32.mrf.mxu3  ;;  %v1130_v24 = vadd.f32 %v1129_v3, %v1116_v26  ;;  %v1343_v3 = vld [vmem:[#allocation2 + $0xc0] sm:$0xff]  ;;  %v1340_v20 = vld [vmem:[#allocation2 + $0xa8] sm:$0xff] }
  0xeb   : > { %1502 = vmatpush.msrb.mxu0 %v1344_v55  ;;  %v1331_v26 = vld [vmem:[#allocation2 + $0x60] sm:$0xff]  ;;  %v1333_v55 = vld [vmem:[#allocation2 + $0x70] sm:$0xff] }
  0xec   : > { %v1144_v32 = vadd.f32 %v1143_v21, %v1130_v24  ;;  %v1339_v21 = vld [vmem:[#allocation2 + $0xa0] sm:$0xff] }
  0xed   : > { %1503 = vmatpush.msrb.mxu0 %v1340_v20  ;;  %v1323_v24 = vld [vmem:[#allocation2 + $0x20] sm:$0xff]  ;;  %v1334_v20 = vld [vmem:[#allocation2 + $0x78] sm:$0xff] }
  0xee   : > { %v1395_v19 = vld [vmem:[#allocation2 + $0x260] sm:$0xff] }
  0xef   : > { %v1117_v25 = vpop.f32.mrf.mxu1 }
  0xf0   : > { %v1118_v27 = vadd.f32 %v1117_v25, %v1104_v22  ;;  %v1131_v29 = vpop.f32.mrf.mxu2  ;;  %v1336_v22 = vld [vmem:[#allocation2 + $0x88] sm:$0xff]  ;;  %v1335_v25 = vld [vmem:[#allocation2 + $0x80] sm:$0xff] }
  0xf1   : > { %1504 = vmatpush.msrb.mxu0 %v1336_v22  ;;  %v1392_v22 = vld [vmem:[#allocation2 + $0x248] sm:$0xff] }
  0xf2   : > { %v1132_v30 = vadd.f32 %v1131_v29, %v1118_v27  ;;  %v1145_v31 = vpop.f32.mrf.mxu3  ;;  %v1332_v27 = vld [vmem:[#allocation2 + $0x68] sm:$0xff] }
  0xf3   : > { %1505 = vmatpush.msrb.mxu0 %v1332_v27  ;;  %v1328_v29 = vld [vmem:[#allocation2 + $0x48] sm:$0xff]  ;;  %v1387_v27 = vld [vmem:[#allocation2 + $0x220] sm:$0xff] }
  0xf4   : > { %v1146_v33 = vadd.f32 %v1145_v31, %v1132_v30  ;;  %v1324_v30 = vld [vmem:[#allocation2 + $0x28] sm:$0xff]  ;;  %v1443_v31 = vld [vmem:[#allocation2 + $0x3e0] sm:$0xff] }
  0xf5   : > { %1506 = vmatpush.msrb.mxu0 %v1328_v29  ;;  %v1325_v29 = vld [vmem:[#allocation2 + $0x30] sm:$0xff] }
  0xf7   : > { %1507 = vmatpush.msrb.mxu0 %v1324_v30  ;;  %v1383_v30 = vld [vmem:[#allocation2 + $0x200] sm:$0xff] }
 0x100   : > { %v1157_v28 = vpop.f32.mrf.mxu0 }
 0x101   : > { %v1158_v35 = vadd.f32 %v1157_v28, %v1144_v32  ;;  %v1327_v28 = vld [vmem:[#allocation2 + $0x40] sm:$0xff]  ;;  %v1444_v32 = vld [vmem:[#allocation2 + $0x3e8] sm:$0xff] }
 0x102   : > { %1516 = vmatpush.msrb.mxu1 %v1444_v32  ;;  %v1321_v32 = vld [vmem:[#allocation2 + $0x10] sm:$0xff] }
 0x103   : > { %v1171_v38 = vpop.f32.mrf.mxu1  ;;  %v1232_v39 = vmax.f32 %v1158_v35, 0.0  ;;  %v1381_v35 = vld [vmem:[#allocation2 + $0x1f0] sm:$0xff] }
 0x104   : > { %v1172_v47 = vadd.f32 %v1171_v38, %v689_v44  ;;  %v1440_v38 = vld [vmem:[#allocation2 + $0x3c8] sm:$0xff] }
 0x105   : > { %1517 = vmatpush.msrb.mxu1 %v1440_v38  ;;  %v1442_v38 = vld [vmem:[#allocation2 + $0x3d8] sm:$0xff] }
 0x108   : > { %v1159_v34 = vpop.f32.mrf.mxu0  ;;  %v1185_v42 = vpop.f32.mrf.mxu2 }
 0x109   : > { %v1160_v36 = vadd.f32 %v1159_v34, %v1146_v33  ;;  %v1186_v59 = vadd.f32 %v1185_v42, %v1172_v47  ;;  %v1319_v33 = vld [vmem:[#allocation2] sm:$0xff]  ;;  %v1320_v34 = vld [vmem:[#allocation2 + $0x8] sm:$0xff] }
 0x10a   : > { %v1199_v46 = vpop.f32.mrf.mxu3  ;;  %1508 = vmatpush.msrb.mxu0 %v1320_v34  ;;  %v1435_v42 = vld [vmem:[#allocation2 + $0x3a0] sm:$0xff]  ;;  %v1432_v47 = vld [vmem:[#allocation2 + $0x388] sm:$0xff]  ;;  %v1445_v34 = vld [vmem:[#allocation2 + $0x3f0] sm:$0xff] }
 0x10b   : > { %v1234_v37 = vmax.f32 %v1160_v36, 0.0  ;;  %v1173_v45 = vpop.f32.mrf.mxu1  ;;  %v1200_v61 = vadd.f32 %v1199_v46, %v1186_v59  ;;  %v1382_v36 = vld [vmem:[#allocation2 + $0x1f8] sm:$0xff]  ;;  %v1431_v46 = vld [vmem:[#allocation2 + $0x380] sm:$0xff]  ;;  %v1365_v59 = vld [vmem:[#allocation2 + $0x170] sm:$0xff] }
 0x10c   : > { %v1174_v48 = vadd.f32 %v1173_v45, %v689_v44  ;;  %1585 = vmatpush.msra.mxu0 %v1382_v36  ;;  %v1373_v44 = vld [vmem:[#allocation2 + $0x1b0] sm:$0xff]  ;;  %v1374_v45 = vld [vmem:[#allocation2 + $0x1b8] sm:$0xff] }
 0x10d   : > { %1263 = vmatpush.msra.mxu2 %v1234_v37  ;;  %v1439_v37 = vld [vmem:[#allocation2 + $0x3c0] sm:$0xff] }
 0x10f   : > { %1264 = vmatpush.msra.mxu2 %v1232_v39  ;;  %v1377_v39 = vld [vmem:[#allocation2 + $0x1d0] sm:$0xff] }
 0x110   : > { %4016 = vmatmul.msk.f32.vlgmr.msra.gmra.mxu2 %vm1239_vm4, %v6321_v41  ;;  %v1187_v50 = vpop.f32.mrf.mxu2 }
 0x111   : > { %v1188_v54 = vadd.f32 %v1187_v50, %v1174_v48  ;;  %1447 = vmatpush.msrb.mxu2 %v1379_v53  ;;  %v1369_v48 = vld [vmem:[#allocation2 + $0x190] sm:$0xff]  ;;  %v1370_v50 = vld [vmem:[#allocation2 + $0x198] sm:$0xff]  ;;  %v1423_v53 = vld [vmem:[#allocation2 + $0x340] sm:$0xff] }
 0x112   : > { %v1201_v58 = vpop.f32.mrf.mxu3 }
 0x113   : > { %1448 = vmatpush.msrb.mxu2 %v1375_v56  ;;  %v1202_v0 = vadd.f32 %v1201_v58, %v1188_v54  ;;  %v1361_v54 = vld [vmem:[#allocation2 + $0x150] sm:$0xff]  ;;  %v1362_v56 = vld [vmem:[#allocation2 + $0x158] sm:$0xff]  ;;  %v1420_v58 = vld [vmem:[#allocation2 + $0x328] sm:$0xff] }
 0x115   : > { %1449 = vmatpush.msrb.mxu2 %v1371_v62  ;;  %v1415_v62 = vld [vmem:[#allocation2 + $0x300] sm:$0xff] }
 0x117   : > { %1450 = vmatpush.msrb.mxu2 %v1367_v2  ;;  %v1411_v2 = vld [vmem:[#allocation2 + $0x2e0] sm:$0xff] }
 0x118   : > { %4017 = vmatmul.msk.f32.gmra.mxu2 %vm1239_vm4, %v6328_v43 }
 0x119   : > { %1451 = vmatpush.msrb.mxu2 %v1363_v7  ;;  %v1407_v7 = vld [vmem:[#allocation2 + $0x2c0] sm:$0xff] }
 0x11b   : > { %1452 = vmatpush.msrb.mxu2 %v1359_v12  ;;  %v1404_v12 = vld [vmem:[#allocation2 + $0x2a8] sm:$0xff] }
 0x11d   : > { %1453 = vmatpush.msrb.mxu2 %v1355_v15  ;;  %v1399_v15 = vld [vmem:[#allocation2 + $0x280] sm:$0xff] }
 0x11f   : > { %1454 = vmatpush.msrb.mxu2 %v1351_v18  ;;  %v1338_v18 = vld [vmem:[#allocation2 + $0x98] sm:$0xff] }
 0x120   : > { %v1213_v51 = vpop.f32.mrf.mxu0  ;;  %4018 = vmatmul.msk.f32.gmra.mxu2 %vm1239_vm4, %v6335_v52 }
 0x121   : > { %v1227_v40 = vpop.f32.mrf.mxu1  ;;  %v1214_v1 = vadd.f32 %v1213_v51, %v1200_v61  ;;  %1455 = vmatpush.msrb.mxu2 %v1347_v49  ;;  %v1427_v51 = vld [vmem:[#allocation2 + $0x360] sm:$0xff]  ;;  %v1358_v61 = vld [vmem:[#allocation2 + $0x138] sm:$0xff]  ;;  %v1396_v49 = vld [vmem:[#allocation2 + $0x268] sm:$0xff] }
 0x123   : > { %v1228_v10 = vadd.f32 %v1227_v40, %v1214_v1  ;;  %1456 = vmatpush.msrb.mxu2 %v1343_v3  ;;  %v1366_v40 = vld [vmem:[#allocation2 + $0x178] sm:$0xff] }
 0x124   : > { %v1354_v1 = vld [vmem:[#allocation2 + $0x118] sm:$0xff] }
 0x125   : > { %v1233_v17 = vmax.f32 %v1228_v10, 0.0  ;;  %1457 = vmatpush.msrb.mxu2 %v1339_v21  ;;  %v1346_v10 = vld [vmem:[#allocation2 + $0xd8] sm:$0xff]  ;;  %v1391_v21 = vld [vmem:[#allocation2 + $0x240] sm:$0xff] }
 0x127   : > { %1458 = vmatpush.msrb.mxu2 %v1335_v25  ;;  %v1329_v25 = vld [vmem:[#allocation2 + $0x50] sm:$0xff] }
 0x128   : > { %v1215_v4 = vpop.f32.mrf.mxu0 }
 0x129   : > { %v1216_v6 = vadd.f32 %v1215_v4, %v1202_v0  ;;  %v1229_v8 = vpop.f32.mrf.mxu1  ;;  %1459 = vmatpush.msrb.mxu2 %v1331_v26  ;;  %v1353_v0 = vld [vmem:[#allocation2 + $0x110] sm:$0xff]  ;;  %v1412_v4 = vld [vmem:[#allocation2 + $0x2e8] sm:$0xff]  ;;  %v1330_v26 = vld [vmem:[#allocation2 + $0x58] sm:$0xff] }
 0x12b   : > { %v1230_v11 = vadd.f32 %v1229_v8, %v1216_v6  ;;  %1460 = vmatpush.msrb.mxu2 %v1327_v28  ;;  %v1350_v6 = vld [vmem:[#allocation2 + $0xf8] sm:$0xff]  ;;  %v1408_v8 = vld [vmem:[#allocation2 + $0x2c8] sm:$0xff] }
 0x12c   : > { %v1388_v28 = vld [vmem:[#allocation2 + $0x228] sm:$0xff] }
 0x12d   : > { %v1235_v14 = vmax.f32 %v1230_v11, 0.0  ;;  %1461 = vmatpush.msrb.mxu2 %v1323_v24  ;;  %v1403_v11 = vld [vmem:[#allocation2 + $0x2a0] sm:$0xff]  ;;  %v1326_v24 = vld [vmem:[#allocation2 + $0x38] sm:$0xff] }
 0x12f   : > { %1289 = vmatpush.msra.mxu3 %v1235_v14  ;;  %1462 = vmatpush.msrb.mxu2 %v1319_v33  ;;  %v1342_v14 = vld [vmem:[#allocation2 + $0xb8] sm:$0xff] }
 0x130   : > { %v1322_v33 = vld [vmem:[#allocation2 + $0x18] sm:$0xff] }
 0x131   : > { %1290 = vmatpush.msra.mxu3 %v1233_v17  ;;  %1539 = vmatpush.msra.mxu2 %v1381_v35  ;;  %v1337_v17 = vld [vmem:[#allocation2 + $0x90] sm:$0xff]  ;;  %v1446_v35 = vld [vmem:[#allocation2 + $0x3f8] sm:$0xff] }
 0x132   : > { %4019 = vmatmul.msk.f32.vlgmr.msra.gmra.mxu3 %vm1239_vm4, %v6321_v41  ;;  %v1378_v41 = vld [vmem:[#allocation2 + $0x1d8] sm:$0xff] }
 0x133   : > { %1470 = vmatpush.msrb.mxu3 %v1443_v31  ;;  %1540 = vmatpush.msra.mxu2 %v1377_v39  ;;  %v1384_v31 = vld [vmem:[#allocation2 + $0x208] sm:$0xff]  ;;  %v1437_v39 = vld [vmem:[#allocation2 + $0x3b0] sm:$0xff] }
 0x134   : > { %1586 = vmatpush.msra.mxu0 %v1378_v41  ;;  %v1438_v41 = vld [vmem:[#allocation2 + $0x3b8] sm:$0xff] }
 0x135   : > { %1471 = vmatpush.msrb.mxu3 %v1439_v37  ;;  %1541 = vmatpush.msra.mxu2 %v1373_v44  ;;  %v1441_v37 = vld [vmem:[#allocation2 + $0x3d0] sm:$0xff] }
 0x136   : > { %1587 = vmatpush.msra.mxu0 %v1374_v45  ;;  %v1429_v44 = vld [vmem:[#allocation2 + $0x370] sm:$0xff]  ;;  %v1430_v45 = vld [vmem:[#allocation2 + $0x378] sm:$0xff] }
 0x137   : > { %1472 = vmatpush.msrb.mxu3 %v1435_v42  ;;  %1542 = vmatpush.msra.mxu2 %v1369_v48  ;;  %v1433_v42 = vld [vmem:[#allocation2 + $0x390] sm:$0xff] }
 0x138   : > { %1588 = vmatpush.msra.mxu0 %v1370_v50  ;;  %v1425_v48 = vld [vmem:[#allocation2 + $0x350] sm:$0xff]  ;;  %v1426_v50 = vld [vmem:[#allocation2 + $0x358] sm:$0xff] }
 0x139   : > { %1473 = vmatpush.msrb.mxu3 %v1431_v46  ;;  %1543 = vmatpush.msra.mxu2 %v1365_v59  ;;  %v1422_v59 = vld [vmem:[#allocation2 + $0x338] sm:$0xff] }
 0x13a   : > { %4020 = vmatmul.msk.f32.gmra.mxu3 %vm1239_vm4, %v6328_v43  ;;  %v1436_v43 = vld [vmem:[#allocation2 + $0x3a8] sm:$0xff]  ;;  %1589 = vmatpush.msra.mxu0 %v1366_v40 }
 0x13b   : > { %1518 = vmatpush.msrb.mxu1 %v1436_v43  ;;  %1474 = vmatpush.msrb.mxu3 %v1427_v51  ;;  %v1434_v43 = vld [vmem:[#allocation2 + $0x398] sm:$0xff] }
 0x13c   : > { %1544 = vmatpush.msra.mxu2 %v1361_v54  ;;  %1590 = vmatpush.msra.mxu0 %v1362_v56  ;;  %v1418_v54 = vld [vmem:[#allocation2 + $0x318] sm:$0xff]  ;;  %v1413_v56 = vld [vmem:[#allocation2 + $0x2f0] sm:$0xff] }
 0x13d   : > { %1519 = vmatpush.msrb.mxu1 %v1432_v47  ;;  %1475 = vmatpush.msrb.mxu3 %v1423_v53 }
 0x13e   : > { %1545 = vmatpush.msra.mxu2 %v1357_v60  ;;  %1591 = vmatpush.msra.mxu0 %v1358_v61  ;;  %v1410_v60 = vld [vmem:[#allocation2 + $0x2d8] sm:$0xff] }
 0x13f   : > { %1476 = vmatpush.msrb.mxu3 %v1419_v57  ;;  %v1414_v57 = vld [vmem:[#allocation2 + $0x2f8] sm:$0xff] }
 0x140   : > { %1546 = vmatpush.msra.mxu2 %v1353_v0  ;;  %1592 = vmatpush.msra.mxu0 %v1354_v1  ;;  %v1401_v0 = vld [vmem:[#allocation2 + $0x290] sm:$0xff]  ;;  %v1402_v1 = vld [vmem:[#allocation2 + $0x298] sm:$0xff] }
 0x141   : > { %1477 = vmatpush.msrb.mxu3 %v1415_v62  ;;  %v1405_v62 = vld [vmem:[#allocation2 + $0x2b0] sm:$0xff] }
 0x142   : > { %4021 = vmatmul.msk.f32.gmra.mxu3 %vm1239_vm4, %v6335_v52  ;;  %v1428_v52 = vld [vmem:[#allocation2 + $0x368] sm:$0xff]  ;;  %1547 = vmatpush.msra.mxu2 %v1349_v5 }
 0x143   : > { %1520 = vmatpush.msrb.mxu1 %v1428_v52  ;;  %1478 = vmatpush.msrb.mxu3 %v1411_v2  ;;  %v1421_v52 = vld [vmem:[#allocation2 + $0x330] sm:$0xff] }
 0x144   : > { %1593 = vmatpush.msra.mxu0 %v1350_v6  ;;  %1548 = vmatpush.msra.mxu2 %v1345_v9  ;;  %v1397_v2 = vld [vmem:[#allocation2 + $0x270] sm:$0xff]  ;;  %v1390_v9 = vld [vmem:[#allocation2 + $0x238] sm:$0xff] }
 0x145   : > { %1521 = vmatpush.msrb.mxu1 %v1424_v23  ;;  %1479 = vmatpush.msrb.mxu3 %v1407_v7  ;;  %v1417_v23 = vld [vmem:[#allocation2 + $0x310] sm:$0xff]  ;;  %v1394_v7 = vld [vmem:[#allocation2 + $0x258] sm:$0xff] }
 0x146   : > { %1594 = vmatpush.msra.mxu0 %v1346_v10  ;;  %1549 = vmatpush.msra.mxu2 %v1341_v13  ;;  %v1393_v6 = vld [vmem:[#allocation2 + $0x250] sm:$0xff] }
 0x147   : > { %1522 = vmatpush.msrb.mxu1 %v1420_v58  ;;  %1480 = vmatpush.msrb.mxu3 %v1403_v11  ;;  %v1409_v58 = vld [vmem:[#allocation2 + $0x2d0] sm:$0xff]  ;;  %v1386_v11 = vld [vmem:[#allocation2 + $0x218] sm:$0xff] }
 0x148   : > { %1595 = vmatpush.msra.mxu0 %v1342_v14  ;;  %1550 = vmatpush.msra.mxu2 %v1337_v17  ;;  %v1385_v10 = vld [vmem:[#allocation2 + $0x210] sm:$0xff] }
 0x149   : > { %1523 = vmatpush.msrb.mxu1 %v1416_v63  ;;  %1481 = vmatpush.msrb.mxu3 %v1399_v15  ;;  %v1406_v63 = vld [vmem:[#allocation2 + $0x2b8] sm:$0xff]  ;;  %v4144_v14 = vld [vmem:[#allocation5 + $0xf0] sm:$0xf] }
 0x14a   : > { %1596 = vmatpush.msra.mxu0 %v1338_v18  ;;  %1551 = vmatpush.msra.mxu2 %v1333_v55  ;;  %v4937_v15 = vld [vmem:[#allocation5 + $0xf4] sm:$0xf0] }
 0x14b   : > { %1524 = vmatpush.msrb.mxu1 %v1412_v4  ;;  %1482 = vmatpush.msrb.mxu3 %v1395_v19  ;;  %v1398_v4 = vld [vmem:[#allocation2 + $0x278] sm:$0xff]  ;;  %v4145_v19 = vor.u32 %v4937_v15, %v4144_v14  ;;  %v4240_v15 = vld [vmem:[#allocation5 + $0x1b0] sm:$0xf] }
 0x14c   : > { %1597 = vmatpush.msra.mxu0 %v1334_v20  ;;  %1552 = vmatpush.msra.mxu2 %v1329_v25  ;;  %v4935_v20 = vld [vmem:[#allocation5 + $0xe4] sm:$0xf0]  ;;  %v4921_v25 = vld [vmem:[#allocation5 + $0x74] sm:$0xf0] }
 0x14d   : > { %1525 = vmatpush.msrb.mxu1 %v1408_v8  ;;  %1483 = vmatpush.msrb.mxu3 %v1391_v21  ;;  %v1389_v8 = vld [vmem:[#allocation2 + $0x230] sm:$0xff] }
 0x14e   : > { %1598 = vmatpush.msra.mxu0 %v1330_v26  ;;  %1553 = vmatpush.msra.mxu2 %v1325_v29  ;;  %v4128_v26 = vld [vmem:[#allocation5 + $0xd0] sm:$0xf] }
 0x14f   : > { %1526 = vmatpush.msrb.mxu1 %v1404_v12  ;;  %1484 = vmatpush.msrb.mxu3 %v1387_v27 }
 0x150   : > { %1599 = vmatpush.msra.mxu0 %v1326_v24  ;;  %1554 = vmatpush.msra.mxu2 %v1321_v32  ;;  %v4072_v24 = vld [vmem:[#allocation5 + $0x60] sm:$0xf]  ;;  %v4272_v32 = vld [vmem:[#allocation5 + $0x1f0] sm:$0xf] }
 0x151   : > { %1527 = vmatpush.msrb.mxu1 %v1400_v16  ;;  %1485 = vmatpush.msrb.mxu3 %v1383_v30  ;;  %v4919_v30 = vld [vmem:[#allocation5 + $0x64] sm:$0xf0] }
 0x152   : > { %1600 = vmatpush.msra.mxu0 %v1322_v33  ;;  %v4969_v33 = vld [vmem:[#allocation5 + $0x1f4] sm:$0xf0] }
 0x153   : > { %1528 = vmatpush.msrb.mxu1 %v1396_v49  ;;  %1562 = vmatpush.msra.mxu3 %v1445_v34  ;;  %v4273_v34 = vor.u32 %v4969_v33, %v4272_v32  ;;  %v4945_v32 = vld [vmem:[#allocation5 + $0x134] sm:$0xf0]  ;;  %v4392_v33 = vld [vmem:[#allocation5 + $0x2e0] sm:$0xf] }
 0x155   : > { %1529 = vmatpush.msrb.mxu1 %v1392_v22  ;;  %1563 = vmatpush.msra.mxu3 %v1441_v37  ;;  %v4080_v22 = vld [vmem:[#allocation5 + $0x70] sm:$0xf] }
 0x156   : > { %v4081_v27 = vor.u32 %v4921_v25, %v4080_v22  ;;  %v5001_v22 = vld [vmem:[#allocation5 + $0x2f4] sm:$0xf0]  ;;  %v4032_v25 = vld [vmem:[#allocation5 + $0x10] sm:$0xf] }
 0x157   : > { %1530 = vmatpush.msrb.mxu1 %v1388_v28  ;;  %1564 = vmatpush.msra.mxu3 %v1437_v39  ;;  %v4933_v28 = vld [vmem:[#allocation5 + $0xd4] sm:$0xf0] }
 0x158   : > { %v4129_v29 = vor.u32 %v4933_v28, %v4128_v26  ;;  %v4917_v39 = vld [vmem:[#allocation5 + $0x54] sm:$0xf0] }
 0x159   : > { %1531 = vmatpush.msrb.mxu1 %v1384_v31  ;;  %1565 = vmatpush.msra.mxu3 %v1433_v42  ;;  %v4073_v31 = vor.u32 %v4919_v30, %v4072_v24  ;;  %v4909_v26 = vld [vmem:[#allocation5 + $0x14] sm:$0xf0]  ;;  %v4959_v24 = vld [vmem:[#allocation5 + $0x1a4] sm:$0xf0]  ;;  %v4176_v30 = vld [vmem:[#allocation5 + $0x130] sm:$0xf] }
 0x15a   : > { %v4033_v28 = vor.u32 %v4909_v26, %v4032_v25  ;;  %v4360_v25 = vld [vmem:[#allocation5 + $0x2a0] sm:$0xf]  ;;  %v4991_v26 = vld [vmem:[#allocation5 + $0x2a4] sm:$0xf0] }
 0x15b   : > { %1608 = vmatpush.msra.mxu1 %v1446_v35  ;;  %1566 = vmatpush.msra.mxu3 %v1429_v44  ;;  %v4120_v35 = vld [vmem:[#allocation5 + $0xc0] sm:$0xf]  ;;  %v4112_v44 = vld [vmem:[#allocation5 + $0xb0] sm:$0xf] }
 0x15d   : > { %1609 = vmatpush.msra.mxu1 %v1442_v38  ;;  %1567 = vmatpush.msra.mxu3 %v1425_v48  ;;  %v4064_v38 = vld [vmem:[#allocation5 + $0x50] sm:$0xf] }
 0x15e   : > { %v4065_v42 = vor.u32 %v4917_v39, %v4064_v38  ;;  %v4208_v48 = vld [vmem:[#allocation5 + $0x170] sm:$0xf]  ;;  %v4907_v38 = vld [vmem:[#allocation5 + $0x4] sm:$0xf0] }
 0x15f   : > { %1610 = vmatpush.msra.mxu1 %v1438_v41  ;;  %1568 = vmatpush.msra.mxu3 %v1421_v52  ;;  %v4264_v41 = vld [vmem:[#allocation5 + $0x1e0] sm:$0xf] }
 0x160   : > { %v4056_v52 = vld [vmem:[#allocation5 + $0x40] sm:$0xf] }
 0x161   : > { %1611 = vmatpush.msra.mxu1 %v1434_v43  ;;  %1569 = vmatpush.msra.mxu3 %v1417_v23  ;;  %v4967_v43 = vld [vmem:[#allocation5 + $0x1e4] sm:$0xf0]  ;;  %v4965_v23 = vld [vmem:[#allocation5 + $0x1d4] sm:$0xf0] }
 0x163   : > { %1612 = vmatpush.msra.mxu1 %v1430_v45  ;;  %1570 = vmatpush.msra.mxu3 %v1413_v56  ;;  %v4929_v45 = vld [vmem:[#allocation5 + $0xb4] sm:$0xf0]  ;;  %v4104_v56 = vld [vmem:[#allocation5 + $0xa0] sm:$0xf] }
 0x165   : > { %1613 = vmatpush.msra.mxu1 %v1426_v50  ;;  %1571 = vmatpush.msra.mxu3 %v1409_v58  ;;  %v4953_v50 = vld [vmem:[#allocation5 + $0x174] sm:$0xf0] }
 0x167   : > { %1614 = vmatpush.msra.mxu1 %v1422_v59  ;;  %1572 = vmatpush.msra.mxu3 %v1405_v62  ;;  %v4915_v59 = vld [vmem:[#allocation5 + $0x44] sm:$0xf0] }
 0x169   : > { %1615 = vmatpush.msra.mxu1 %v1418_v54  ;;  %1573 = vmatpush.msra.mxu3 %v1401_v0  ;;  %v4913_v0 = vld [vmem:[#allocation5 + $0x34] sm:$0xf0] }
 0x16b   : > { %1616 = vmatpush.msra.mxu1 %v1414_v57  ;;  %1574 = vmatpush.msra.mxu3 %v1397_v2  ;;  %v4927_v57 = vld [vmem:[#allocation5 + $0xa4] sm:$0xf0] }
 0x16c   : > { %v4105_v58 = vor.u32 %v4927_v57, %v4104_v56  ;;  %v4983_v56 = vld [vmem:[#allocation5 + $0x264] sm:$0xf0]  ;;  %v4528_v57 = vld [vmem:[#allocation5 + $0x3f0] sm:$0xf] }
 0x16d   : > { %1617 = vmatpush.msra.mxu1 %v1410_v60  ;;  %1575 = vmatpush.msra.mxu3 %v1393_v6  ;;  %v4200_v60 = vld [vmem:[#allocation5 + $0x160] sm:$0xf]  ;;  %v4925_v6 = vld [vmem:[#allocation5 + $0x94] sm:$0xf0] }
 0x16f   : > { %1618 = vmatpush.msra.mxu1 %v1406_v63  ;;  %1576 = vmatpush.msra.mxu3 %v1389_v8  ;;  %v4048_v63 = vld [vmem:[#allocation5 + $0x30] sm:$0xf] }
 0x170   : > { %v4049_v2 = vor.u32 %v4913_v0, %v4048_v63  ;;  %v4941_v63 = vld [vmem:[#allocation5 + $0x114] sm:$0xf0]  ;;  %v4376_v0 = vld [vmem:[#allocation5 + $0x2c0] sm:$0xf] }
 0x171   : > { %1619 = vmatpush.msra.mxu1 %v1402_v1  ;;  %1577 = vmatpush.msra.mxu3 %v1385_v10  ;;  %v4248_v1 = vld [vmem:[#allocation5 + $0x1c0] sm:$0xf]  ;;  %v4949_v10 = vld [vmem:[#allocation5 + $0x154] sm:$0xf0] }
 0x173   : > { %1620 = vmatpush.msra.mxu1 %v1398_v4  ;;  %v4963_v4 = vld [vmem:[#allocation5 + $0x1c4] sm:$0xf0] }
 0x175   : > { %1621 = vmatpush.msra.mxu1 %v1394_v7  ;;  %v4249_v7 = vor.u32 %v4963_v4, %v4248_v1 }
 0x177   : > { %1622 = vmatpush.msra.mxu1 %v1390_v9  ;;  %v4192_v9 = vld [vmem:[#allocation5 + $0x150] sm:$0xf] }
 0x179   : > { %1623 = vmatpush.msra.mxu1 %v1386_v11  ;;  %v4193_v11 = vor.u32 %v4949_v10, %v4192_v9  ;;  %v5031_v9 = vld [vmem:[#allocation5 + $0x3e4] sm:$0xf0] }
 0x193   : > { %v1266_v3 = vpop.f32.mrf.mxu2 }
 0x19b   : > { %v1269_v36 = vpop.f32.mrf.mxu2 }
 0x19c   : > { %v1305_v46 = vrot.slane %v1269_v36, 4 }
 0x1a3   : > { %v1272_v47 = vpop.f32.mrf.mxu2 }
 0x1a4   : > { %v1306_v51 = vrot.slane %v1272_v47, 4  ;;  %v4113_v47 = vor.u32 %v4929_v45, %v4112_v44  ;;  %v4985_v45 = vld [vmem:[#allocation5 + $0x274] sm:$0xf0] }
 0x1a6   : > { %v1307_v40 = vsel %vm593_vm3, %v1305_v46, %v1306_v51  ;;  %v1317_v61 = vmax.f32 %v1269_v36, %v1306_v51  ;;  %v4931_v36 = vld [vmem:[#allocation5 + $0xc4] sm:$0xf0]  ;;  %v4265_v46 = vor.u32 %v4967_v43, %v4264_v41  ;;  %v4209_v51 = vor.u32 %v4953_v50, %v4208_v48  ;;  %v4224_v41 = vld [vmem:[#allocation5 + $0x190] sm:$0xf] }
 0x1a7   : > { %v1315_v53 = vmax.f32 %v1266_v3, %v1307_v40  ;;  %v4136_v3 = vld [vmem:[#allocation5 + $0xe0] sm:$0xf]  ;;  %v4121_v37 = vor.u32 %v4931_v36, %v4120_v35  ;;  %v4057_v40 = vor.u32 %v4915_v59, %v4056_v52  ;;  %v4177_v35 = vor.u32 %v4945_v32, %v4176_v30  ;;  %v4336_v43 = vld [vmem:[#allocation5 + $0x270] sm:$0xf]  ;;  %v4943_v48 = vld [vmem:[#allocation5 + $0x124] sm:$0xf0] }
 0x1a8   : > { %v4137_v21 = vor.u32 %v4935_v20, %v4136_v3  ;;  %v4947_v3 = vld [vmem:[#allocation5 + $0x144] sm:$0xf0]  ;;  %v4400_v20 = vld [vmem:[#allocation5 + $0x2f0] sm:$0xf]  ;;  %v4997_v52 = vld [vmem:[#allocation5 + $0x2d4] sm:$0xf0] }
 0x1a9   : > { %1463 = vmatmul.f32.vlgmr.msrb.gmra.mxu2 %v1315_v53  ;;  %1509 = vmatmul.f32.vlgmr.msrb.gmra.mxu0 %v1315_v53  ;;  %v4384_v50 = vld [vmem:[#allocation5 + $0x2d0] sm:$0xf]  ;;  %v4216_v59 = vld [vmem:[#allocation5 + $0x180] sm:$0xf] }
 0x1aa   : > { %2647 = vmatpush.bf16.msrb.mxu2 %v4081_v27  ;;  %2673 = vmatpush.bf16.msrb.mxu0 %v4209_v51  ;;  %v4401_v27 = vor.u32 %v5001_v22, %v4400_v20  ;;  %v4304_v30 = vld [vmem:[#allocation5 + $0x230] sm:$0xf] }
 0x1ae   : > { %2648 = vmatpush.bf16.msrb.mxu2 %v4073_v31 }
 0x1b1   : > { %1466 = vmatmul.f32.gmra.mxu2 %v1317_v61  ;;  %1512 = vmatmul.f32.gmra.mxu0 %v1317_v61 }
 0x1b2   : > { %2649 = vmatpush.bf16.msrb.mxu2 %v4065_v42  ;;  %v4957_v42 = vld [vmem:[#allocation5 + $0x194] sm:$0xf0] }
 0x1b3   : > { %v4225_v44 = vor.u32 %v4957_v42, %v4224_v41  ;;  %v5013_v41 = vld [vmem:[#allocation5 + $0x354] sm:$0xf0] }
 0x1b5   : > { %v1292_v5 = vpop.f32.mrf.mxu3 }
 0x1b6   : > { %2650 = vmatpush.bf16.msrb.mxu2 %v4057_v40  ;;  %v4955_v40 = vld [vmem:[#allocation5 + $0x184] sm:$0xf0] }
 0x1b9   : > { %1555 = vmatmul.f32.vlgmr.msra.gmra.mxu2 %v1315_v53  ;;  %1601 = vmatmul.f32.vlgmr.msra.gmra.mxu0 %v1315_v53  ;;  %v4256_v53 = vld [vmem:[#allocation5 + $0x1d0] sm:$0xf] }
 0x1ba   : > { %v4257_v54 = vor.u32 %v4965_v23, %v4256_v53  ;;  %2651 = vmatpush.bf16.msrb.mxu2 %v4049_v2  ;;  %v4385_v53 = vor.u32 %v4997_v52, %v4384_v50  ;;  %v4217_v23 = vor.u32 %v4955_v40, %v4216_v59  ;;  %v4995_v2 = vld [vmem:[#allocation5 + $0x2c4] sm:$0xf0]  ;;  %v4344_v50 = vld [vmem:[#allocation5 + $0x280] sm:$0xf] }
 0x1bb   : > { %v4377_v4 = vor.u32 %v4995_v2, %v4376_v0  ;;  %v4440_v59 = vld [vmem:[#allocation5 + $0x340] sm:$0xf]  ;;  %v5011_v40 = vld [vmem:[#allocation5 + $0x344] sm:$0xf0] }
 0x1bc   : > { %v4971_v2 = vld [vmem:[#allocation5 + $0x204] sm:$0xf0] }
 0x1bd   : > { %v1295_v12 = vpop.f32.mrf.mxu3 }
 0x1be   : > { %v1308_v16 = vrot.slane %v1295_v12, 4 }
 0x1c1   : > { %1558 = vmatmul.f32.gmra.mxu2 %v1317_v61  ;;  %1604 = vmatmul.f32.gmra.mxu0 %v1317_v61  ;;  %v4951_v61 = vld [vmem:[#allocation5 + $0x164] sm:$0xf0] }
 0x1c2   : > { %v4201_v62 = vor.u32 %v4951_v61, %v4200_v60  ;;  %v5033_v60 = vld [vmem:[#allocation5 + $0x3f4] sm:$0xf0] }
 0x1c3   : > { %v4529_v61 = vor.u32 %v5033_v60, %v4528_v57  ;;  %v4488_v57 = vld [vmem:[#allocation5 + $0x3a0] sm:$0xf] }
 0x1c4   : > { %2674 = vmatpush.bf16.msrb.mxu0 %v4201_v62  ;;  %v4160_v62 = vld [vmem:[#allocation5 + $0x110] sm:$0xf] }
 0x1c5   : > { %v1298_v13 = vpop.f32.mrf.mxu3  ;;  %v4161_v1 = vor.u32 %v4941_v63, %v4160_v62  ;;  %v5009_v62 = vld [vmem:[#allocation5 + $0x334] sm:$0xf0] }
 0x1c6   : > { %v1309_v17 = vrot.slane %v1298_v13, 4  ;;  %v4911_v13 = vld [vmem:[#allocation5 + $0x24] sm:$0xf0] }
 0x1c8   : > { %v1310_v18 = vsel %vm593_vm3, %v1308_v16, %v1309_v17  ;;  %v1318_v55 = vmax.f32 %v1295_v12, %v1309_v17  ;;  %v4040_v12 = vld [vmem:[#allocation5 + $0x20] sm:$0xf]  ;;  %v4961_v16 = vld [vmem:[#allocation5 + $0x1b4] sm:$0xf0]  ;;  %2675 = vmatpush.bf16.msrb.mxu0 %v4193_v11 }
 0x1c9   : > { %v1316_v49 = vmax.f32 %v1292_v5, %v1310_v18  ;;  %v4096_v5 = vld [vmem:[#allocation5 + $0x90] sm:$0xf]  ;;  %v4041_v14 = vor.u32 %v4911_v13, %v4040_v12  ;;  %v4241_v17 = vor.u32 %v4961_v16, %v4240_v15  ;;  %v4088_v18 = vld [vmem:[#allocation5 + $0x80] sm:$0xf]  ;;  %v4939_v12 = vld [vmem:[#allocation5 + $0x104] sm:$0xf0] }
 0x1ca   : > { %v4097_v8 = vor.u32 %v4925_v6, %v4096_v5  ;;  %v4320_v5 = vld [vmem:[#allocation5 + $0x250] sm:$0xf]  ;;  %v4981_v6 = vld [vmem:[#allocation5 + $0x254] sm:$0xf0]  ;;  %v4152_v11 = vld [vmem:[#allocation5 + $0x100] sm:$0xf] }
 0x1cb   : > { %1486 = vmatmul.f32.vlgmr.msrb.gmra.mxu3 %v1316_v49  ;;  %1532 = vmatmul.f32.vlgmr.msrb.gmra.mxu1 %v1316_v49  ;;  %v4368_v13 = vld [vmem:[#allocation5 + $0x2b0] sm:$0xf]  ;;  %v4993_v15 = vld [vmem:[#allocation5 + $0x2b4] sm:$0xf0] }
 0x1cc   : > { %2660 = vmatpush.bf16.msrb.mxu3 %v4145_v19  ;;  %2686 = vmatpush.bf16.msrb.mxu1 %v4273_v34  ;;  %v4923_v19 = vld [vmem:[#allocation5 + $0x84] sm:$0xf0]  ;;  %v4464_v16 = vld [vmem:[#allocation5 + $0x370] sm:$0xf] }
 0x1cd   : > { %2652 = vmatpush.bf16.msrb.mxu2 %v4041_v14  ;;  %v4999_v34 = vld [vmem:[#allocation5 + $0x2e4] sm:$0xf0]  ;;  %v4153_v14 = vor.u32 %v4939_v12, %v4152_v11  ;;  %v4472_v11 = vld [vmem:[#allocation5 + $0x380] sm:$0xf] }
 0x1ce   : > { %v4393_v36 = vor.u32 %v4999_v34, %v4392_v33  ;;  %v4504_v33 = vld [vmem:[#allocation5 + $0x3c0] sm:$0xf]  ;;  %v5027_v34 = vld [vmem:[#allocation5 + $0x3c4] sm:$0xf0] }
 0x1cf   : > { %v5019_v12 = vld [vmem:[#allocation5 + $0x384] sm:$0xf0] }
 0x1d0   : > { %2661 = vmatpush.bf16.msrb.mxu3 %v4137_v21  ;;  %2687 = vmatpush.bf16.msrb.mxu1 %v4265_v46  ;;  %v4337_v46 = vor.u32 %v4985_v45, %v4336_v43  ;;  %v4296_v43 = vld [vmem:[#allocation5 + $0x220] sm:$0xf] }
 0x1d1   : > { %2653 = vmatpush.bf16.msrb.mxu2 %v4033_v28  ;;  %v4456_v28 = vld [vmem:[#allocation5 + $0x360] sm:$0xf] }
 0x1d3   : > { %1489 = vmatmul.f32.gmra.mxu3 %v1318_v55  ;;  %1535 = vmatmul.f32.gmra.mxu1 %v1318_v55 }
 0x1d4   : > { %2662 = vmatpush.bf16.msrb.mxu3 %v4129_v29  ;;  %2688 = vmatpush.bf16.msrb.mxu1 %v4257_v54  ;;  %v4232_v29 = vld [vmem:[#allocation5 + $0x1a0] sm:$0xf] }
 0x1d5   : > { %v4233_v31 = vor.u32 %v4959_v24, %v4232_v29  ;;  %v4328_v54 = vld [vmem:[#allocation5 + $0x260] sm:$0xf]  ;;  %v5015_v29 = vld [vmem:[#allocation5 + $0x364] sm:$0xf0] }
 0x1d6   : > { %v4457_v24 = vor.u32 %v5015_v29, %v4456_v28 }
 0x1d8   : > { %2663 = vmatpush.bf16.msrb.mxu3 %v4121_v37  ;;  %2689 = vmatpush.bf16.msrb.mxu1 %v4249_v7  ;;  %v4024_v37 = vld [vmem:[#allocation5] sm:$0xf]  ;;  %v4321_v7 = vor.u32 %v4981_v6, %v4320_v5  ;;  %v4480_v5 = vld [vmem:[#allocation5 + $0x390] sm:$0xf]  ;;  %v5021_v6 = vld [vmem:[#allocation5 + $0x394] sm:$0xf0] }
 0x1d9   : > { %v4025_v39 = vor.u32 %v4907_v38, %v4024_v37  ;;  %v4989_v37 = vld [vmem:[#allocation5 + $0x294] sm:$0xf0] }
 0x1db   : > { %1578 = vmatmul.f32.vlgmr.msra.gmra.mxu3 %v1316_v49  ;;  %1624 = vmatmul.f32.vlgmr.msra.gmra.mxu1 %v1316_v49  ;;  %v4089_v49 = vor.u32 %v4923_v19, %v4088_v18  ;;  %v4369_v18 = vor.u32 %v4993_v15, %v4368_v13  ;;  %v4473_v15 = vor.u32 %v5019_v12, %v4472_v11  ;;  %v4934_v12 = vld [vmem:[#allocation5 + $0xe4] sm:$0xf] }
 0x1dc   : > { %2664 = vmatpush.bf16.msrb.mxu3 %v4113_v47  ;;  %2690 = vmatpush.bf16.msrb.mxu1 %v4241_v17  ;;  %v4168_v47 = vld [vmem:[#allocation5 + $0x120] sm:$0xf]  ;;  %v5017_v17 = vld [vmem:[#allocation5 + $0x374] sm:$0xf0] }
 0x1dd   : > { %2654 = vmatpush.bf16.msrb.mxu2 %v4025_v39  ;;  %v4169_v51 = vor.u32 %v4943_v48, %v4168_v47  ;;  %v4465_v19 = vor.u32 %v5017_v17, %v4464_v16  ;;  %v4448_v39 = vld [vmem:[#allocation5 + $0x350] sm:$0xf]  ;;  %v5025_v47 = vld [vmem:[#allocation5 + $0x3b4] sm:$0xf0] }
 0x1de   : > { %v4449_v42 = vor.u32 %v5013_v41, %v4448_v39  ;;  %v4416_v16 = vld [vmem:[#allocation5 + $0x310] sm:$0xf]  ;;  %v5005_v17 = vld [vmem:[#allocation5 + $0x314] sm:$0xf0] }
 0x1df   : > { %v4592_v41 = vld [vmem:[#allocation5 + $0x470] sm:$0xf] }
 0x1e0   : > { %2665 = vmatpush.bf16.msrb.mxu3 %v4105_v58  ;;  %2691 = vmatpush.bf16.msrb.mxu1 %v4233_v31  ;;  %v4329_v58 = vor.u32 %v4983_v56, %v4328_v54  ;;  %v4977_v31 = vld [vmem:[#allocation5 + $0x234] sm:$0xf0] }
 0x1e1   : > { %2699 = vmatpush.bf16.msra.mxu2 %v4337_v46  ;;  %v4305_v32 = vor.u32 %v4977_v31, %v4304_v30  ;;  %v4496_v46 = vld [vmem:[#allocation5 + $0x3b0] sm:$0xf]  ;;  %v4973_v54 = vld [vmem:[#allocation5 + $0x214] sm:$0xf0] }
 0x1e2   : > { %v4497_v48 = vor.u32 %v5025_v47, %v4496_v46  ;;  %v5065_v30 = vld [vmem:[#allocation5 + $0x4f4] sm:$0xf0] }
 0x1e3   : > { %1581 = vmatmul.f32.gmra.mxu3 %v1318_v55  ;;  %1627 = vmatmul.f32.gmra.mxu1 %v1318_v55  ;;  %v4184_v55 = vld [vmem:[#allocation5 + $0x140] sm:$0xf] }
 0x1e4   : > { %2666 = vmatpush.bf16.msrb.mxu3 %v4097_v8  ;;  %v4185_v21 = vor.u32 %v4947_v3, %v4184_v55  ;;  %2692 = vmatpush.bf16.msrb.mxu1 %v4225_v44  ;;  %v4520_v8 = vld [vmem:[#allocation5 + $0x3e0] sm:$0xf]  ;;  %v4979_v55 = vld [vmem:[#allocation5 + $0x244] sm:$0xf0]  ;;  %v4512_v3 = vld [vmem:[#allocation5 + $0x3d0] sm:$0xf] }
 0x1e5   : > { %2700 = vmatpush.bf16.msra.mxu2 %v4329_v58  ;;  %v4521_v10 = vor.u32 %v5031_v9, %v4520_v8  ;;  %v4975_v44 = vld [vmem:[#allocation5 + $0x224] sm:$0xf0]  ;;  %v4424_v8 = vld [vmem:[#allocation5 + $0x320] sm:$0xf] }
 0x1e6   : > { %2676 = vmatpush.bf16.msrb.mxu0 %v4185_v21  ;;  %v5029_v21 = vld [vmem:[#allocation5 + $0x3d4] sm:$0xf0]  ;;  %v4297_v45 = vor.u32 %v4975_v44, %v4296_v43  ;;  %v5023_v58 = vld [vmem:[#allocation5 + $0x3a4] sm:$0xf0] }
 0x1e7   : > { %v4513_v22 = vor.u32 %v5029_v21, %v4512_v3  ;;  %v4489_v60 = vor.u32 %v5023_v58, %v4488_v57  ;;  %v5007_v9 = vld [vmem:[#allocation5 + $0x324] sm:$0xf0]  ;;  %v4146_v57 = vld [vmem:[#allocation5 + $0xf8] sm:$0xf0] }
 0x1e8   : > { %2667 = vmatpush.bf16.msrb.mxu3 %v4089_v49  ;;  %2693 = vmatpush.bf16.msrb.mxu1 %v4217_v23  ;;  %v4312_v49 = vld [vmem:[#allocation5 + $0x240] sm:$0xf]  ;;  %v4288_v23 = vld [vmem:[#allocation5 + $0x210] sm:$0xf] }
 0x1e9   : > { %2701 = vmatpush.bf16.msra.mxu2 %v4321_v7  ;;  %v4313_v20 = vor.u32 %v4979_v55, %v4312_v49  ;;  %v4289_v56 = vor.u32 %v4973_v54, %v4288_v23  ;;  %v4481_v7 = vor.u32 %v5021_v6, %v4480_v5  ;;  %v4408_v49 = vld [vmem:[#allocation5 + $0x300] sm:$0xf]  ;;  %v5003_v55 = vld [vmem:[#allocation5 + $0x304] sm:$0xf0] }
 0x1ea   : > { %2677 = vmatpush.bf16.msrb.mxu0 %v4177_v35  ;;  %v4505_v35 = vor.u32 %v5027_v34, %v4504_v33  ;;  %v5047_v23 = vld [vmem:[#allocation5 + $0x464] sm:$0xf0] }
 0x1ec   : > { %2712 = vmatpush.bf16.msra.mxu3 %v4401_v27  ;;  %2738 = vmatpush.bf16.msra.mxu1 %v4529_v61  ;;  %v4361_v27 = vor.u32 %v4991_v26, %v4360_v25  ;;  %v4432_v61 = vld [vmem:[#allocation5 + $0x330] sm:$0xf] }
 0x1ed   : > { %2702 = vmatpush.bf16.msra.mxu2 %v4313_v20  ;;  %v4433_v0 = vor.u32 %v5009_v62, %v4432_v61  ;;  %v4409_v20 = vor.u32 %v5003_v55, %v4408_v49  ;;  %v4632_v61 = vld [vmem:[#allocation5 + $0x4c0] sm:$0xf]  ;;  %v5059_v62 = vld [vmem:[#allocation5 + $0x4c4] sm:$0xf0]  ;;  %v4920_v49 = vld [vmem:[#allocation5 + $0x74] sm:$0xf] }
 0x1ee   : > { %2678 = vmatpush.bf16.msrb.mxu0 %v4169_v51  ;;  %v4987_v51 = vld [vmem:[#allocation5 + $0x284] sm:$0xf0]  ;;  %v4633_v11 = vor.u32 %v5059_v62, %v4632_v61  ;;  %v4082_v55 = vld [vmem:[#allocation5 + $0x78] sm:$0xf0]  ;;  %v4552_v61 = vld [vmem:[#allocation5 + $0x420] sm:$0xf] }
 0x1ef   : > { %v4345_v52 = vor.u32 %v4987_v51, %v4344_v50  ;;  %v4640_v50 = vld [vmem:[#allocation5 + $0x4d0] sm:$0xf]  ;;  %v5061_v51 = vld [vmem:[#allocation5 + $0x4d4] sm:$0xf0]  ;;  %v5039_v62 = vld [vmem:[#allocation5 + $0x424] sm:$0xf0] }
 0x1f0   : > { %2713 = vmatpush.bf16.msra.mxu3 %v4393_v36  ;;  %2739 = vmatpush.bf16.msra.mxu1 %v4521_v10  ;;  %v4352_v36 = vld [vmem:[#allocation5 + $0x290] sm:$0xf]  ;;  %v4425_v10 = vor.u32 %v5007_v9, %v4424_v8  ;;  %v4641_v54 = vor.u32 %v5061_v51, %v4640_v50  ;;  %v5045_v9 = vld [vmem:[#allocation5 + $0x454] sm:$0xf0]  ;;  %v4122_v50 = vld [vmem:[#allocation5 + $0xc8] sm:$0xf0] }
 0x1f1   : > { %v4353_v38 = vor.u32 %v4989_v37, %v4352_v36  ;;  %2703 = vmatpush.bf16.msra.mxu2 %v4305_v32  ;;  %v5063_v36 = vld [vmem:[#allocation5 + $0x4e4] sm:$0xf0]  ;;  %v4576_v8 = vld [vmem:[#allocation5 + $0x450] sm:$0xf] }
 0x1f2   : > { %2679 = vmatpush.bf16.msrb.mxu0 %v4161_v1  ;;  %v4280_v1 = vld [vmem:[#allocation5 + $0x200] sm:$0xf] }
 0x1f4   : > { %2714 = vmatpush.bf16.msra.mxu3 %v4385_v53  ;;  %2740 = vmatpush.bf16.msra.mxu1 %v4513_v22  ;;  %v4441_v53 = vor.u32 %v5011_v40, %v4440_v59 }
 0x1f5   : > { %2704 = vmatpush.bf16.msra.mxu2 %v4297_v45 }
 0x1f6   : > { %2680 = vmatpush.bf16.msrb.mxu0 %v4153_v14 }
 0x1f8   : > { %2715 = vmatpush.bf16.msra.mxu3 %v4377_v4  ;;  %2741 = vmatpush.bf16.msra.mxu1 %v4505_v35  ;;  %v4281_v4 = vor.u32 %v4971_v2, %v4280_v1  ;;  %v4648_v35 = vld [vmem:[#allocation5 + $0x4e0] sm:$0xf] }
 0x1f9   : > { %2705 = vmatpush.bf16.msra.mxu2 %v4289_v56  ;;  %v4649_v45 = vor.u32 %v5063_v36, %v4648_v35  ;;  %v4936_v56 = vld [vmem:[#allocation5 + $0xf4] sm:$0xf]  ;;  %v5055_v35 = vld [vmem:[#allocation5 + $0x4a4] sm:$0xf0] }
 0x1fa   : > { %2725 = vmatpush.bf16.msra.mxu0 %v4465_v19 }
 0x1fc   : > { %2716 = vmatpush.bf16.msra.mxu3 %v4369_v18  ;;  %2742 = vmatpush.bf16.msra.mxu1 %v4497_v48  ;;  %v4417_v18 = vor.u32 %v5005_v17, %v4416_v16  ;;  %v4624_v16 = vld [vmem:[#allocation5 + $0x4b0] sm:$0xf]  ;;  %v5057_v17 = vld [vmem:[#allocation5 + $0x4b4] sm:$0xf0] }
 0x1fd   : > { %2706 = vmatpush.bf16.msra.mxu2 %v4281_v4 }
 0x1fe   : > { %2726 = vmatpush.bf16.msra.mxu0 %v4457_v24  ;;  %v4656_v24 = vld [vmem:[#allocation5 + $0x4f0] sm:$0xf] }
 0x1ff   : > { %v4657_v33 = vor.u32 %v5065_v30, %v4656_v24 }
 0x200   : > { %2717 = vmatpush.bf16.msra.mxu3 %v4361_v27  ;;  %2743 = vmatpush.bf16.msra.mxu1 %v4489_v60 }
 0x202   : > { %2727 = vmatpush.bf16.msra.mxu0 %v4449_v42  ;;  %v5049_v42 = vld [vmem:[#allocation5 + $0x474] sm:$0xf0] }
 0x204   : > { %2718 = vmatpush.bf16.msra.mxu3 %v4353_v38  ;;  %2744 = vmatpush.bf16.msra.mxu1 %v4481_v7  ;;  %v4149_v7 = vor.u32 %v4936_v56, %v4146_v57  ;;  %v4916_v56 = vld [vmem:[#allocation5 + $0x54] sm:$0xf]  ;;  %v4066_v57 = vld [vmem:[#allocation5 + $0x58] sm:$0xf0] }
 0x206   : > { %2728 = vmatpush.bf16.msra.mxu0 %v4441_v53  ;;  %v4584_v53 = vld [vmem:[#allocation5 + $0x460] sm:$0xf] }
 0x207   : > { %v4585_v2 = vor.u32 %v5047_v23, %v4584_v53  ;;  %v4608_v53 = vld [vmem:[#allocation5 + $0x490] sm:$0xf]  ;;  %v5053_v23 = vld [vmem:[#allocation5 + $0x494] sm:$0xf0] }
 0x208   : > { %2719 = vmatpush.bf16.msra.mxu3 %v4345_v52  ;;  %2745 = vmatpush.bf16.msra.mxu1 %v4473_v15  ;;  %v4593_v52 = vor.u32 %v5049_v42, %v4592_v41 }
 0x20a   : > { %2729 = vmatpush.bf16.msra.mxu0 %v4433_v0 }
 0x20e   : > { %2730 = vmatpush.bf16.msra.mxu0 %v4425_v10 }
 0x212   : > { %2731 = vmatpush.bf16.msra.mxu0 %v4417_v18  ;;  %v4577_v18 = vor.u32 %v5045_v9, %v4576_v8  ;;  %v4914_v8 = vld [vmem:[#allocation5 + $0x44] sm:$0xf]  ;;  %v4058_v9 = vld [vmem:[#allocation5 + $0x48] sm:$0xf0] }
 0x216   : > { %2732 = vmatpush.bf16.msra.mxu0 %v4409_v20 }
 0x226   : > { %v1510_v63 = vpop.f32.mrf.mxu0 }
 0x22c   : > { %v1464_v13 = vpop.f32.mrf.mxu2 }
 0x22e   : > { %v1513_v19 = vpop.f32.mrf.mxu0 }
 0x234   : > { %v1467_v22 = vpop.f32.mrf.mxu2 }
 0x236   : > { %v1602_v25 = vpop.f32.mrf.mxu0 }
 0x23c   : > { %v1556_v32 = vpop.f32.mrf.mxu2 }
 0x23e   : > { %v1605_v43 = vpop.f32.mrf.mxu0 }
 0x248   : > { %v1533_v14 = vpop.f32.mrf.mxu1 }
 0x249   : > { %v1534_v28 = vadd.f32 %v1533_v14, %v1510_v63  ;;  %v1559_v63 = vpop.f32.mrf.mxu2 }
 0x24e   : > { %v1487_v3 = vpop.f32.mrf.mxu3 }
 0x24f   : > { %v1488_v38 = vadd.f32 %v1487_v3, %v1464_v13  ;;  %v4138_v13 = vld [vmem:[#allocation5 + $0xe8] sm:$0xf0] }
 0x250   : > { %v1536_v21 = vpop.f32.mrf.mxu1  ;;  %v4141_v20 = vor.u32 %v4934_v12, %v4138_v13  ;;  %v4553_v12 = vor.u32 %v5039_v62, %v4552_v61  ;;  %v4968_v13 = vld [vmem:[#allocation5 + $0x1f4] sm:$0xf]  ;;  %v4950_v61 = vld [vmem:[#allocation5 + $0x164] sm:$0xf]  ;;  %v4202_v62 = vld [vmem:[#allocation5 + $0x168] sm:$0xf0] }
 0x251   : > { %v1537_v46 = vadd.f32 %v1536_v21, %v1513_v19 }
 0x256   : > { %v1490_v26 = vpop.f32.mrf.mxu3 }
 0x257   : > { %v1491_v4 = vadd.f32 %v1490_v26, %v1467_v22  ;;  %v4568_v22 = vld [vmem:[#allocation5 + $0x440] sm:$0xf] }
 0x258   : > { %v1625_v27 = vpop.f32.mrf.mxu1 }
 0x259   : > { %v1626_v29 = vadd.f32 %v1625_v27, %v1602_v25  ;;  %v5043_v25 = vld [vmem:[#allocation5 + $0x444] sm:$0xf0]  ;;  %v4625_v27 = vor.u32 %v5057_v17, %v4624_v16 }
 0x25b   : > { %v6347_v31 = vmax.f32 %v1534_v28, %v1626_v29  ;;  %v4932_v28 = vld [vmem:[#allocation5 + $0xd4] sm:$0xf]  ;;  %v4130_v29 = vld [vmem:[#allocation5 + $0xd8] sm:$0xf0] }
 0x25c   : > { %v4133_v42 = vor.u32 %v4932_v28, %v4130_v29  ;;  %v4050_v29 = vld [vmem:[#allocation5 + $0x38] sm:$0xf0] }
 0x25d   : > { %v6351_v34 = vpack.c.bf16 %v6347_v31, %v6347_v31  ;;  %v1642_v60 = vrot.slane %v6347_v31, 1  ;;  %v1650_v14 = vrot.slane %v6347_v31, 2 }
 0x25e   : > { %v1579_v37 = vpop.f32.mrf.mxu3 }
 0x25f   : > { %v1580_v39 = vadd.f32 %v1579_v37, %v1556_v32  ;;  %2668 = vmatmul.bf16.vlgmr.msrb.gmra.mxu3 %v6351_v34  ;;  %v4085_v32 = vor.u32 %v4920_v49, %v4082_v55  ;;  %v4569_v37 = vor.u32 %v5043_v25, %v4568_v22 }
 0x260   : > { %2764 = vmatpush.bf16.msrb.mxu3 %v4657_v33  ;;  %v1628_v44 = vpop.f32.mrf.mxu1  ;;  %v4616_v33 = vld [vmem:[#allocation5 + $0x4a0] sm:$0xf] }
 0x261   : > { %v6354_v47 = vmax.f32 %v1488_v38, %v1580_v39  ;;  %v1629_v48 = vadd.f32 %v1628_v44, %v1605_v43  ;;  %v4918_v38 = vld [vmem:[#allocation5 + $0x64] sm:$0xf]  ;;  %v4074_v39 = vld [vmem:[#allocation5 + $0x68] sm:$0xf0]  ;;  %v4560_v43 = vld [vmem:[#allocation5 + $0x430] sm:$0xf] }
 0x262   : > { %v5041_v44 = vld [vmem:[#allocation5 + $0x434] sm:$0xf0] }
 0x263   : > { %v6356_v59 = vmax.f32 %v1537_v46, %v1629_v48  ;;  %v6360_v40 = vpack.c.bf16 %v6354_v47, %v6354_v47  ;;  %v1639_v21 = vrot.slane %v6354_v47, 1  ;;  %v1647_v41 = vrot.slane %v6354_v47, 2  ;;  %v4930_v48 = vld [vmem:[#allocation5 + $0xc4] sm:$0xf] }
 0x264   : > { %2765 = vmatpush.bf16.msrb.mxu3 %v4649_v45  ;;  %v4617_v45 = vor.u32 %v5055_v35, %v4616_v33  ;;  %v1655_v25 = vrot.slane %v6354_v47, 3 }
 0x265   : > { %v1643_v58 = vrot.slane %v6356_v59, 1  ;;  %2655 = vmatmul.bf16.vlgmr.msrb.gmra.mxu2 %v6360_v40  ;;  %v1651_v0 = vrot.slane %v6356_v59, 2  ;;  %v1659_v51 = vrot.slane %v6356_v59, 3 }
 0x266   : > { %2751 = vmatpush.bf16.msrb.mxu2 %v4593_v52  ;;  %v1582_v1 = vpop.f32.mrf.mxu3  ;;  %v4077_v52 = vor.u32 %v4918_v38, %v4074_v39  ;;  %v4924_v38 = vld [vmem:[#allocation5 + $0x94] sm:$0xf]  ;;  %v4098_v39 = vld [vmem:[#allocation5 + $0x98] sm:$0xf0] }
 0x267   : > { %v1583_v5 = vadd.f32 %v1582_v1, %v1559_v63  ;;  %v1644_v6 = vsel %vm569_vm2, %v1642_v60, %v1643_v58  ;;  %v1652_v19 = vsel %vm577_vm0, %v1650_v14, %v1651_v0  ;;  %v4125_v60 = vor.u32 %v4930_v48, %v4122_v50  ;;  %v4928_v1 = vld [vmem:[#allocation5 + $0xb4] sm:$0xf]  ;;  %v4274_v14 = vld [vmem:[#allocation5 + $0x1f8] sm:$0xf0]  ;;  %v4910_v48 = vld [vmem:[#allocation5 + $0x24] sm:$0xf] }
 0x268   : > { %2766 = vmatpush.bf16.msrb.mxu3 %v4641_v54  ;;  %v6367_v10 = vpack.c.bf16 %v1644_v6, %v1644_v6  ;;  %v6377_v24 = vpack.c.bf16 %v1652_v19, %v1652_v19  ;;  %v4561_v54 = vor.u32 %v5041_v44, %v4560_v43  ;;  %v1658_v63 = vrot.slane %v6347_v31, 3  ;;  %v5037_v19 = vld [vmem:[#allocation5 + $0x414] sm:$0xf0] }
 0x269   : > { %v6370_v15 = vmax.f32 %v1491_v4, %v1583_v5  ;;  %v4609_v0 = vor.u32 %v5053_v23, %v4608_v53  ;;  %v4600_v4 = vld [vmem:[#allocation5 + $0x480] sm:$0xf]  ;;  %v4069_v5 = vor.u32 %v4916_v56, %v4066_v57  ;;  %v4277_v22 = vor.u32 %v4968_v13, %v4274_v14  ;;  %v4964_v53 = vld [vmem:[#allocation5 + $0x1d4] sm:$0xf]  ;;  %v4258_v23 = vld [vmem:[#allocation5 + $0x1d8] sm:$0xf0] }
 0x26a   : > { %2752 = vmatpush.bf16.msrb.mxu2 %v4585_v2  ;;  %2694 = vmatmul.bf16.vlgmr.msrb.gmra.mxu1 %v6367_v10  ;;  %v4114_v2 = vld [vmem:[#allocation5 + $0xb8] sm:$0xf0]  ;;  %v1660_v6 = vsel %vm585_vm1, %v1658_v63, %v1659_v51  ;;  %v4922_v57 = vld [vmem:[#allocation5 + $0x84] sm:$0xf]  ;;  %v4948_v13 = vld [vmem:[#allocation5 + $0x154] sm:$0xf] }
 0x26b   : > { %v1640_v3 = vrot.slane %v6370_v15, 1  ;;  %2790 = vmatpush.bf16.msrb.mxu1 %v4149_v7  ;;  %v1648_v26 = vrot.slane %v6370_v15, 2  ;;  %v5051_v7 = vld [vmem:[#allocation5 + $0x484] sm:$0xf0]  ;;  %v1656_v16 = vrot.slane %v6370_v15, 3  ;;  %v4117_v17 = vor.u32 %v4928_v1, %v4114_v2 }
 0x26c   : > { %2767 = vmatpush.bf16.msrb.mxu3 %v4633_v11  ;;  %v1667_v11 = vrot.slane %v6356_v59, 4  ;;  %v6394_v49 = vpack.c.bf16 %v1660_v6, %v1660_v6  ;;  %v4601_v55 = vor.u32 %v5051_v7, %v4600_v4  ;;  %v4061_v59 = vor.u32 %v4914_v8, %v4058_v9  ;;  %v5000_v2 = vld [vmem:[#allocation5 + $0x2f4] sm:$0xf]  ;;  %v4402_v4 = vld [vmem:[#allocation5 + $0x2f8] sm:$0xf0] }
 0x26d   : > { %v1641_v30 = vsel %vm569_vm2, %v1639_v21, %v1640_v3  ;;  %v1649_v46 = vsel %vm577_vm0, %v1647_v41, %v1648_v26  ;;  %v4926_v3 = vld [vmem:[#allocation5 + $0xa4] sm:$0xf]  ;;  %v1666_v21 = vrot.slane %v6347_v31, 4  ;;  %v4912_v26 = vld [vmem:[#allocation5 + $0x34] sm:$0xf]  ;;  %v1657_v35 = vsel %vm585_vm1, %v1655_v25, %v1656_v16 }
 0x26e   : > { %2753 = vmatpush.bf16.msrb.mxu2 %v4577_v18  ;;  %v6380_v36 = vpack.c.bf16 %v1641_v30, %v1641_v30  ;;  %v6387_v58 = vpack.c.bf16 %v1649_v46, %v1649_v46  ;;  %v4544_v18 = vld [vmem:[#allocation5 + $0x410] sm:$0xf]  ;;  %v4966_v30 = vld [vmem:[#allocation5 + $0x1e4] sm:$0xf]  ;;  %v4536_v31 = vld [vmem:[#allocation5 + $0x400] sm:$0xf]  ;;  %v6404_v50 = vpack.c.bf16 %v1657_v35, %v1657_v35  ;;  %v4205_v9 = vor.u32 %v4950_v61, %v4202_v62 }
 0x26f   : > { %2791 = vmatpush.bf16.msrb.mxu1 %v4141_v20  ;;  %2720 = vmatmul.bf16.vlgmr.msra.gmra.mxu3 %v6377_v24  ;;  %v4106_v20 = vld [vmem:[#allocation5 + $0xa8] sm:$0xf0]  ;;  %v1668_v28 = vsel %vm593_vm3, %v1666_v21, %v1667_v11  ;;  %v4952_v41 = vld [vmem:[#allocation5 + $0x174] sm:$0xf]  ;;  %v1664_v43 = vrot.slane %v6370_v15, 4  ;;  %v1663_v15 = vrot.slane %v6354_v47, 4 }
 0x270   : > { %2768 = vmatpush.bf16.msrb.mxu3 %v4625_v27  ;;  %2681 = vmatmul.bf16.vlgmr.msrb.gmra.mxu0 %v6380_v36  ;;  %v4545_v27 = vor.u32 %v5037_v19, %v4544_v18  ;;  %v4109_v33 = vor.u32 %v4926_v3, %v4106_v20  ;;  %v6402_v44 = vpack.c.bf16 %v1668_v28, %v1668_v28  ;;  %v4034_v6 = vld [vmem:[#allocation5 + $0x18] sm:$0xf0]  ;;  %v4962_v7 = vld [vmem:[#allocation5 + $0x1c4] sm:$0xf]  ;;  %v4250_v8 = vld [vmem:[#allocation5 + $0x1c8] sm:$0xf0] }
 0x271   : > { %2777 = vmatpush.bf16.msrb.mxu0 %v4085_v32  ;;  %v4266_v32 = vld [vmem:[#allocation5 + $0x1e8] sm:$0xf0]  ;;  %v1665_v1 = vsel %vm593_vm3, %v1663_v15, %v1664_v43  ;;  %v4194_v14 = vld [vmem:[#allocation5 + $0x158] sm:$0xf0]  ;;  %v4998_v18 = vld [vmem:[#allocation5 + $0x2e4] sm:$0xf] }
 0x272   : > { %2754 = vmatpush.bf16.msrb.mxu2 %v4569_v37  ;;  %v5035_v37 = vld [vmem:[#allocation5 + $0x404] sm:$0xf0]  ;;  %v4269_v46 = vor.u32 %v4966_v30, %v4266_v32  ;;  %v6410_v11 = vpack.c.bf16 %v1665_v1, %v1665_v1  ;;  %v4394_v19 = vld [vmem:[#allocation5 + $0x2e8] sm:$0xf0]  ;;  %v4960_v20 = vld [vmem:[#allocation5 + $0x1b4] sm:$0xf] }
 0x273   : > { %2792 = vmatpush.bf16.msrb.mxu1 %v4133_v42  ;;  %v4210_v42 = vld [vmem:[#allocation5 + $0x178] sm:$0xf0]  ;;  %v4537_v51 = vor.u32 %v5035_v37, %v4536_v31  ;;  %v4026_v3 = vld [vmem:[#allocation5 + $0x8] sm:$0xf0]  ;;  %v4996_v32 = vld [vmem:[#allocation5 + $0x2d4] sm:$0xf] }
 0x274   : > { %2769 = vmatpush.bf16.msrb.mxu3 %v4617_v45  ;;  %v4053_v45 = vor.u32 %v4912_v26, %v4050_v29  ;;  %v4213_v56 = vor.u32 %v4952_v41, %v4210_v42  ;;  %v4242_v21 = vld [vmem:[#allocation5 + $0x1b8] sm:$0xf0]  ;;  %v4397_v26 = vor.u32 %v4998_v18, %v4394_v19  ;;  %v4186_v28 = vld [vmem:[#allocation5 + $0x148] sm:$0xf0]  ;;  %v4958_v31 = vld [vmem:[#allocation5 + $0x1a4] sm:$0xf] }
 0x275   : > { %2778 = vmatpush.bf16.msrb.mxu0 %v4077_v52  ;;  %2707 = vmatmul.bf16.vlgmr.msra.gmra.mxu2 %v6387_v58  ;;  %v4042_v52 = vld [vmem:[#allocation5 + $0x28] sm:$0xf0]  ;;  %v4338_v25 = vld [vmem:[#allocation5 + $0x278] sm:$0xf0]  ;;  %v4245_v30 = vor.u32 %v4960_v20, %v4242_v21  ;;  %v4944_v43 = vld [vmem:[#allocation5 + $0x134] sm:$0xf] }
 0x276   : > { %2755 = vmatpush.bf16.msrb.mxu2 %v4561_v54  ;;  %v4101_v54 = vor.u32 %v4924_v38, %v4098_v39  ;;  %v4045_v63 = vor.u32 %v4910_v48, %v4042_v52  ;;  %v4234_v37 = vld [vmem:[#allocation5 + $0x1a8] sm:$0xf0]  ;;  %v4982_v39 = vld [vmem:[#allocation5 + $0x264] sm:$0xf]  ;;  %v4992_v62 = vld [vmem:[#allocation5 + $0x2b4] sm:$0xf] }
 0x277   : > { %2793 = vmatpush.bf16.msrb.mxu1 %v4125_v60  ;;  %v4090_v60 = vld [vmem:[#allocation5 + $0x88] sm:$0xf0]  ;;  %v4994_v48 = vld [vmem:[#allocation5 + $0x2c4] sm:$0xf]  ;;  %v4976_v18 = vld [vmem:[#allocation5 + $0x234] sm:$0xf] }
 0x278   : > { %2770 = vmatpush.bf16.msrb.mxu3 %v4609_v0  ;;  %v4261_v0 = vor.u32 %v4964_v53, %v4258_v23  ;;  %v4093_v47 = vor.u32 %v4922_v57, %v4090_v60  ;;  %v4330_v41 = vld [vmem:[#allocation5 + $0x268] sm:$0xf0]  ;;  %v4956_v53 = vld [vmem:[#allocation5 + $0x194] sm:$0xf]  ;;  %v4942_v57 = vld [vmem:[#allocation5 + $0x124] sm:$0xf] }
 0x279   : > { %2779 = vmatpush.bf16.msrb.mxu0 %v4069_v5  ;;  %v4908_v5 = vld [vmem:[#allocation5 + $0x14] sm:$0xf]  ;;  %v4333_v52 = vor.u32 %v4982_v39, %v4330_v41  ;;  %v4170_v60 = vld [vmem:[#allocation5 + $0x128] sm:$0xf0]  ;;  %v4954_v1 = vld [vmem:[#allocation5 + $0x184] sm:$0xf] }
 0x27a   : > { %2756 = vmatpush.bf16.msrb.mxu2 %v4553_v12  ;;  %2746 = vmatmul.bf16.vlgmr.msra.gmra.mxu1 %v6394_v49  ;;  %v4405_v12 = vor.u32 %v5000_v2, %v4402_v4  ;;  %v4037_v16 = vor.u32 %v4908_v5, %v4034_v6  ;;  %v4218_v2 = vld [vmem:[#allocation5 + $0x188] sm:$0xf0]  ;;  %v4978_v4 = vld [vmem:[#allocation5 + $0x244] sm:$0xf]  ;;  %v4173_v5 = vor.u32 %v4942_v57, %v4170_v60  ;;  %v4514_v39 = vld [vmem:[#allocation5 + $0x3d8] sm:$0xf0] }
 0x27b   : > { %2794 = vmatpush.bf16.msrb.mxu1 %v4117_v17  ;;  %v4253_v17 = vor.u32 %v4962_v7, %v4250_v8  ;;  %v4314_v6 = vld [vmem:[#allocation5 + $0x248] sm:$0xf0]  ;;  %v5032_v7 = vld [vmem:[#allocation5 + $0x3f4] sm:$0xf]  ;;  %v4530_v8 = vld [vmem:[#allocation5 + $0x3f8] sm:$0xf0] }
 0x27c   : > { %2771 = vmatpush.bf16.msrb.mxu3 %v4601_v55  ;;  %v4906_v55 = vld [vmem:[#allocation5 + $0x4] sm:$0xf]  ;;  %v4522_v20 = vld [vmem:[#allocation5 + $0x3e8] sm:$0xf0]  ;;  %v5012_v57 = vld [vmem:[#allocation5 + $0x354] sm:$0xf] }
 0x27d   : > { %2780 = vmatpush.bf16.msrb.mxu0 %v4061_v59  ;;  %v4197_v59 = vor.u32 %v4948_v13, %v4194_v14  ;;  %v4029_v29 = vor.u32 %v4906_v55, %v4026_v3  ;;  %v4990_v13 = vld [vmem:[#allocation5 + $0x2a4] sm:$0xf]  ;;  %v4362_v14 = vld [vmem:[#allocation5 + $0x2a8] sm:$0xf0]  ;;  %v4306_v55 = vld [vmem:[#allocation5 + $0x238] sm:$0xf0] }
 0x27e   : > { %2757 = vmatpush.bf16.msrb.mxu2 %v4545_v27  ;;  %v4946_v27 = vld [vmem:[#allocation5 + $0x144] sm:$0xf]  ;;  %v4365_v21 = vor.u32 %v4990_v13, %v4362_v14  ;;  %v4450_v60 = vld [vmem:[#allocation5 + $0x358] sm:$0xf0] }
 0x27f   : > { %2795 = vmatpush.bf16.msrb.mxu1 %v4109_v33  ;;  %2772 = vmatmul.bf16.vlgmr.msrb.gmra.mxu3 %v6402_v44  ;;  %v4386_v33 = vld [vmem:[#allocation5 + $0x2d8] sm:$0xf0]  ;;  %v4189_v38 = vor.u32 %v4946_v27, %v4186_v28  ;;  %v5030_v3 = vld [vmem:[#allocation5 + $0x3e4] sm:$0xf]  ;;  %v5016_v27 = vld [vmem:[#allocation5 + $0x374] sm:$0xf] }
 0x280   : > { %2816 = vmatpush.bf16.msra.mxu3 %v4277_v22  ;;  %2733 = vmatmul.bf16.vlgmr.msra.gmra.mxu0 %v6404_v50  ;;  %v4984_v22 = vld [vmem:[#allocation5 + $0x274] sm:$0xf]  ;;  %v4389_v42 = vor.u32 %v4996_v32, %v4386_v33  ;;  %v4466_v28 = vld [vmem:[#allocation5 + $0x378] sm:$0xf0]  ;;  %v4974_v33 = vld [vmem:[#allocation5 + $0x224] sm:$0xf] }
 0x281   : > { %2781 = vmatpush.bf16.msrb.mxu0 %v4053_v45  ;;  %v4341_v35 = vor.u32 %v4984_v22, %v4338_v25  ;;  %v4178_v45 = vld [vmem:[#allocation5 + $0x138] sm:$0xf0]  ;;  %v4154_v22 = vld [vmem:[#allocation5 + $0x108] sm:$0xf0]  ;;  %v4988_v25 = vld [vmem:[#allocation5 + $0x294] sm:$0xf] }
 0x282   : > { %2758 = vmatpush.bf16.msrb.mxu2 %v4537_v51  ;;  %v4378_v51 = vld [vmem:[#allocation5 + $0x2c8] sm:$0xf0]  ;;  %v4181_v23 = vor.u32 %v4944_v43, %v4178_v45  ;;  %v4986_v41 = vld [vmem:[#allocation5 + $0x284] sm:$0xf]  ;;  %v4642_v13 = vld [vmem:[#allocation5 + $0x4d8] sm:$0xf0] }
 0x283   : > { %2796 = vmatpush.bf16.msrb.mxu1 %v4101_v54  ;;  %v4980_v54 = vld [vmem:[#allocation5 + $0x254] sm:$0xf]  ;;  %v4381_v15 = vor.u32 %v4994_v48, %v4378_v51  ;;  %v5014_v43 = vld [vmem:[#allocation5 + $0x364] sm:$0xf]  ;;  %v4458_v45 = vld [vmem:[#allocation5 + $0x368] sm:$0xf0] }
 0x284   : > { %2817 = vmatpush.bf16.msra.mxu3 %v4269_v46  ;;  %v4237_v46 = vor.u32 %v4958_v31, %v4234_v37  ;;  %v4469_v37 = vor.u32 %v5016_v27, %v4466_v28  ;;  %v5064_v48 = vld [vmem:[#allocation5 + $0x4f4] sm:$0xf]  ;;  %v4658_v51 = vld [vmem:[#allocation5 + $0x4f8] sm:$0xf0] }
 0x285   : > { %2782 = vmatpush.bf16.msrb.mxu0 %v4045_v63  ;;  %2759 = vmatmul.bf16.vlgmr.msrb.gmra.mxu2 %v6410_v11  ;;  %v4370_v63 = vld [vmem:[#allocation5 + $0x2b8] sm:$0xf0] }
 0x286   : > { %2803 = vmatpush.bf16.msra.mxu2 %v4213_v56  ;;  %v4322_v56 = vld [vmem:[#allocation5 + $0x258] sm:$0xf0] }
 0x287   : > { %2797 = vmatpush.bf16.msrb.mxu1 %v4093_v47  ;;  %v4373_v47 = vor.u32 %v4992_v62, %v4370_v63  ;;  %v5062_v62 = vld [vmem:[#allocation5 + $0x4e4] sm:$0xf]  ;;  %v4650_v63 = vld [vmem:[#allocation5 + $0x4e8] sm:$0xf0] }
 0x288   : > { %2818 = vmatpush.bf16.msra.mxu3 %v4261_v0  ;;  %v4325_v0 = vor.u32 %v4980_v54, %v4322_v56  ;;  %v5026_v54 = vld [vmem:[#allocation5 + $0x3c4] sm:$0xf]  ;;  %v4506_v56 = vld [vmem:[#allocation5 + $0x3c8] sm:$0xf0] }
 0x289   : > { %2783 = vmatpush.bf16.msrb.mxu0 %v4037_v16  ;;  %v4317_v16 = vor.u32 %v4978_v4, %v4314_v6  ;;  %v5024_v4 = vld [vmem:[#allocation5 + $0x3b4] sm:$0xf]  ;;  %v4498_v6 = vld [vmem:[#allocation5 + $0x3b8] sm:$0xf0] }
 0x28a   : > { %2804 = vmatpush.bf16.msra.mxu2 %v4205_v9  ;;  %2798 = vmatmul.bf16.vlgmr.msrb.gmra.mxu1 %v6351_v34  ;;  %v4226_v34 = vld [vmem:[#allocation5 + $0x198] sm:$0xf0]  ;;  %v4501_v14 = vor.u32 %v5024_v4, %v4498_v6  ;;  %v4554_v4 = vld [vmem:[#allocation5 + $0x428] sm:$0xf0]  ;;  %v5050_v6 = vld [vmem:[#allocation5 + $0x484] sm:$0xf] }
 0x28b   : > { %2842 = vmatpush.bf16.msra.mxu1 %v4405_v12  ;;  %v4229_v61 = vor.u32 %v4956_v53, %v4226_v34  ;;  %v4162_v9 = vld [vmem:[#allocation5 + $0x118] sm:$0xf0]  ;;  %v4221_v12 = vor.u32 %v4954_v1, %v4218_v2  ;;  %v4972_v53 = vld [vmem:[#allocation5 + $0x214] sm:$0xf]  ;;  %v4970_v1 = vld [vmem:[#allocation5 + $0x204] sm:$0xf] }
 0x28c   : > { %2819 = vmatpush.bf16.msra.mxu3 %v4253_v17  ;;  %v4533_v17 = vor.u32 %v5032_v7, %v4530_v8  ;;  %v4290_v34 = vld [vmem:[#allocation5 + $0x218] sm:$0xf0]  ;;  %v4282_v2 = vld [vmem:[#allocation5 + $0x208] sm:$0xf0]  ;;  %v5048_v7 = vld [vmem:[#allocation5 + $0x474] sm:$0xf] }
 0x28d   : > { %2784 = vmatpush.bf16.msrb.mxu0 %v4029_v29  ;;  %v4309_v29 = vor.u32 %v4976_v18, %v4306_v55  ;;  %v4594_v8 = vld [vmem:[#allocation5 + $0x478] sm:$0xf0]  ;;  %v5046_v55 = vld [vmem:[#allocation5 + $0x464] sm:$0xf] }
 0x28e   : > { %2805 = vmatpush.bf16.msra.mxu2 %v4197_v59  ;;  %v4938_v59 = vld [vmem:[#allocation5 + $0x104] sm:$0xf] }
 0x28f   : > { %2843 = vmatpush.bf16.msra.mxu1 %v4397_v26  ;;  %v4354_v26 = vld [vmem:[#allocation5 + $0x298] sm:$0xf0]  ;;  %v4157_v32 = vor.u32 %v4938_v59, %v4154_v22  ;;  %v5058_v22 = vld [vmem:[#allocation5 + $0x4c4] sm:$0xf] }
 0x290   : > { %2820 = vmatpush.bf16.msra.mxu3 %v4245_v30  ;;  %2785 = vmatmul.bf16.vlgmr.msrb.gmra.mxu0 %v6360_v40  ;;  %v4940_v40 = vld [vmem:[#allocation5 + $0x114] sm:$0xf]  ;;  %v4525_v30 = vor.u32 %v5030_v3, %v4522_v20  ;;  %v4357_v31 = vor.u32 %v4988_v25, %v4354_v26  ;;  %v4586_v3 = vld [vmem:[#allocation5 + $0x468] sm:$0xf0]  ;;  %v4434_v59 = vld [vmem:[#allocation5 + $0x338] sm:$0xf0] }
 0x291   : > { %2829 = vmatpush.bf16.msra.mxu0 %v4341_v35  ;;  %v4165_v19 = vor.u32 %v4940_v40, %v4162_v9  ;;  %v4298_v35 = vld [vmem:[#allocation5 + $0x228] sm:$0xf0]  ;;  %v5010_v40 = vld [vmem:[#allocation5 + $0x344] sm:$0xf]  ;;  %v4589_v27 = vor.u32 %v5046_v55, %v4586_v3 }
 0x292   : > { %2806 = vmatpush.bf16.msra.mxu2 %v4189_v38  ;;  %v5028_v38 = vld [vmem:[#allocation5 + $0x3d4] sm:$0xf]  ;;  %v4442_v9 = vld [vmem:[#allocation5 + $0x348] sm:$0xf0] }
 0x293   : > { %2844 = vmatpush.bf16.msra.mxu1 %v4389_v42  ;;  %v4346_v42 = vld [vmem:[#allocation5 + $0x288] sm:$0xf0]  ;;  %v4445_v18 = vor.u32 %v5010_v40, %v4442_v9  ;;  %v4546_v40 = vld [vmem:[#allocation5 + $0x418] sm:$0xf0] }
 0x294   : > { %2821 = vmatpush.bf16.msra.mxu3 %v4237_v46  ;;  %v4301_v46 = vor.u32 %v4974_v33, %v4298_v35  ;;  %v4634_v25 = vld [vmem:[#allocation5 + $0x4c8] sm:$0xf0]  ;;  %v5006_v35 = vld [vmem:[#allocation5 + $0x324] sm:$0xf] }
 0x295   : > { %2830 = vmatpush.bf16.msra.mxu0 %v4333_v52  ;;  %v4517_v52 = vor.u32 %v5028_v38, %v4514_v39  ;;  %v4637_v33 = vor.u32 %v5058_v22, %v4634_v25  ;;  %v4626_v38 = vld [vmem:[#allocation5 + $0x4b8] sm:$0xf0] }
 0x296   : > { %2807 = vmatpush.bf16.msra.mxu2 %v4181_v23  ;;  %v4461_v23 = vor.u32 %v5014_v43, %v4458_v45  ;;  %v4474_v45 = vld [vmem:[#allocation5 + $0x388] sm:$0xf0] }
 0x297   : > { %2845 = vmatpush.bf16.msra.mxu1 %v4381_v15  ;;  %v4661_v15 = vor.u32 %v5064_v48, %v4658_v51  ;;  %v4570_v48 = vld [vmem:[#allocation5 + $0x448] sm:$0xf0] }
 0x298   : > { %2822 = vmatpush.bf16.msra.mxu3 %v4229_v61  ;;  %v4293_v61 = vor.u32 %v4972_v53, %v4290_v34  ;;  %v5054_v53 = vld [vmem:[#allocation5 + $0x4a4] sm:$0xf]  ;;  %v4618_v34 = vld [vmem:[#allocation5 + $0x4a8] sm:$0xf0] }
 0x299   : > { %2831 = vmatpush.bf16.msra.mxu0 %v4325_v0  ;;  %v4509_v0 = vor.u32 %v5026_v54, %v4506_v56  ;;  %v5040_v56 = vld [vmem:[#allocation5 + $0x434] sm:$0xf] }
 0x29a   : > { %2808 = vmatpush.bf16.msra.mxu2 %v4173_v5  ;;  %v4453_v5 = vor.u32 %v5012_v57, %v4450_v60  ;;  %v4621_v57 = vor.u32 %v5054_v53, %v4618_v34  ;;  %v5002_v60 = vld [vmem:[#allocation5 + $0x304] sm:$0xf] }
 0x29b   : > { %2846 = vmatpush.bf16.msra.mxu1 %v4373_v47  ;;  %v4653_v47 = vor.u32 %v5062_v62, %v4650_v63  ;;  %v5052_v62 = vld [vmem:[#allocation5 + $0x494] sm:$0xf]  ;;  %v4610_v63 = vld [vmem:[#allocation5 + $0x498] sm:$0xf0] }
 0x29c   : > { %2823 = vmatpush.bf16.msra.mxu3 %v4221_v12  ;;  %v5060_v12 = vld [vmem:[#allocation5 + $0x4d4] sm:$0xf] }
 0x29d   : > { %2832 = vmatpush.bf16.msra.mxu0 %v4317_v16  ;;  %v4597_v16 = vor.u32 %v5048_v7, %v4594_v8  ;;  %v4645_v20 = vor.u32 %v5060_v12, %v4642_v13  ;;  %v4602_v7 = vld [vmem:[#allocation5 + $0x488] sm:$0xf0]  ;;  %v5034_v12 = vld [vmem:[#allocation5 + $0x404] sm:$0xf] }
 0x29e   : > { %2809 = vmatpush.bf16.msra.mxu2 %v4165_v19  ;;  %v4490_v19 = vld [vmem:[#allocation5 + $0x3a8] sm:$0xf0]  ;;  %v4605_v9 = vor.u32 %v5050_v6, %v4602_v7  ;;  %v2987_v6 = vld [vmem:[#allocation10 + $0xc8] sm:$0xff] }
 0x29f   : > { %2824 = vmatmul.bf16.vlgmr.msra.gmra.mxu3 %v6367_v10  ;;  %2847 = vmatpush.bf16.msra.mxu1 %v4365_v21  ;;  %v4349_v10 = vor.u32 %v4986_v41, %v4346_v42  ;;  %v5008_v21 = vld [vmem:[#allocation5 + $0x334] sm:$0xf]  ;;  %v5018_v42 = vld [vmem:[#allocation5 + $0x384] sm:$0xf]  ;;  %v4538_v13 = vld [vmem:[#allocation5 + $0x408] sm:$0xf0] }
 0x2a0   : > { %2868 = vmatpush.bf16.msrb.mxu3 %v4533_v17  ;;  %v5022_v17 = vld [vmem:[#allocation5 + $0x3a4] sm:$0xf]  ;;  %v4437_v28 = vor.u32 %v5008_v21, %v4434_v59 }
 0x2a1   : > { %2833 = vmatpush.bf16.msra.mxu0 %v4309_v29  ;;  %v4493_v26 = vor.u32 %v5022_v17, %v4490_v19  ;;  %v4482_v29 = vld [vmem:[#allocation5 + $0x398] sm:$0xf0]  ;;  %v1841_v17 = vld [vmem:[#allocation7] sm:$0x3] }
 0x2a2   : > { %2810 = vmatpush.bf16.msra.mxu2 %v4157_v32  ;;  %v4578_v32 = vld [vmem:[#allocation5 + $0x458] sm:$0xf0]  ;;  %v1843_v19 = vperm.slane %v1841_v17, 0 }
 0x2a3   : > { %2848 = vmatpush.bf16.msra.mxu1 %v4357_v31  ;;  %v4426_v31 = vld [vmem:[#allocation5 + $0x328] sm:$0xf0] }
 0x2a4   : > { %2869 = vmatpush.bf16.msrb.mxu3 %v4525_v30  ;;  %v5044_v30 = vld [vmem:[#allocation5 + $0x454] sm:$0xf]  ;;  %v4429_v43 = vor.u32 %v5006_v35, %v4426_v31 }
 0x2a5   : > { %2811 = vmatmul.bf16.vlgmr.msra.gmra.mxu2 %v6380_v36  ;;  %2834 = vmatpush.bf16.msra.mxu0 %v4301_v46  ;;  %v4285_v36 = vor.u32 %v4970_v1, %v4282_v2  ;;  %v4581_v41 = vor.u32 %v5044_v30, %v4578_v32  ;;  %v5042_v46 = vld [vmem:[#allocation5 + $0x444] sm:$0xf] }
 0x2a6   : > { %2855 = vmatpush.bf16.msrb.mxu2 %v4469_v37  ;;  %v5056_v37 = vld [vmem:[#allocation5 + $0x4b4] sm:$0xf]  ;;  %v5038_v2 = vld [vmem:[#allocation5 + $0x424] sm:$0xf] }
 0x2a7   : > { %2849 = vmatpush.bf16.msra.mxu1 %v4349_v10  ;;  %v4629_v51 = vor.u32 %v5056_v37, %v4626_v38  ;;  %v4477_v10 = vor.u32 %v5018_v42, %v4474_v45  ;;  %v4557_v8 = vor.u32 %v5038_v2, %v4554_v4  ;;  %v2992_v4 = vld [vmem:[#allocation10 + $0xf0] sm:$0xff] }
 0x2a8   : > { %2870 = vmatpush.bf16.msrb.mxu3 %v4517_v52  ;;  %v5004_v52 = vld [vmem:[#allocation5 + $0x314] sm:$0xf] }
 0x2a9   : > { %2835 = vmatpush.bf16.msra.mxu0 %v4293_v61  ;;  %v4410_v61 = vld [vmem:[#allocation5 + $0x308] sm:$0xf0] }
 0x2aa   : > { %2856 = vmatpush.bf16.msrb.mxu2 %v4461_v23  ;;  %2850 = vmatmul.bf16.vlgmr.msra.gmra.mxu1 %v6377_v24  ;;  %v5020_v24 = vld [vmem:[#allocation5 + $0x394] sm:$0xf]  ;;  %v4573_v23 = vor.u32 %v5042_v46, %v4570_v48  ;;  %v4413_v1 = vor.u32 %v5002_v60, %v4410_v61  ;;  %v6425_v60 = vld [vmem:[#allocation8] sm:$0xff] }
 0x2ab   : > { %2894 = vmatpush.bf16.msrb.mxu1 %v4661_v15  ;;  %v4485_v39 = vor.u32 %v5020_v24, %v4482_v29  ;;  %v4562_v15 = vld [vmem:[#allocation5 + $0x438] sm:$0xf0] }
 0x2ac   : > { %2871 = vmatpush.bf16.msrb.mxu3 %v4509_v0  ;;  %v4565_v0 = vor.u32 %v5040_v56, %v4562_v15  ;;  %v1844_v56 = vperm.slane %v1841_v17, 1  ;;  %v2984_v17 = vld [vmem:[#allocation10 + $0xb0] sm:$0xff] }
 0x2ad   : > { %2836 = vmatpush.bf16.msra.mxu0 %v4285_v36 }
 0x2ae   : > { %2857 = vmatpush.bf16.msrb.mxu2 %v4453_v5  ;;  %v4613_v5 = vor.u32 %v5052_v62, %v4610_v63  ;;  %v2993_v62 = vld [vmem:[#allocation10 + $0xf8] sm:$0xff]  ;;  %v2991_v63 = vld [vmem:[#allocation10 + $0xe8] sm:$0xff] }
 0x2af   : > { %2895 = vmatpush.bf16.msrb.mxu1 %v4653_v47  ;;  %v5036_v47 = vld [vmem:[#allocation5 + $0x414] sm:$0xf] }
 0x2b0   : > { %2872 = vmatpush.bf16.msrb.mxu3 %v4501_v14  ;;  %2837 = vmatmul.bf16.vlgmr.msra.gmra.mxu0 %v6387_v58  ;;  %v4418_v58 = vld [vmem:[#allocation5 + $0x318] sm:$0xf0]  ;;  %v4549_v36 = vor.u32 %v5036_v47, %v4546_v40  ;;  %v4541_v14 = vor.u32 %v5034_v12, %v4538_v13  ;;  %v3022_v47 = vld [vmem:[#allocation10 + $0x1e0] sm:$0xff]  ;;  %v2985_v40 = vld [vmem:[#allocation10 + $0xb8] sm:$0xff] }
 0x2b1   : > { %2881 = vmatpush.bf16.msrb.mxu0 %v4597_v16  ;;  %v4421_v54 = vor.u32 %v5004_v52, %v4418_v58  ;;  %v2983_v12 = vld [vmem:[#allocation10 + $0xa8] sm:$0xff] }
 0x2b2   : > { %2858 = vmatpush.bf16.msrb.mxu2 %v4445_v18 }
 0x2b3   : > { %2896 = vmatpush.bf16.msrb.mxu1 %v4645_v20 }
 0x2b4   : > { %2873 = vmatpush.bf16.msrb.mxu3 %v4493_v26 }
 0x2b5   : > { %2882 = vmatpush.bf16.msrb.mxu0 %v4589_v27 }
 0x2b6   : > { %2859 = vmatpush.bf16.msrb.mxu2 %v4437_v28 }
 0x2b7   : > { %2897 = vmatpush.bf16.msrb.mxu1 %v4637_v33 }
 0x2b8   : > { %2874 = vmatpush.bf16.msrb.mxu3 %v4485_v39 }
 0x2b9   : > { %2883 = vmatpush.bf16.msrb.mxu0 %v4581_v41 }
 0x2ba   : > { %2860 = vmatpush.bf16.msrb.mxu2 %v4429_v43 }
 0x2bb   : > { %2898 = vmatpush.bf16.msrb.mxu1 %v4629_v51 }
 0x2bc   : > { %2875 = vmatpush.bf16.msrb.mxu3 %v4477_v10 }
 0x2bd   : > { %2884 = vmatpush.bf16.msrb.mxu0 %v4573_v23 }
 0x2be   : > { %2861 = vmatpush.bf16.msrb.mxu2 %v4421_v54 }
 0x2bf   : > { %2899 = vmatpush.bf16.msrb.mxu1 %v4621_v57  ;;  %2876 = vmatmul.bf16.vlgmr.msrb.gmra.mxu3 %v6394_v49 }
 0x2c1   : > { %2885 = vmatpush.bf16.msrb.mxu0 %v4565_v0 }
 0x2c2   : > { %2862 = vmatpush.bf16.msrb.mxu2 %v4413_v1  ;;  %v2989_v1 = vld [vmem:[#allocation10 + $0xd8] sm:$0xff] }
 0x2c3   : > { %2900 = vmatpush.bf16.msrb.mxu1 %v4613_v5  ;;  %v3024_v5 = vld [vmem:[#allocation10 + $0x1f0] sm:$0xff] }
 0x2c5   : > { %2863 = vmatmul.bf16.vlgmr.msrb.gmra.mxu2 %v6404_v50  ;;  %2886 = vmatpush.bf16.msrb.mxu0 %v4557_v8  ;;  %v2990_v8 = vld [vmem:[#allocation10 + $0xe0] sm:$0xff] }
 0x2c7   : > { %2901 = vmatpush.bf16.msrb.mxu1 %v4605_v9  ;;  %v2988_v9 = vld [vmem:[#allocation10 + $0xd0] sm:$0xff] }
 0x2c9   : > { %2887 = vmatpush.bf16.msrb.mxu0 %v4549_v36  ;;  %v3020_v36 = vld [vmem:[#allocation10 + $0x1d0] sm:$0xff] }
 0x2ca   : > { %2902 = vmatmul.bf16.vlgmr.msrb.gmra.mxu1 %v6402_v44 }
 0x2cb   : > { %3046 = vmatpush.msra.mxu1 %v3024_v5  ;;  %v2967_v5 = vld [vmem:[#allocation10 + $0x28] sm:$0xff] }
 0x2cd   : > { %2888 = vmatpush.bf16.msrb.mxu0 %v4541_v14  ;;  %3047 = vmatpush.msra.mxu1 %v3022_v47  ;;  %v2986_v14 = vld [vmem:[#allocation10 + $0xc0] sm:$0xff] }
 0x2cf   : > { %3048 = vmatpush.msra.mxu1 %v3020_v36  ;;  %v2998_v36 = vld [vmem:[#allocation10 + $0x120] sm:$0xff] }
 0x2d0   : > { %2889 = vmatmul.bf16.vlgmr.msrb.gmra.mxu0 %v6410_v11 }
 0x2d1   : > { %3026 = vmatpush.msra.mxu0 %v2992_v4  ;;  %v2968_v4 = vld [vmem:[#allocation10 + $0x30] sm:$0xff] }
 0x2d3   : > { %3027 = vmatpush.msra.mxu0 %v2990_v8 }
 0x2d5   : > { %3028 = vmatpush.msra.mxu0 %v2988_v9  ;;  %v2965_v9 = vld [vmem:[#allocation10 + $0x18] sm:$0xff] }
 0x2d7   : > { %3029 = vmatpush.msra.mxu0 %v2986_v14  ;;  %v2997_v14 = vld [vmem:[#allocation10 + $0x118] sm:$0xff] }
 0x2d9   : > { %3030 = vmatpush.msra.mxu0 %v2984_v17  ;;  %v2995_v17 = vld [vmem:[#allocation10 + $0x108] sm:$0xff] }
 0x2e2   : > { %v2669_v49 = vpop.f32.mrf.mxu3 }
 0x2e7   : > { %v2695_v16 = vpop.f32.mrf.mxu1 }
 0x2e8   : > { %v2656_v18 = vpop.f32.mrf.mxu2 }
 0x2e9   : > { %v2657_v50 = vadd.f32 %v2656_v18, %v1843_v19  ;;  %v3016_v18 = vld [vmem:[#allocation10 + $0x1b0] sm:$0xff]  ;;  %v2979_v19 = vld [vmem:[#allocation10 + $0x88] sm:$0xff] }
 0x2ea   : > { %v2671_v55 = vpop.f32.mrf.mxu3 }
 0x2eb   : > { %v2670_v59 = vadd.f32 %v2669_v49, %v2657_v50  ;;  %v3018_v49 = vld [vmem:[#allocation10 + $0x1c0] sm:$0xff] }
 0x2ec   : > { %3049 = vmatpush.msra.mxu1 %v3018_v49  ;;  %v2982_v50 = vld [vmem:[#allocation10 + $0xa0] sm:$0xff]  ;;  %v2963_v49 = vld [vmem:[#allocation10 + $0x8] sm:$0xff] }
 0x2ed   : > { %v2682_v3 = vpop.f32.mrf.mxu0  ;;  %3031 = vmatpush.msra.mxu0 %v2982_v50  ;;  %v5089_v50 = vld [vmem:[#allocation11 + $0xb8] sm:$0xff] }
 0x2ee   : > { %v2683_v26 = vadd.f32 %v2682_v3, %v2670_v59  ;;  %3050 = vmatpush.msra.mxu1 %v3016_v18  ;;  %v2980_v59 = vld [vmem:[#allocation10 + $0x90] sm:$0xff]  ;;  %v2962_v18 = vld [vmem:[#allocation10] sm:$0xff] }
 0x2ef   : > { %v2697_v20 = vpop.f32.mrf.mxu1  ;;  %3032 = vmatpush.msra.mxu0 %v2980_v59  ;;  %v5080_v59 = vld [vmem:[#allocation11 + $0x70] sm:$0xff] }
 0x2f0   : > { %v2658_v21 = vpop.f32.mrf.mxu2  ;;  %v2696_v44 = vadd.f32 %v2695_v16, %v2683_v26  ;;  %v2981_v16 = vld [vmem:[#allocation10 + $0x98] sm:$0xff]  ;;  %v3014_v20 = vld [vmem:[#allocation10 + $0x1a0] sm:$0xff] }
 0x2f1   : > { %v2977_v21 = vld [vmem:[#allocation10 + $0x78] sm:$0xff]  ;;  %3051 = vmatpush.msra.mxu1 %v3014_v20 }
 0x2f2   : > { %v2721_v22 = vpop.f32.mrf.mxu3  ;;  %v5097_v20 = vld [vmem:[#allocation11 + $0xf8] sm:$0xff] }
 0x2f5   : > { %v2684_v25 = vpop.f32.mrf.mxu0 }
 0x2f6   : > { %v2975_v25 = vld [vmem:[#allocation10 + $0x68] sm:$0xff] }
 0x2f7   : > { %v2747_v27 = vpop.f32.mrf.mxu1 }
 0x2f8   : > { %v2708_v24 = vpop.f32.mrf.mxu2 }
 0x2f9   : > { %v2709_v29 = vadd.f32 %v2708_v24, %v2696_v44  ;;  %v2978_v44 = vld [vmem:[#allocation10 + $0x80] sm:$0xff] }
 0x2fa   : > { %v2723_v28 = vpop.f32.mrf.mxu3  ;;  %3033 = vmatpush.msra.mxu0 %v2978_v44  ;;  %v5095_v44 = vld [vmem:[#allocation11 + $0xe8] sm:$0xff] }
 0x2fb   : > { %v2722_v32 = vadd.f32 %v2721_v22, %v2709_v29  ;;  %v3012_v22 = vld [vmem:[#allocation10 + $0x190] sm:$0xff]  ;;  %v3010_v28 = vld [vmem:[#allocation10 + $0x180] sm:$0xff]  ;;  %v2973_v29 = vld [vmem:[#allocation10 + $0x58] sm:$0xff] }
 0x2fc   : > { %3052 = vmatpush.msra.mxu1 %v3012_v22  ;;  %v5088_v22 = vld [vmem:[#allocation11 + $0xb0] sm:$0xff] }
 0x2fd   : > { %v2734_v11 = vpop.f32.mrf.mxu0 }
 0x2fe   : > { %v2735_v31 = vadd.f32 %v2734_v11, %v2722_v32  ;;  %3053 = vmatpush.msra.mxu1 %v3010_v28  ;;  %v3008_v32 = vld [vmem:[#allocation10 + $0x170] sm:$0xff]  ;;  %v5070_v28 = vld [vmem:[#allocation11 + $0x20] sm:$0xff] }
 0x2ff   : > { %v2749_v30 = vpop.f32.mrf.mxu1 }
 0x300   : > { %v2710_v33 = vpop.f32.mrf.mxu2  ;;  %v2748_v39 = vadd.f32 %v2747_v27, %v2735_v31  ;;  %v2976_v30 = vld [vmem:[#allocation10 + $0x70] sm:$0xff]  ;;  %3054 = vmatpush.msra.mxu1 %v3008_v32  ;;  %v5069_v32 = vld [vmem:[#allocation11 + $0x18] sm:$0xff] }
 0x301   : > { %v2971_v33 = vld [vmem:[#allocation10 + $0x48] sm:$0xff]  ;;  %3034 = vmatpush.msra.mxu0 %v2976_v30  ;;  %v5094_v30 = vld [vmem:[#allocation11 + $0xe0] sm:$0xff] }
 0x302   : > { %v2773_v35 = vpop.f32.mrf.mxu3 }
 0x305   : > { %v2736_v37 = vpop.f32.mrf.mxu0 }
 0x306   : > { %v2974_v37 = vld [vmem:[#allocation10 + $0x60] sm:$0xff] }
 0x307   : > { %v2799_v38 = vpop.f32.mrf.mxu1  ;;  %3035 = vmatpush.msra.mxu0 %v2974_v37  ;;  %v5068_v37 = vld [vmem:[#allocation11 + $0x10] sm:$0xff] }
 0x308   : > { %v2760_v41 = vpop.f32.mrf.mxu2 }
 0x309   : > { %v2761_v42 = vadd.f32 %v2760_v41, %v2748_v39  ;;  %v2969_v39 = vld [vmem:[#allocation10 + $0x38] sm:$0xff] }
 0x30a   : > { %v2775_v43 = vpop.f32.mrf.mxu3 }
 0x30b   : > { %v2774_v45 = vadd.f32 %v2773_v35, %v2761_v42 }
 0x30d   : > { %v2786_v46 = vpop.f32.mrf.mxu0  ;;  %v2907_v48 = vmax.f32 %v2774_v45, 0.0 }
 0x30e   : > { %v2787_v61 = vadd.f32 %v2786_v46, %v1844_v56  ;;  %v3011_v56 = vld [vmem:[#allocation10 + $0x188] sm:$0xff] }
 0x30f   : > { %v2801_v51 = vpop.f32.mrf.mxu1  ;;  %2929 = vmatpush.msra.mxu2 %v2907_v48 }
 0x310   : > { %v2762_v52 = vpop.f32.mrf.mxu2  ;;  %4662 = vmatmul.msk.f32.vlgmr.msra.gmra.mxu2 %vm2910_vm5, %v6425_v60  ;;  %v2800_v2 = vadd.f32 %v2799_v38, %v2787_v61  ;;  %v3006_v38 = vld [vmem:[#allocation10 + $0x160] sm:$0xff]  ;;  %v3025_v51 = vld [vmem:[#allocation10 + $0x1f8] sm:$0xff] }
 0x311   : > { %3066 = vmatpush.msrb.mxu2 %v2993_v62  ;;  %3055 = vmatpush.msra.mxu1 %v3006_v38  ;;  %v3005_v61 = vld [vmem:[#allocation10 + $0x158] sm:$0xff]  ;;  %v5076_v38 = vld [vmem:[#allocation11 + $0x50] sm:$0xff] }
 0x312   : > { %v3001_v62 = vld [vmem:[#allocation10 + $0x138] sm:$0xff] }
 0x313   : > { %3067 = vmatpush.msrb.mxu2 %v2991_v63  ;;  %v2972_v63 = vld [vmem:[#allocation10 + $0x50] sm:$0xff] }
 0x314   : > { %3036 = vmatpush.msra.mxu0 %v2972_v63 }
 0x315   : > { %v2788_v58 = vpop.f32.mrf.mxu0  ;;  %3068 = vmatpush.msrb.mxu2 %v2989_v1  ;;  %v2970_v1 = vld [vmem:[#allocation10 + $0x40] sm:$0xff] }
 0x316   : > { %v3023_v58 = vld [vmem:[#allocation10 + $0x1e8] sm:$0xff]  ;;  %3037 = vmatpush.msra.mxu0 %v2970_v1 }
 0x317   : > { %3069 = vmatpush.msrb.mxu2 %v2987_v6  ;;  %v3000_v6 = vld [vmem:[#allocation10 + $0x130] sm:$0xff] }
 0x318   : > { %3038 = vmatpush.msra.mxu0 %v2968_v4 }
 0x319   : > { %3070 = vmatpush.msrb.mxu2 %v2985_v40  ;;  %v2999_v40 = vld [vmem:[#allocation10 + $0x128] sm:$0xff] }
 0x31b   : > { %3071 = vmatpush.msrb.mxu2 %v2983_v12  ;;  %v2964_v12 = vld [vmem:[#allocation10 + $0x10] sm:$0xff] }
 0x31d   : > { %3072 = vmatpush.msrb.mxu2 %v2981_v16  ;;  %v2996_v16 = vld [vmem:[#allocation10 + $0x110] sm:$0xff] }
 0x31f   : > { %3073 = vmatpush.msrb.mxu2 %v2979_v19  ;;  %v2994_v19 = vld [vmem:[#allocation10 + $0x100] sm:$0xff] }
 0x321   : > { %3074 = vmatpush.msrb.mxu2 %v2977_v21  ;;  %v5072_v21 = vld [vmem:[#allocation11 + $0x30] sm:$0xff] }
 0x322   : > { %v2825_v53 = vpop.f32.mrf.mxu3 }
 0x323   : > { %3075 = vmatpush.msrb.mxu2 %v2975_v25  ;;  %v5096_v25 = vld [vmem:[#allocation11 + $0xf0] sm:$0xff] }
 0x325   : > { %3076 = vmatpush.msrb.mxu2 %v2973_v29  ;;  %v5078_v29 = vld [vmem:[#allocation11 + $0x60] sm:$0xff] }
 0x327   : > { %v6423_v34 = vpop.f32.mrf.mxu1  ;;  %3077 = vmatpush.msrb.mxu2 %v2971_v33  ;;  %v5077_v33 = vld [vmem:[#allocation11 + $0x58] sm:$0xff] }
 0x328   : > { %v2812_v10 = vpop.f32.mrf.mxu2 }
 0x329   : > { %v2813_v7 = vadd.f32 %v2812_v10, %v2800_v2  ;;  %3078 = vmatpush.msrb.mxu2 %v2969_v39  ;;  %v3017_v10 = vld [vmem:[#allocation10 + $0x1b8] sm:$0xff]  ;;  %v3002_v2 = vld [vmem:[#allocation10 + $0x140] sm:$0xff]  ;;  %v5084_v39 = vld [vmem:[#allocation11 + $0x90] sm:$0xff] }
 0x32a   : > { %v2827_v23 = vpop.f32.mrf.mxu3 }
 0x32b   : > { %v2826_v13 = vadd.f32 %v2825_v53, %v2813_v7  ;;  %v3021_v53 = vld [vmem:[#allocation10 + $0x1d8] sm:$0xff]  ;;  %v3015_v23 = vld [vmem:[#allocation10 + $0x1a8] sm:$0xff]  ;;  %v2966_v7 = vld [vmem:[#allocation10 + $0x20] sm:$0xff]  ;;  %3079 = vmatpush.msrb.mxu2 %v2967_v5 }
 0x32c   : > { %3039 = vmatpush.msra.mxu0 %v2966_v7  ;;  %v5101_v7 = vld [vmem:[%s6499_s11 + $0x18] sm:$0xff] }
 0x32d   : > { %v2838_v54 = vpop.f32.mrf.mxu0  ;;  %3080 = vmatpush.msrb.mxu2 %v2965_v9  ;;  %v3107_v9 = vld [vmem:[#allocation13] sm:$0x1] }
 0x32e   : > { %v2839_v55 = vadd.f32 %v2838_v54, %v2826_v13  ;;  %v3013_v54 = vld [vmem:[#allocation10 + $0x198] sm:$0xff]  ;;  %3040 = vmatpush.msra.mxu0 %v2964_v12 }
 0x32f   : > { %v2853_v15 = vpop.f32.mrf.mxu1  ;;  %3081 = vmatpush.msrb.mxu2 %v2963_v49 }
 0x330   : > { %v2814_v57 = vpop.f32.mrf.mxu2  ;;  %v2852_v27 = vadd.f32 %v6423_v34, %v2839_v55  ;;  %v3019_v34 = vld [vmem:[#allocation10 + $0x1c8] sm:$0xff]  ;;  %v3009_v15 = vld [vmem:[#allocation10 + $0x178] sm:$0xff]  ;;  %3041 = vmatpush.msra.mxu0 %v2962_v18 }
 0x331   : > { %v3007_v57 = vld [vmem:[#allocation10 + $0x168] sm:$0xff]  ;;  %v5073_v55 = vld [vmem:[#allocation11 + $0x38] sm:$0xff]  ;;  %3336 = vmatpush.bf16.msra.mxu2 %v5089_v50 }
 0x332   : > { %3173 = vmatpush.bf16.msrb.mxu0 %v5073_v55 }
 0x335   : > { %v2840_v0 = vpop.f32.mrf.mxu0  ;;  %3337 = vmatpush.bf16.msra.mxu2 %v5088_v22 }
 0x336   : > { %v3004_v0 = vld [vmem:[#allocation10 + $0x150] sm:$0xff]  ;;  %3174 = vmatpush.bf16.msrb.mxu0 %v5072_v21 }
 0x337   : > { %3056 = vmatpush.msra.mxu1 %v3004_v0 }
 0x339   : > { %3057 = vmatpush.msra.mxu1 %v3002_v2 }
 0x33b   : > { %3058 = vmatpush.msra.mxu1 %v3000_v6 }
 0x33d   : > { %3059 = vmatpush.msra.mxu1 %v2998_v36 }
 0x33f   : > { %3060 = vmatpush.msra.mxu1 %v2996_v16 }
 0x341   : > { %3061 = vmatpush.msra.mxu1 %v2994_v19 }
 0x342   : > { %v2877_v3 = vpop.f32.mrf.mxu3 }
 0x347   : > { %v2903_v26 = vpop.f32.mrf.mxu1 }
 0x348   : > { %v2864_v24 = vpop.f32.mrf.mxu2 }
 0x349   : > { %v2865_v11 = vadd.f32 %v2864_v24, %v2852_v27  ;;  %v5079_v27 = vld [vmem:[#allocation11 + $0x68] sm:$0xff] }
 0x34a   : > { %v2879_v35 = vpop.f32.mrf.mxu3  ;;  %v5087_v24 = vld [vmem:[#allocation11 + $0xa8] sm:$0xff] }
 0x34b   : > { %v2878_v31 = vadd.f32 %v2877_v3, %v2865_v11  ;;  %v5081_v3 = vld [vmem:[#allocation11 + $0x78] sm:$0xff]  ;;  %3338 = vmatpush.bf16.msra.mxu2 %v5087_v24  ;;  %v5086_v11 = vld [vmem:[#allocation11 + $0xa0] sm:$0xff] }
 0x34c   : > { %3255 = vmatpush.bf16.msrb.mxu1 %v5081_v3  ;;  %v5085_v35 = vld [vmem:[#allocation11 + $0x98] sm:$0xff] }
 0x34d   : > { %v2890_v41 = vpop.f32.mrf.mxu0 }
 0x34e   : > { %v2891_v42 = vadd.f32 %v2890_v41, %v2878_v31  ;;  %v5093_v31 = vld [vmem:[#allocation11 + $0xd8] sm:$0xff] }
 0x34f   : > { %v2905_v43 = vpop.f32.mrf.mxu1  ;;  %3339 = vmatpush.bf16.msra.mxu2 %v5086_v11 }
 0x350   : > { %v2904_v45 = vadd.f32 %v2903_v26, %v2891_v42  ;;  %v2866_v46 = vpop.f32.mrf.mxu2  ;;  %3256 = vmatpush.bf16.msrb.mxu1 %v5080_v59  ;;  %v5071_v26 = vld [vmem:[#allocation11 + $0x28] sm:$0xff]  ;;  %v3510_v59 = vlaneseq }
 0x351   : > { %3175 = vmatpush.bf16.msrb.mxu0 %v5071_v26  ;;  %v5092_v46 = vld [vmem:[#allocation11 + $0xd0] sm:$0xff] }
 0x352   : > { %v2908_v48 = vmax.f32 %v2904_v45, 0.0  ;;  %v5067_v45 = vld [vmem:[#allocation11 + $0x8] sm:$0xff]  ;;  %v3511_v22 = vand.u32 127, %v3510_v59 }
 0x353   : > { %3340 = vmatpush.bf16.msra.mxu2 %v5085_v35 }
 0x354   : > { %2949 = vmatpush.msra.mxu3 %v2908_v48  ;;  %3257 = vmatpush.bf16.msrb.mxu1 %v5079_v27  ;;  %v5075_v48 = vld [vmem:[#allocation11 + $0x48] sm:$0xff]  ;;  %vm3512_vm6 = vcmp.lt.s32.totalorder %v3511_v22, 10 }
 0x355   : > { %v2892_v52 = vpop.f32.mrf.mxu0  ;;  %4663 = vmatmul.msk.f32.vlgmr.msra.gmra.mxu3 %vm2910_vm5, %v6425_v60  ;;  %v3003_v60 = vld [vmem:[#allocation10 + $0x148] sm:$0xff]  ;;  %3176 = vmatpush.bf16.msrb.mxu0 %v5070_v28 }
 0x356   : > { %3086 = vmatpush.msrb.mxu3 %v3025_v51  ;;  %v5083_v51 = vld [vmem:[#allocation11 + $0x88] sm:$0xff]  ;;  %v5066_v52 = vld [vmem:[#allocation11] sm:$0xff] }
 0x357   : > { %3341 = vmatpush.bf16.msra.mxu2 %v5084_v39 }
 0x358   : > { %3087 = vmatpush.msrb.mxu3 %v3023_v58  ;;  %3258 = vmatpush.bf16.msrb.mxu1 %v5078_v29  ;;  %v5091_v58 = vld [vmem:[#allocation11 + $0xc8] sm:$0xff] }
 0x359   : > { %3177 = vmatpush.bf16.msrb.mxu0 %v5069_v32 }
 0x35a   : > { %3088 = vmatpush.msrb.mxu3 %v3021_v53  ;;  %v5074_v53 = vld [vmem:[#allocation11 + $0x40] sm:$0xff] }
 0x35b   : > { %3342 = vmatpush.bf16.msra.mxu2 %v5083_v51 }
 0x35c   : > { %3089 = vmatpush.msrb.mxu3 %v3019_v34  ;;  %3259 = vmatpush.bf16.msrb.mxu1 %v5077_v33  ;;  %v5082_v34 = vld [vmem:[#allocation11 + $0x80] sm:$0xff] }
 0x35d   : > { %3178 = vmatpush.bf16.msrb.mxu0 %v5068_v37 }
 0x35e   : > { %3090 = vmatpush.msrb.mxu3 %v3017_v10  ;;  %v5090_v10 = vld [vmem:[#allocation11 + $0xc0] sm:$0xff] }
 0x35f   : > { %3343 = vmatpush.bf16.msra.mxu2 %v5082_v34 }
 0x360   : > { %3091 = vmatpush.msrb.mxu3 %v3015_v23  ;;  %3260 = vmatpush.bf16.msrb.mxu1 %v5076_v38  ;;  %v5105_v23 = vld [vmem:[%s6499_s11 + $0x38] sm:$0xff] }
 0x361   : > { %3179 = vmatpush.bf16.msrb.mxu0 %v5067_v45 }
 0x362   : > { %3092 = vmatpush.msrb.mxu3 %v3013_v54  ;;  %v5104_v54 = vld [vmem:[%s6499_s11 + $0x30] sm:$0xff] }
 0x364   : > { %3093 = vmatpush.msrb.mxu3 %v3011_v56  ;;  %3261 = vmatpush.bf16.msrb.mxu1 %v5075_v48  ;;  %v5103_v56 = vld [vmem:[%s6499_s11 + $0x28] sm:$0xff] }
 0x365   : > { %3180 = vmatpush.bf16.msrb.mxu0 %v5066_v52 }
 0x366   : > { %3094 = vmatpush.msrb.mxu3 %v3009_v15  ;;  %v5102_v15 = vld [vmem:[%s6499_s11 + $0x20] sm:$0xff] }
 0x368   : > { %3095 = vmatpush.msrb.mxu3 %v3007_v57  ;;  %3262 = vmatpush.bf16.msrb.mxu1 %v5074_v53 }
 0x36a   : > { %3096 = vmatpush.msrb.mxu3 %v3005_v61 }
 0x36c   : > { %3097 = vmatpush.msrb.mxu3 %v3003_v60 }
 0x36e   : > { %3098 = vmatpush.msrb.mxu3 %v3001_v62 }
 0x370   : > { %3099 = vmatpush.msrb.mxu3 %v2999_v40  ;;  %v5098_v40 = vld [vmem:[%s6499_s11] sm:$0xff] }
 0x372   : > { %3100 = vmatpush.msrb.mxu3 %v2997_v14 }
 0x374   : > { %3101 = vmatpush.msrb.mxu3 %v2995_v17 }
 0x376   : > { %3416 = vmatpush.bf16.msra.mxu3 %v5097_v20 }
 0x37a   : > { %3417 = vmatpush.bf16.msra.mxu3 %v5096_v25  ;;  %v3448_v25 = vld [vmem:[#allocation14] sm:$0x1] }
 0x37e   : > { %3418 = vmatpush.bf16.msra.mxu3 %v5095_v44 }
 0x382   : > { %3419 = vmatpush.bf16.msra.mxu3 %v5094_v30 }
 0x386   : > { %3420 = vmatpush.bf16.msra.mxu3 %v5093_v31 }
 0x38a   : > { %3421 = vmatpush.bf16.msra.mxu3 %v5092_v46 }
 0x38e   : > { %3422 = vmatpush.bf16.msra.mxu3 %v5091_v58 }
 0x392   : > { %3423 = vmatpush.bf16.msra.mxu3 %v5090_v10 }
 0x393   : > { %v2931_v8 = vpop.f32.mrf.mxu2 }
 0x394   : > { %v2956_v47 = vrot.slane %v2931_v8, 4 }
 0x396   : > { %v2960_v13 = vmax.f32 %v2931_v8, %v2956_v47  ;;  %v5100_v8 = vld [vmem:[%s6499_s11 + $0x10] sm:$0xff]  ;;  %v5099_v47 = vld [vmem:[%s6499_s11 + $0x8] sm:$0xff] }
 0x398   : > { %3082 = vmatmul.f32.vlgmr.msrb.gmra.mxu2 %v2960_v13  ;;  %3042 = vmatmul.f32.vlgmr.msra.gmra.mxu0 %v2960_v13 }
 0x399   : > { %3497 = vmatpush.bf16.msra.mxu0 %v5105_v23 }
 0x39d   : > { %3498 = vmatpush.bf16.msra.mxu0 %v5104_v54 }
 0x3a1   : > { %3499 = vmatpush.bf16.msra.mxu0 %v5103_v56 }
 0x3a5   : > { %3500 = vmatpush.bf16.msra.mxu0 %v5102_v15 }
 0x3a9   : > { %3501 = vmatpush.bf16.msra.mxu0 %v5101_v7 }
 0x3ad   : > { %3502 = vmatpush.bf16.msra.mxu0 %v5100_v8 }
 0x3b1   : > { %3503 = vmatpush.bf16.msra.mxu0 %v5099_v47 }
 0x3b5   : > { %3504 = vmatpush.bf16.msra.mxu0 %v5098_v40 }
 0x3d8   : > { %v2951_v41 = vpop.f32.mrf.mxu3 }
 0x3d9   : > { %v2957_v42 = vrot.slane %v2951_v41, 4 }
 0x3db   : > { %v2961_v43 = vmax.f32 %v2951_v41, %v2957_v42 }
 0x3dd   : > { %3102 = vmatmul.f32.vlgmr.msrb.gmra.mxu3 %v2961_v43  ;;  %3062 = vmatmul.f32.vlgmr.msra.gmra.mxu1 %v2961_v43 }
 0x415   : > { %v3043_v61 = vpop.f32.mrf.mxu0 }
 0x41b   : > { %v3083_v60 = vpop.f32.mrf.mxu2 }
 0x45a   : > { %v3063_v57 = vpop.f32.mrf.mxu1 }
 0x45b   : > { %v3064_v63 = vadd.f32 %v3063_v57, %v3043_v61 }
 0x460   : > { %v3103_v62 = vpop.f32.mrf.mxu3 }
 0x461   : > { %v3104_v0 = vadd.f32 %v3103_v62, %v3083_v60 }
 0x463   : > { %v3106_v1 = vmax.f32 %v3064_v63, %v3104_v0 }
 0x465   : > { %v3108_v2 = vpack.c.bf16 %v3106_v1, %v3106_v1 }
 0x467   : > { %v3286_v4 = vrot.slane %v3108_v2, 1  ;;  %3181 = vmatmul.bf16.vlgmr.msrb.gmra.mxu0 %v3108_v2  ;;  %v3204_v5 = vshrl.u32 %v3108_v2, 16 }
 0x469   : > { %3263 = vmatmul.bf16.vlgmr.msrb.gmra.mxu1 %v3204_v5  ;;  %v3366_v6 = vrot.slane %v3204_v5, 1  ;;  %3344 = vmatmul.bf16.vlgmr.msra.gmra.mxu2 %v3286_v4 }
 0x46b   : > { %3424 = vmatmul.bf16.vlgmr.msra.gmra.mxu3 %v3366_v6 }
 0x4e4   : > { %v3182_v36 = vpop.f32.mrf.mxu0 }
 0x4e5   : > { %v3186_v13 = vadd.f32 %v3182_v36, %v3107_v9 }
 0x4e6   : > { %v3264_v12 = vpop.f32.mrf.mxu1 }
 0x4e7   : > { %v3268_v14 = vadd.f32 %v3264_v12, %v3186_v13 }
 0x4ec   : > { %v3184_v49 = vpop.f32.mrf.mxu0  ;;  %v3345_v16 = vpop.f32.mrf.mxu2 }
 0x4ed   : > { %v3349_v17 = vadd.f32 %v3345_v16, %v3268_v14 }
 0x4ee   : > { %v3266_v18 = vpop.f32.mrf.mxu1  ;;  %v3425_v19 = vpop.f32.mrf.mxu3 }
 0x4ef   : > { %v3429_v55 = vadd.f32 %v3425_v19, %v3349_v17 }
 0x4f1   : > { %v3430_v3 = vmax.f32 %v3429_v55, 0.0 }
 0x4f3   : > { %v3431_v50 = vpack.c.bf16 %v3430_v3, %v3430_v3 }
 0x4f4   : > { %v3347_v20 = vpop.f32.mrf.mxu2 }
 0x4f5   : > { %3505 = vmatmul.bf16.vlgmr.msra.gmra.mxu0 %v3431_v50 }
 0x4f6   : > { %v3427_v21 = vpop.f32.mrf.mxu3 }
 0x572   : > { %v3506_v26 = vpop.f32.mrf.mxu0 }
 0x573   : > { %v3507_v27 = vadd.f32 %v3506_v26, %v3448_v25 }
 0x575   : > { %v3513_v24 = vsel %vm3512_vm6, %v3507_v27, -1e+30 }
 0x576   : > { %v3515_v44 = vsel %vm3514_vm7, %v3513_v24, -inf }
 0x577   : > { %3516 = vmax.xlane.f32.xlu0 %v3515_v44 }
 0x57a   : > { %v3508_v28 = vpop.f32.mrf.mxu0 }
 0x5ea   : > { %v3517_v29 = vpop.xlane.xlu0 %3516 }
 0x5eb   : > { %v3518_v11 = vsub.f32 %v3513_v24, %v3517_v29 }
 0x5ed   : > { %v3519_v30 = vmul.f32 1.442695, %v3518_v11 }
 0x5ef   : > { %5235 = vpow2.f32 %v3519_v30 }
 0x5f5   : > { %v5236_v32 = vpop.eup %5235 }
 0x5f6   : > { %v3521_v33 = vsel %vm3514_vm7, %v5236_v32, 0.0 }
 0x5f7   : > { %3522 = vadd.xlane.f32.xlu0 %v3521_v33 }
 0x66a   : > { %v3523_v35 = vpop.xlane.xlu0 %3522 }
 0x66b   : > { %5237 = vlog2.f32 %v3523_v35 }
 0x671   : > { %v5238_v31 = vpop.eup %5237 }
 0x672   : > { %v3525_v37 = vmul.f32 0.6931472, %v5238_v31 }
 0x674   : > { %v3526_v38 = vsub.f32 %v3518_v11, %v3525_v37 }
 0x676   : > { %3527 = vst [vmem:[%s557_s28] sm:$0x1] %v3526_v38 }
 0x677   : > { %5506 = shalt.err (!%p5503_p8)
}
 0x678   : > { %5139 = dma.vmem_to_hbm [thread:$0]  (%p5687_p5), %s3540_s24, 16, %s3542_s20, %s3529_s13  }
 0x679 PF: > { %s6530_s25 = sld [smem:[#allocation25_spill]] }
 0x67a   : > { %s6531_s19 = sld [smem:[#allocation23_spill]] }
 0x67f   : > { %p5186_p9 = scmp.ge.s32.totalorder %s6530_s25, 2 }
 0x680   : > { %s3553_s17 = sand.u32 1, %s6531_s19  }
 0x681   : > { %p5167_p10 = pnand %p5186_p9, %p5691_p6  ;;  %s3554_s27 = scalar_lea.sflag [#allocation4], %s3553_s17 }
 0x683   : > { %p5168_p11 = pneg %p5167_p10 }
 0x685   : > { %5544 = dma.done.wait (%p5168_p11), %s3554_s27, 16  }
 0x686   : > { %5546 = vsyncadd (%p5168_p11), %s3554_s27, 4294967280  ;;  %s6533_s28 = sld [smem:[#allocation26_spill]]  ;;  %s6536_s25 = smov %s5553_s26 }
 0x687   : > { %s6534_s22 = sld [smem:[#allocation24_spill]] }
 0x688   : > { %s6535_s27 = sld [smem:[#allocation27_spill]] }
 0x68c   : > { %p28_p12 = scmp.ge.s32.totalorder %s6533_s28, 4  }
 0x68d   : > { %s6537_s26 = smov %s6534_s22 }
 0x68e   :  { %30 = sbr.rel (!%p28_p12) target bundleno = 12 (0xc), region = 140 }
 0x693   :  { %3559 = vsyncpa [#allocation3], 1 }
 0x694   :  { %3561 = vsyncpa [#allocation3 + $0x1], 1 }
 0x695   :  { %3562 = vsyncpa [#allocation6], 1 }
 0x696   :  { %3563 = vsyncpa [#allocation9], 1 }
 0x697   :  { %3564 = vsyncpa [#allocation12], 1 }
 0x698   :  { %3565 = vsyncpa [#allocation15], 1 }
 0x699   :  { %3566 = vsyncpa [#allocation4], 1 }
 0x69a   :  { %3568 = vsyncpa [#allocation4 + $0x1], 1 }

</bundles_post_ra>
